<compile_context>
chip_gen: v6e
topology: v6e:2x2x1
jax: 0.10.0
libtpu: 0.0.40
codegen_flags: <defaults>
</compile_context>

<pallas_src>
import functools

import jax
import jax.numpy as jnp
import numpy as np
from jax.experimental import pallas as pl
from jax.experimental.pallas import tpu as pltpu

EPS = 1e-5
SUBLANE = 8
DEFAULT_TILE_M = 512                  # v7x-safe: ~8 MiB double-buffered at K=9*256 bf16
VMEM_LIMIT_BYTES = 32 * 1024 * 1024   # raises v5e's 16 MiB scoped default


def _round_up(x, m):
    return ((x + m - 1) // m) * m


# ----------------------------------------------------------------------------
# Pallas kernel: fused matmul + per-column scale/bias (+residual) + activation
# ----------------------------------------------------------------------------
def _fused_matmul_kernel(*refs, act, has_scale, has_res):
    it = iter(refs)
    a_ref = next(it)
    b_ref = next(it)
    scale_ref = next(it) if has_scale else None
    bias_ref = next(it)
    res_ref = next(it) if has_res else None
    o_ref = next(it)

    # MXU matmul (bf16 operands in the perf path), f32 accumulation.
    acc = jnp.dot(a_ref[...], b_ref[...], preferred_element_type=jnp.float32)
    if has_scale:
        acc = acc * scale_ref[...]
    acc = acc + bias_ref[...]
    if has_res:
        acc = acc + res_ref[...].astype(jnp.float32)
    if act == "relu":
        acc = jnp.maximum(acc, 0.0)
    elif act == "tanh":
        acc = jnp.tanh(acc)
    o_ref[...] = acc.astype(o_ref.dtype)


def fused_matmul(a, b, bias, scale=None, residual=None, act="none",
                 out_dtype=jnp.float32, compute_dtype=jnp.bfloat16,
                 tile_m=DEFAULT_TILE_M):
    """out = act((a @ b) * scale + bias [+ residual]);  a:(M,K)  b:(K,N).

    Grid tiles M (double-buffered, "parallel" for megacore); K and N are carried
    as full-dim blocks so any K/N is legal (weights are pre-padded where it
    matters for lane density).
    """
    M, K = a.shape
    Kb, N = b.shape
    assert K == Kb, (K, Kb)

    a = a.astype(compute_dtype)
    b = b.astype(compute_dtype)
    bias2 = bias.reshape(1, N).astype(jnp.float32)
    scale2 = None if scale is None else scale.reshape(1, N).astype(jnp.float32)

    # M tile: multiple of the sublane width; whole (padded) M for tiny inputs.
    tm = min(int(tile_m), _round_up(M, SUBLANE))
    Mp = _round_up(M, tm)
    if Mp != M:
        a = jnp.pad(a, ((0, Mp - M), (0, 0)))
        if residual is not None:
            residual = jnp.pad(residual, ((0, Mp - M), (0, 0)))

    args = [a, b]
    in_specs = [pl.BlockSpec((tm, K), lambda i: (i, 0)),
                pl.BlockSpec((K, N), lambda i: (0, 0))]
    if scale2 is not None:
        args.append(scale2)
        in_specs.append(pl.BlockSpec((1, N), lambda i: (0, 0)))
    args.append(bias2)
    in_specs.append(pl.BlockSpec((1, N), lambda i: (0, 0)))
    if residual is not None:
        args.append(residual.astype(compute_dtype))
        in_specs.append(pl.BlockSpec((tm, N), lambda i: (i, 0)))

    kernel = functools.partial(_fused_matmul_kernel, act=act,
                               has_scale=scale2 is not None,
                               has_res=residual is not None)

    out = pl.pallas_call(
        kernel,
        out_shape=jax.ShapeDtypeStruct((Mp, N), out_dtype),
        grid=(Mp // tm,),
        in_specs=in_specs,
        out_specs=pl.BlockSpec((tm, N), lambda i: (i, 0)),
        compiler_params=pltpu.CompilerParams(
            dimension_semantics=("parallel",),
            vmem_limit_bytes=VMEM_LIMIT_BYTES),
    )(*args)
    return out[:M] if Mp != M else out


# ----------------------------------------------------------------------------
# Glue (plain JAX): im2col + one-time parameter preparation
# ----------------------------------------------------------------------------
def im2col_3x3(x_nhwc):
    """(N,H,W,C) -> (N*H*W, 9*C), column order (ky, kx, c)."""
    N, H, W, C = x_nhwc.shape
    xp = jnp.pad(x_nhwc, ((0, 0), (1, 1), (1, 1), (0, 0)))
    cols = [xp[:, ky:ky + H, kx:kx + W, :] for ky in range(3) for kx in range(3)]
    return jnp.concatenate(cols, axis=-1).reshape(N * H * W, 9 * C)


def _bn_fold(conv_b, bn):
    s = bn["gamma"] / jnp.sqrt(bn["var"] + EPS)
    bias = (conv_b - bn["mean"]) * s + bn["beta"]
    return s.astype(jnp.float32), bias.astype(jnp.float32)


def _prep_conv3x3(w_oihw, conv_b, bn, cout_pad, cin_pad=None,
                  compute_dtype=jnp.bfloat16):
    cout, cin = w_oihw.shape[0], w_oihw.shape[1]
    s, b = _bn_fold(conv_b, bn)
    # (O,I,3,3) -> (ky,kx,ci,co) -> (9*ci, co); matches im2col column order.
    w = jnp.transpose(w_oihw, (2, 3, 1, 0)).reshape(9 * cin, cout)
    if cin_pad is not None and cin_pad != cin:
        w = w.reshape(9, cin, cout)
        w = jnp.pad(w, ((0, 0), (0, cin_pad - cin), (0, 0)))
        w = w.reshape(9 * cin_pad, cout)
    if cout_pad != cout:
        w = jnp.pad(w, ((0, 0), (0, cout_pad - cout)))
        s = jnp.pad(s, (0, cout_pad - cout), constant_values=1.0)
        b = jnp.pad(b, (0, cout_pad - cout))            # pad channels stay exactly 0
    return {"w": w.astype(compute_dtype), "scale": s, "bias": b}


def _prep_head_conv(ph, vh, cin_pad, compute_dtype):
    """Fuse the policy (Cout=2) and value (Cout=1) 1x1 convs into one matmul."""
    pw = ph["conv_w"].reshape(ph["conv_w"].shape[0], -1)   # (2, nf)
    vw = vh["conv_w"].reshape(vh["conv_w"].shape[0], -1)   # (1, nf)
    ps, pb = _bn_fold(ph["conv_b"], ph["bn"])
    vs, vb = _bn_fold(vh["conv_b"], vh["bn"])
    w = jnp.concatenate([pw, vw], axis=0).T                 # (nf, 3)
    if cin_pad != w.shape[0]:
        w = jnp.pad(w, ((0, cin_pad - w.shape[0]), (0, 0)))
    return {"w": w.astype(compute_dtype),
            "scale": jnp.concatenate([ps, vs]),
            "bias": jnp.concatenate([pb, vb])}


def _prep_policy_linear(ln_w, ln_b, H, W, compute_dtype):
    """Fold the NCHW-flatten permutation into the linear weights (NHWC input)."""
    out = ln_w.shape[0]
    wp = ln_w.reshape(out, 2, H, W).transpose(0, 2, 3, 1).reshape(out, 2 * H * W)
    return {"w": wp.T.astype(compute_dtype), "bias": ln_b.astype(jnp.float32)}


def _prep_linear(w, b, compute_dtype):
    return {"w": w.T.astype(compute_dtype), "bias": b.astype(jnp.float32)}


def prepare_params(params, in_channels, num_filters, width, height,
                   compute_dtype=jnp.bfloat16, channel_align=128):
    """One-time weight prep: fold BN, transpose to matmul layout, pad, cast."""
    cf = _round_up(num_filters, channel_align)     # lane-friendly trunk width
    cl = params["conv_layer"]
    prepped = {
        "conv_layer": _prep_conv3x3(cl["w"], cl["b"], cl["bn"], cout_pad=cf,
                                    cin_pad=in_channels,
                                    compute_dtype=compute_dtype),
        "res_layers": [
            {"c1": _prep_conv3x3(rl["w1"], rl["b1"], rl["bn"], cout_pad=cf,
                                 cin_pad=cf, compute_dtype=compute_dtype),
             "c2": _prep_conv3x3(rl["w2"], rl["b2"], rl["bn"], cout_pad=cf,
                                 cin_pad=cf, compute_dtype=compute_dtype)}
            for rl in params["res_layers"]],
    }
    ph, vh = params["policy"], params["value"]
    prepped["head_conv"] = _prep_head_conv(ph, vh, cf, compute_dtype)
    prepped["policy_ln"] = _prep_policy_linear(ph["ln_w"], ph["ln_b"],
                                               height, width, compute_dtype)
    prepped["value_ln1"] = _prep_linear(vh["ln1_w"], vh["ln1_b"], compute_dtype)
    prepped["value_ln2"] = _prep_linear(vh["ln2_w"], vh["ln2_b"], compute_dtype)
    return prepped


# ----------------------------------------------------------------------------
# Network forward (Pallas)
# ----------------------------------------------------------------------------
def forward_pallas(x_nchw, p, *, compute_dtype=jnp.bfloat16,
                   act_dtype=jnp.bfloat16, tile_m=DEFAULT_TILE_M):
    Nb, _, H, W = x_nchw.shape
    x = jnp.transpose(x_nchw, (0, 2, 3, 1))                  # NHWC
    cf = p["conv_layer"]["w"].shape[1]                       # padded trunk width

    def conv3x3(x_nhwc, layer, residual=None):
        A = im2col_3x3(x_nhwc).astype(compute_dtype)
        return fused_matmul(A, layer["w"], layer["bias"], scale=layer["scale"],
                            residual=residual, act="relu",
                            out_dtype=act_dtype, compute_dtype=compute_dtype,
                            tile_m=tile_m)

    # trunk: activations kept as a flat (Nb*H*W, cf) bf16 matrix between layers
    x2 = conv3x3(x, p["conv_layer"])
    for rl in p["res_layers"]:
        h1 = conv3x3(x2.reshape(Nb, H, W, cf), rl["c1"])
        x2 = conv3x3(h1.reshape(Nb, H, W, cf), rl["c2"], residual=x2)

    # fused policy+value 1x1 conv heads: relu(bn(conv)), Cout = 2 + 1
    hc = p["head_conv"]
    heads = fused_matmul(x2, hc["w"], hc["bias"], scale=hc["scale"], act="relu",
                         out_dtype=act_dtype, compute_dtype=compute_dtype,
                         tile_m=tile_m)                      # (Nb*H*W, 3)
    heads = heads.reshape(Nb, H * W, 3)
    p_flat = heads[:, :, 0:2].reshape(Nb, 2 * H * W)   # NHWC-flat; perm folded in ln_w
    v_flat = heads[:, :, 2]                            # (Nb, H*W); C==1, order matches

    pol = p["policy_ln"]
    policy = fused_matmul(p_flat, pol["w"], pol["bias"], act="none",
                          out_dtype=jnp.float32, compute_dtype=compute_dtype,
                          tile_m=tile_m)

    v = fused_matmul(v_flat, p["value_ln1"]["w"], p["value_ln1"]["bias"],
                     act="relu", out_dtype=act_dtype, compute_dtype=compute_dtype,
                     tile_m=tile_m)
    value = fused_matmul(v, p["value_ln2"]["w"], p["value_ln2"]["bias"],
                         act="tanh", out_dtype=jnp.float32,
                         compute_dtype=compute_dtype, tile_m=tile_m)
    return policy, value


# ----------------------------------------------------------------------------
# Pure-JAX reference (mirrors PyTorch NCHW ops) for correctness checking
# ----------------------------------------------------------------------------
def _conv_ref(x, w, b, padding):
    out = jax.lax.conv_general_dilated(
        x, w, (1, 1), padding, dimension_numbers=("NCHW", "OIHW", "NCHW"))
    return out + b[None, :, None, None]


def _bn_ref(x, bn):
    s = bn["gamma"] / jnp.sqrt(bn["var"] + EPS)
    return (x - bn["mean"][None, :, None, None]) * s[None, :, None, None] \
        + bn["beta"][None, :, None, None]


def forward_ref(x, params):
    cl = params["conv_layer"]
    x = jax.nn.relu(_bn_ref(_conv_ref(x, cl["w"], cl["b"], "SAME"), cl["bn"]))
    for rl in params["res_layers"]:
        x1 = jax.nn.relu(_bn_ref(_conv_ref(x, rl["w1"], rl["b1"], "SAME"), rl["bn"]))
        x1 = _bn_ref(_conv_ref(x1, rl["w2"], rl["b2"], "SAME"), rl["bn"])
        x = jax.nn.relu(x1 + x)
    N = x.shape[0]
    ph = params["policy"]
    p = jax.nn.relu(_bn_ref(_conv_ref(x, ph["conv_w"], ph["conv_b"], "VALID"), ph["bn"]))
    policy = p.reshape(N, -1) @ ph["ln_w"].T + ph["ln_b"]
    vh = params["value"]
    v = jax.nn.relu(_bn_ref(_conv_ref(x, vh["conv_w"], vh["conv_b"], "VALID"), vh["bn"]))
    v = jax.nn.relu(v.reshape(N, -1) @ vh["ln1_w"].T + vh["ln1_b"])
    value = jnp.tanh(v @ vh["ln2_w"].T + vh["ln2_b"])
    return policy, value


# ----------------------------------------------------------------------------
# Deterministic parameter initialization (shapes match the nn.Module __init__)
# ----------------------------------------------------------------------------
def _uniform(key, shape, bound):
    return jax.random.uniform(key, shape, jnp.float32, -bound, bound)


def _init_bn(key, c):
    k1, k2, k3, k4 = jax.random.split(key, 4)
    return {
        "gamma": 1.0 + 0.1 * jax.random.normal(k1, (c,), jnp.float32),
        "beta": 0.1 * jax.random.normal(k2, (c,), jnp.float32),
        "mean": 0.1 * jax.random.normal(k3, (c,), jnp.float32),
        "var": 1.0 + 0.5 * jax.random.uniform(k4, (c,), jnp.float32),
    }


def _init_conv(key, cin, cout, k):
    kw, kb = jax.random.split(key)
    bound = 1.0 / np.sqrt(cin * k * k)
    return _uniform(kw, (cout, cin, k, k), bound), _uniform(kb, (cout,), bound)


def _init_linear(key, fin, fout):
    kw, kb = jax.random.split(key)
    bound = 1.0 / np.sqrt(fin)
    return _uniform(kw, (fout, fin), bound), _uniform(kb, (fout,), bound)


def init_params(key, in_channels, num_filters, num_blocks, width, height):
    keys = jax.random.split(key, 4 + num_blocks)
    params = {}

    kw, kbn = jax.random.split(keys[0])
    w, b = _init_conv(kw, in_channels, num_filters, 3)
    params["conv_layer"] = {"w": w, "b": b, "bn": _init_bn(kbn, num_filters)}

    res_layers = []
    for i in range(num_blocks):
        k1, k2, k3 = jax.random.split(keys[1 + i], 3)
        w1, b1 = _init_conv(k1, num_filters, num_filters, 3)
        w2, b2 = _init_conv(k2, num_filters, num_filters, 3)
        res_layers.append({"w1": w1, "b1": b1, "w2": w2, "b2": b2,
                           "bn": _init_bn(k3, num_filters)})
    params["res_layers"] = res_layers

    k1, k2, k3 = jax.random.split(keys[1 + num_blocks], 3)
    cw, cb = _init_conv(k1, num_filters, 2, 1)
    lw, lb = _init_linear(k3, 2 * width * height, width * height)
    params["policy"] = {"conv_w": cw, "conv_b": cb, "bn": _init_bn(k2, 2),
                        "ln_w": lw, "ln_b": lb}

    k1, k2, k3, k4 = jax.random.split(keys[2 + num_blocks], 4)
    cw, cb = _init_conv(k1, num_filters, 1, 1)
    l1w, l1b = _init_linear(k3, width * height, 128)
    l2w, l2b = _init_linear(k4, 128, 1)
    params["value"] = {"conv_w": cw, "conv_b": cb, "bn": _init_bn(k2, 1),
                       "ln1_w": l1w, "ln1_b": l1b, "ln2_w": l2w, "ln2_b": l2b}
    return params


# ----------------------------------------------------------------------------
if __name__ == "__main__":
    batch, in_channels, num_filters, num_blocks = 2, 4, 8, 2
    width = height = 8

    key = jax.random.PRNGKey(0)
    kp, kx = jax.random.split(key)
    params = init_params(kp, in_channels, num_filters, num_blocks, width, height)
    x = jax.random.normal(kx, (batch, in_channels, height, width), jnp.float32)

    policy_ref, value_ref = forward_ref(x, params)

    # --- strict correctness check: same Pallas path with f32 operands --------
    prep_f32 = prepare_params(params, in_channels, num_filters, width, height,
                              compute_dtype=jnp.float32)
    fwd_f32 = jax.jit(functools.partial(forward_pallas,
                                        compute_dtype=jnp.float32,
                                        act_dtype=jnp.float32))
    p32, v32 = jax.block_until_ready(fwd_f32(x, prep_f32))
    np.testing.assert_allclose(np.asarray(p32), np.asarray(policy_ref),
                               atol=5e-4, rtol=5e-4)
    np.testing.assert_allclose(np.asarray(v32), np.asarray(value_ref),
                               atol=5e-4, rtol=5e-4)

    # --- performance configuration: bf16 MXU operands + bf16 activations -----
    # (looser tolerance only reflects bf16 operand rounding; exactness of the
    #  layer math is established by the f32-operand run above)
    prep_bf16 = prepare_params(params, in_channels, num_filters, width, height,
                               compute_dtype=jnp.bfloat16)
    fwd = jax.jit(forward_pallas)
    policy, value = jax.block_until_ready(fwd(x, prep_bf16))
    np.testing.assert_allclose(np.asarray(policy), np.asarray(policy_ref),
                               atol=8e-2, rtol=8e-2)
    np.testing.assert_allclose(np.asarray(value), np.asarray(value_ref),
                               atol=8e-2, rtol=8e-2)

    assert policy.shape == (batch, width * height)
    assert value.shape == (batch, 1)
    print("KERNEL_OK")
</pallas_src>

<mosaic_0001>
module attributes {stable_mosaic.version = 11 : i64} {
  func.func @_fused_matmul_kernel(%arg0: i32, %arg1: memref<128x36xf32, #tpu.memory_space<vmem>>, %arg2: memref<36x128xf32, #tpu.memory_space<vmem>>, %arg3: memref<1x128xf32, #tpu.memory_space<vmem>>, %arg4: memref<1x128xf32, #tpu.memory_space<vmem>>, %arg5: memref<128x128xf32, #tpu.memory_space<vmem>>) attributes {dimension_semantics = [#tpu.dimension_semantics<parallel>], iteration_bounds = array<i64: 1>, scalar_prefetch = 0 : i64, scratch_operands = 0 : i64, tpu.core_type = #tpu.core_type<tc>, window_params = [{transform_indices = @transform_0, window_bounds = array<i64: 128, 36>}, {pipeline_mode = #tpu.pipeline_mode<synchronous>, transform_indices = @transform_1, window_bounds = array<i64: 36, 128>}, {pipeline_mode = #tpu.pipeline_mode<synchronous>, transform_indices = @transform_2, window_bounds = array<i64: 1, 128>}, {pipeline_mode = #tpu.pipeline_mode<synchronous>, transform_indices = @transform_3, window_bounds = array<i64: 1, 128>}, {transform_indices = @transform_4, window_bounds = array<i64: 128, 128>}]} {
    %c0 = arith.constant 0 : index
    %c0_0 = arith.constant 0 : index
    %0 = vector.load %arg1[%c0, %c0_0] : memref<128x36xf32, #tpu.memory_space<vmem>>, vector<128x36xf32>
    %c0_1 = arith.constant 0 : index
    %c0_2 = arith.constant 0 : index
    %1 = vector.load %arg2[%c0_1, %c0_2] : memref<36x128xf32, #tpu.memory_space<vmem>>, vector<36x128xf32>
    %cst = arith.constant dense<0.000000e+00> : vector<128x128xf32>
    %2 = tpu.matmul %0, %1, %cst {dimension_numbers = #tpu.dot_dimension_numbers<[1], [0], [0], [1], [0, 0, 1, 1], [], []>} : vector<128x36xf32>, vector<36x128xf32>, vector<128x128xf32> -> vector<128x128xf32>
    %c0_3 = arith.constant 0 : index
    %c0_4 = arith.constant 0 : index
    %3 = vector.load %arg3[%c0_3, %c0_4] : memref<1x128xf32, #tpu.memory_space<vmem>>, vector<1x128xf32>
    %4 = vector.broadcast %3 : vector<1x128xf32> to vector<128x128xf32>
    %5 = arith.mulf %2, %4 : vector<128x128xf32>
    %c0_5 = arith.constant 0 : index
    %c0_6 = arith.constant 0 : index
    %6 = vector.load %arg4[%c0_5, %c0_6] : memref<1x128xf32, #tpu.memory_space<vmem>>, vector<1x128xf32>
    %7 = vector.broadcast %6 : vector<1x128xf32> to vector<128x128xf32>
    %8 = arith.addf %5, %7 : vector<128x128xf32>
    %cst_7 = arith.constant 0.000000e+00 : f32
    %9 = vector.broadcast %cst_7 : f32 to vector<128x128xf32>
    %10 = arith.maximumf %8, %9 : vector<128x128xf32>
    %c0_8 = arith.constant 0 : index
    %c0_9 = arith.constant 0 : index
    %11 = vector.load %arg5[%c0_8, %c0_9] : memref<128x128xf32, #tpu.memory_space<vmem>>, vector<128x128xf32>
    tpu.vector_store %arg5[%c0_8, %c0_9], %10 {strides = array<i32>} : memref<128x128xf32, #tpu.memory_space<vmem>>, vector<128x128xf32>,
    return
  }
  func.func @transform_0(%arg0: i32) -> (i32, i32) {
    %c0_i32 = arith.constant 0 : i32
    %c0_i32_0 = arith.constant 0 : i32
    return %arg0, %c0_i32 : i32, i32
  }
  func.func @transform_1(%arg0: i32) -> (i32, i32) {
    %c0_i32 = arith.constant 0 : i32
    %c0_i32_0 = arith.constant 0 : i32
    %c0_i32_1 = arith.constant 0 : i32
    return %c0_i32, %c0_i32_0 : i32, i32
  }
  func.func @transform_2(%arg0: i32) -> (i32, i32) {
    %c0_i32 = arith.constant 0 : i32
    %c0_i32_0 = arith.constant 0 : i32
    %c0_i32_1 = arith.constant 0 : i32
    return %c0_i32, %c0_i32_0 : i32, i32
  }
  func.func @transform_3(%arg0: i32) -> (i32, i32) {
    %c0_i32 = arith.constant 0 : i32
    %c0_i32_0 = arith.constant 0 : i32
    %c0_i32_1 = arith.constant 0 : i32
    return %c0_i32, %c0_i32_0 : i32, i32
  }
  func.func @transform_4(%arg0: i32) -> (i32, i32) {
    %c0_i32 = arith.constant 0 : i32
    %c0_i32_0 = arith.constant 0 : i32
    return %arg0, %c0_i32 : i32, i32
  }
}

module attributes {stable_mosaic.version = 11 : i64} {
  func.func @_fused_matmul_kernel(%arg0: i32, %arg1: memref<128x1152xf32, #tpu.memory_space<vmem>>, %arg2: memref<1152x128xf32, #tpu.memory_space<vmem>>, %arg3: memref<1x128xf32, #tpu.memory_space<vmem>>, %arg4: memref<1x128xf32, #tpu.memory_space<vmem>>, %arg5: memref<128x128xf32, #tpu.memory_space<vmem>>, %arg6: memref<128x128xf32, #tpu.memory_space<vmem>>) attributes {dimension_semantics = [#tpu.dimension_semantics<parallel>], iteration_bounds = array<i64: 1>, scalar_prefetch = 0 : i64, scratch_operands = 0 : i64, tpu.core_type = #tpu.core_type<tc>, window_params = [{transform_indices = @transform_0, window_bounds = array<i64: 128, 1152>}, {pipeline_mode = #tpu.pipeline_mode<synchronous>, transform_indices = @transform_1, window_bounds = array<i64: 1152, 128>}, {pipeline_mode = #tpu.pipeline_mode<synchronous>, transform_indices = @transform_2, window_bounds = array<i64: 1, 128>}, {pipeline_mode = #tpu.pipeline_mode<synchronous>, transform_indices = @transform_3, window_bounds = array<i64: 1, 128>}, {transform_indices = @transform_4, window_bounds = array<i64: 128, 128>}, {transform_indices = @transform_5, window_bounds = array<i64: 128, 128>}]} {
    %c0 = arith.constant 0 : index
    %c0_0 = arith.constant 0 : index
    %0 = vector.load %arg1[%c0, %c0_0] : memref<128x1152xf32, #tpu.memory_space<vmem>>, vector<128x1152xf32>
    %c0_1 = arith.constant 0 : index
    %c0_2 = arith.constant 0 : index
    %1 = vector.load %arg2[%c0_1, %c0_2] : memref<1152x128xf32, #tpu.memory_space<vmem>>, vector<1152x128xf32>
    %cst = arith.constant dense<0.000000e+00> : vector<128x128xf32>
    %2 = tpu.matmul %0, %1, %cst {dimension_numbers = #tpu.dot_dimension_numbers<[1], [0], [0], [1], [0, 0, 1, 1], [], []>} : vector<128x1152xf32>, vector<1152x128xf32>, vector<128x128xf32> -> vector<128x128xf32>
    %c0_3 = arith.constant 0 : index
    %c0_4 = arith.constant 0 : index
    %3 = vector.load %arg3[%c0_3, %c0_4] : memref<1x128xf32, #tpu.memory_space<vmem>>, vector<1x128xf32>
    %4 = vector.broadcast %3 : vector<1x128xf32> to vector<128x128xf32>
    %5 = arith.mulf %2, %4 : vector<128x128xf32>
    %c0_5 = arith.constant 0 : index
    %c0_6 = arith.constant 0 : index
    %6 = vector.load %arg4[%c0_5, %c0_6] : memref<1x128xf32, #tpu.memory_space<vmem>>, vector<1x128xf32>
    %7 = vector.broadcast %6 : vector<1x128xf32> to vector<128x128xf32>
    %8 = arith.addf %5, %7 : vector<128x128xf32>
    %c0_7 = arith.constant 0 : index
    %c0_8 = arith.constant 0 : index
    %9 = vector.load %arg5[%c0_7, %c0_8] : memref<128x128xf32, #tpu.memory_space<vmem>>, vector<128x128xf32>
    %10 = arith.addf %8, %9 : vector<128x128xf32>
    %cst_9 = arith.constant 0.000000e+00 : f32
    %11 = vector.broadcast %cst_9 : f32 to vector<128x128xf32>
    %12 = arith.maximumf %10, %11 : vector<128x128xf32>
    %c0_10 = arith.constant 0 : index
    %c0_11 = arith.constant 0 : index
    %13 = vector.load %arg6[%c0_10, %c0_11] : memref<128x128xf32, #tpu.memory_space<vmem>>, vector<128x128xf32>
    tpu.vector_store %arg6[%c0_10, %c0_11], %12 {strides = array<i32>} : memref<128x128xf32, #tpu.memory_space<vmem>>, vector<128x128xf32>,
    return
  }
  func.func @transform_0(%arg0: i32) -> (i32, i32) {
    %c0_i32 = arith.constant 0 : i32
    %c0_i32_0 = arith.constant 0 : i32
    return %arg0, %c0_i32 : i32, i32
  }
  func.func @transform_1(%arg0: i32) -> (i32, i32) {
    %c0_i32 = arith.constant 0 : i32
    %c0_i32_0 = arith.constant 0 : i32
    %c0_i32_1 = arith.constant 0 : i32
    return %c0_i32, %c0_i32_0 : i32, i32
  }
  func.func @transform_2(%arg0: i32) -> (i32, i32) {
    %c0_i32 = arith.constant 0 : i32
    %c0_i32_0 = arith.constant 0 : i32
    %c0_i32_1 = arith.constant 0 : i32
    return %c0_i32, %c0_i32_0 : i32, i32
  }
  func.func @transform_3(%arg0: i32) -> (i32, i32) {
    %c0_i32 = arith.constant 0 : i32
    %c0_i32_0 = arith.constant 0 : i32
    %c0_i32_1 = arith.constant 0 : i32
    return %c0_i32, %c0_i32_0 : i32, i32
  }
  func.func @transform_4(%arg0: i32) -> (i32, i32) {
    %c0_i32 = arith.constant 0 : i32
    %c0_i32_0 = arith.constant 0 : i32
    return %arg0, %c0_i32 : i32, i32
  }
  func.func @transform_5(%arg0: i32) -> (i32, i32) {
    %c0_i32 = arith.constant 0 : i32
    %c0_i32_0 = arith.constant 0 : i32
    return %arg0, %c0_i32 : i32, i32
  }
}

module attributes {stable_mosaic.version = 11 : i64} {
  func.func @_fused_matmul_kernel(%arg0: i32, %arg1: memref<128x1152xf32, #tpu.memory_space<vmem>>, %arg2: memref<1152x128xf32, #tpu.memory_space<vmem>>, %arg3: memref<1x128xf32, #tpu.memory_space<vmem>>, %arg4: memref<1x128xf32, #tpu.memory_space<vmem>>, %arg5: memref<128x128xf32, #tpu.memory_space<vmem>>) attributes {dimension_semantics = [#tpu.dimension_semantics<parallel>], iteration_bounds = array<i64: 1>, scalar_prefetch = 0 : i64, scratch_operands = 0 : i64, tpu.core_type = #tpu.core_type<tc>, window_params = [{transform_indices = @transform_0, window_bounds = array<i64: 128, 1152>}, {pipeline_mode = #tpu.pipeline_mode<synchronous>, transform_indices = @transform_1, window_bounds = array<i64: 1152, 128>}, {pipeline_mode = #tpu.pipeline_mode<synchronous>, transform_indices = @transform_2, window_bounds = array<i64: 1, 128>}, {pipeline_mode = #tpu.pipeline_mode<synchronous>, transform_indices = @transform_3, window_bounds = array<i64: 1, 128>}, {transform_indices = @transform_4, window_bounds = array<i64: 128, 128>}]} {
    %c0 = arith.constant 0 : index
    %c0_0 = arith.constant 0 : index
    %0 = vector.load %arg1[%c0, %c0_0] : memref<128x1152xf32, #tpu.memory_space<vmem>>, vector<128x1152xf32>
    %c0_1 = arith.constant 0 : index
    %c0_2 = arith.constant 0 : index
    %1 = vector.load %arg2[%c0_1, %c0_2] : memref<1152x128xf32, #tpu.memory_space<vmem>>, vector<1152x128xf32>
    %cst = arith.constant dense<0.000000e+00> : vector<128x128xf32>
    %2 = tpu.matmul %0, %1, %cst {dimension_numbers = #tpu.dot_dimension_numbers<[1], [0], [0], [1], [0, 0, 1, 1], [], []>} : vector<128x1152xf32>, vector<1152x128xf32>, vector<128x128xf32> -> vector<128x128xf32>
    %c0_3 = arith.constant 0 : index
    %c0_4 = arith.constant 0 : index
    %3 = vector.load %arg3[%c0_3, %c0_4] : memref<1x128xf32, #tpu.memory_space<vmem>>, vector<1x128xf32>
    %4 = vector.broadcast %3 : vector<1x128xf32> to vector<128x128xf32>
    %5 = arith.mulf %2, %4 : vector<128x128xf32>
    %c0_5 = arith.constant 0 : index
    %c0_6 = arith.constant 0 : index
    %6 = vector.load %arg4[%c0_5, %c0_6] : memref<1x128xf32, #tpu.memory_space<vmem>>, vector<1x128xf32>
    %7 = vector.broadcast %6 : vector<1x128xf32> to vector<128x128xf32>
    %8 = arith.addf %5, %7 : vector<128x128xf32>
    %cst_7 = arith.constant 0.000000e+00 : f32
    %9 = vector.broadcast %cst_7 : f32 to vector<128x128xf32>
    %10 = arith.maximumf %8, %9 : vector<128x128xf32>
    %c0_8 = arith.constant 0 : index
    %c0_9 = arith.constant 0 : index
    %11 = vector.load %arg5[%c0_8, %c0_9] : memref<128x128xf32, #tpu.memory_space<vmem>>, vector<128x128xf32>
    tpu.vector_store %arg5[%c0_8, %c0_9], %10 {strides = array<i32>} : memref<128x128xf32, #tpu.memory_space<vmem>>, vector<128x128xf32>,
    return
  }
  func.func @transform_0(%arg0: i32) -> (i32, i32) {
    %c0_i32 = arith.constant 0 : i32
    %c0_i32_0 = arith.constant 0 : i32
    return %arg0, %c0_i32 : i32, i32
  }
  func.func @transform_1(%arg0: i32) -> (i32, i32) {
    %c0_i32 = arith.constant 0 : i32
    %c0_i32_0 = arith.constant 0 : i32
    %c0_i32_1 = arith.constant 0 : i32
    return %c0_i32, %c0_i32_0 : i32, i32
  }
  func.func @transform_2(%arg0: i32) -> (i32, i32) {
    %c0_i32 = arith.constant 0 : i32
    %c0_i32_0 = arith.constant 0 : i32
    %c0_i32_1 = arith.constant 0 : i32
    return %c0_i32, %c0_i32_0 : i32, i32
  }
  func.func @transform_3(%arg0: i32) -> (i32, i32) {
    %c0_i32 = arith.constant 0 : i32
    %c0_i32_0 = arith.constant 0 : i32
    %c0_i32_1 = arith.constant 0 : i32
    return %c0_i32, %c0_i32_0 : i32, i32
  }
  func.func @transform_4(%arg0: i32) -> (i32, i32) {
    %c0_i32 = arith.constant 0 : i32
    %c0_i32_0 = arith.constant 0 : i32
    return %arg0, %c0_i32 : i32, i32
  }
}

module attributes {stable_mosaic.version = 11 : i64} {
  func.func @_fused_matmul_kernel(%arg0: i32, %arg1: memref<128x128xf32, #tpu.memory_space<vmem>>, %arg2: memref<128x3xf32, #tpu.memory_space<vmem>>, %arg3: memref<1x3xf32, #tpu.memory_space<vmem>>, %arg4: memref<1x3xf32, #tpu.memory_space<vmem>>, %arg5: memref<128x3xf32, #tpu.memory_space<vmem>>) attributes {dimension_semantics = [#tpu.dimension_semantics<parallel>], iteration_bounds = array<i64: 1>, scalar_prefetch = 0 : i64, scratch_operands = 0 : i64, tpu.core_type = #tpu.core_type<tc>, window_params = [{transform_indices = @transform_0, window_bounds = array<i64: 128, 128>}, {pipeline_mode = #tpu.pipeline_mode<synchronous>, transform_indices = @transform_1, window_bounds = array<i64: 128, 3>}, {pipeline_mode = #tpu.pipeline_mode<synchronous>, transform_indices = @transform_2, window_bounds = array<i64: 1, 3>}, {pipeline_mode = #tpu.pipeline_mode<synchronous>, transform_indices = @transform_3, window_bounds = array<i64: 1, 3>}, {transform_indices = @transform_4, window_bounds = array<i64: 128, 3>}]} {
    %c0 = arith.constant 0 : index
    %c0_0 = arith.constant 0 : index
    %0 = vector.load %arg1[%c0, %c0_0] : memref<128x128xf32, #tpu.memory_space<vmem>>, vector<128x128xf32>
    %c0_1 = arith.constant 0 : index
    %c0_2 = arith.constant 0 : index
    %1 = vector.load %arg2[%c0_1, %c0_2] : memref<128x3xf32, #tpu.memory_space<vmem>>, vector<128x3xf32>
    %cst = arith.constant dense<0.000000e+00> : vector<128x3xf32>
    %2 = tpu.matmul %0, %1, %cst {dimension_numbers = #tpu.dot_dimension_numbers<[1], [0], [0], [1], [0, 0, 1, 1], [], []>} : vector<128x128xf32>, vector<128x3xf32>, vector<128x3xf32> -> vector<128x3xf32>
    %c0_3 = arith.constant 0 : index
    %c0_4 = arith.constant 0 : index
    %3 = vector.load %arg3[%c0_3, %c0_4] : memref<1x3xf32, #tpu.memory_space<vmem>>, vector<1x3xf32>
    %4 = vector.broadcast %3 : vector<1x3xf32> to vector<128x3xf32>
    %5 = arith.mulf %2, %4 : vector<128x3xf32>
    %c0_5 = arith.constant 0 : index
    %c0_6 = arith.constant 0 : index
    %6 = vector.load %arg4[%c0_5, %c0_6] : memref<1x3xf32, #tpu.memory_space<vmem>>, vector<1x3xf32>
    %7 = vector.broadcast %6 : vector<1x3xf32> to vector<128x3xf32>
    %8 = arith.addf %5, %7 : vector<128x3xf32>
    %cst_7 = arith.constant 0.000000e+00 : f32
    %9 = vector.broadcast %cst_7 : f32 to vector<128x3xf32>
    %10 = arith.maximumf %8, %9 : vector<128x3xf32>
    %c0_8 = arith.constant 0 : index
    %c0_9 = arith.constant 0 : index
    %11 = vector.load %arg5[%c0_8, %c0_9] : memref<128x3xf32, #tpu.memory_space<vmem>>, vector<128x3xf32>
    tpu.vector_store %arg5[%c0_8, %c0_9], %10 {strides = array<i32>} : memref<128x3xf32, #tpu.memory_space<vmem>>, vector<128x3xf32>,
    return
  }
  func.func @transform_0(%arg0: i32) -> (i32, i32) {
    %c0_i32 = arith.constant 0 : i32
    %c0_i32_0 = arith.constant 0 : i32
    return %arg0, %c0_i32 : i32, i32
  }
  func.func @transform_1(%arg0: i32) -> (i32, i32) {
    %c0_i32 = arith.constant 0 : i32
    %c0_i32_0 = arith.constant 0 : i32
    %c0_i32_1 = arith.constant 0 : i32
    return %c0_i32, %c0_i32_0 : i32, i32
  }
  func.func @transform_2(%arg0: i32) -> (i32, i32) {
    %c0_i32 = arith.constant 0 : i32
    %c0_i32_0 = arith.constant 0 : i32
    %c0_i32_1 = arith.constant 0 : i32
    return %c0_i32, %c0_i32_0 : i32, i32
  }
  func.func @transform_3(%arg0: i32) -> (i32, i32) {
    %c0_i32 = arith.constant 0 : i32
    %c0_i32_0 = arith.constant 0 : i32
    %c0_i32_1 = arith.constant 0 : i32
    return %c0_i32, %c0_i32_0 : i32, i32
  }
  func.func @transform_4(%arg0: i32) -> (i32, i32) {
    %c0_i32 = arith.constant 0 : i32
    %c0_i32_0 = arith.constant 0 : i32
    return %arg0, %c0_i32 : i32, i32
  }
}

module attributes {stable_mosaic.version = 11 : i64} {
  func.func @_fused_matmul_kernel(%arg0: i32, %arg1: memref<8x64xf32, #tpu.memory_space<vmem>>, %arg2: memref<64x128xf32, #tpu.memory_space<vmem>>, %arg3: memref<1x128xf32, #tpu.memory_space<vmem>>, %arg4: memref<8x128xf32, #tpu.memory_space<vmem>>) attributes {dimension_semantics = [#tpu.dimension_semantics<parallel>], iteration_bounds = array<i64: 1>, scalar_prefetch = 0 : i64, scratch_operands = 0 : i64, tpu.core_type = #tpu.core_type<tc>, window_params = [{transform_indices = @transform_0, window_bounds = array<i64: 8, 64>}, {pipeline_mode = #tpu.pipeline_mode<synchronous>, transform_indices = @transform_1, window_bounds = array<i64: 64, 128>}, {pipeline_mode = #tpu.pipeline_mode<synchronous>, transform_indices = @transform_2, window_bounds = array<i64: 1, 128>}, {transform_indices = @transform_3, window_bounds = array<i64: 8, 128>}]} {
    %c0 = arith.constant 0 : index
    %c0_0 = arith.constant 0 : index
    %0 = vector.load %arg1[%c0, %c0_0] : memref<8x64xf32, #tpu.memory_space<vmem>>, vector<8x64xf32>
    %c0_1 = arith.constant 0 : index
    %c0_2 = arith.constant 0 : index
    %1 = vector.load %arg2[%c0_1, %c0_2] : memref<64x128xf32, #tpu.memory_space<vmem>>, vector<64x128xf32>
    %cst = arith.constant dense<0.000000e+00> : vector<8x128xf32>
    %2 = tpu.matmul %0, %1, %cst {dimension_numbers = #tpu.dot_dimension_numbers<[1], [0], [0], [1], [0, 0, 1, 1], [], []>} : vector<8x64xf32>, vector<64x128xf32>, vector<8x128xf32> -> vector<8x128xf32>
    %c0_3 = arith.constant 0 : index
    %c0_4 = arith.constant 0 : index
    %3 = vector.load %arg3[%c0_3, %c0_4] : memref<1x128xf32, #tpu.memory_space<vmem>>, vector<1x128xf32>
    %4 = vector.broadcast %3 : vector<1x128xf32> to vector<8x128xf32>
    %5 = arith.addf %2, %4 : vector<8x128xf32>
    %cst_5 = arith.constant 0.000000e+00 : f32
    %6 = vector.broadcast %cst_5 : f32 to vector<8x128xf32>
    %7 = arith.maximumf %5, %6 : vector<8x128xf32>
    %c0_6 = arith.constant 0 : index
    %c0_7 = arith.constant 0 : index
    %8 = vector.load %arg4[%c0_6, %c0_7] : memref<8x128xf32, #tpu.memory_space<vmem>>, vector<8x128xf32>
    tpu.vector_store %arg4[%c0_6, %c0_7], %7 {strides = array<i32>} : memref<8x128xf32, #tpu.memory_space<vmem>>, vector<8x128xf32>,
    return
  }
  func.func @transform_0(%arg0: i32) -> (i32, i32) {
    %c0_i32 = arith.constant 0 : i32
    %c0_i32_0 = arith.constant 0 : i32
    return %arg0, %c0_i32 : i32, i32
  }
  func.func @transform_1(%arg0: i32) -> (i32, i32) {
    %c0_i32 = arith.constant 0 : i32
    %c0_i32_0 = arith.constant 0 : i32
    %c0_i32_1 = arith.constant 0 : i32
    return %c0_i32, %c0_i32_0 : i32, i32
  }
  func.func @transform_2(%arg0: i32) -> (i32, i32) {
    %c0_i32 = arith.constant 0 : i32
    %c0_i32_0 = arith.constant 0 : i32
    %c0_i32_1 = arith.constant 0 : i32
    return %c0_i32, %c0_i32_0 : i32, i32
  }
  func.func @transform_3(%arg0: i32) -> (i32, i32) {
    %c0_i32 = arith.constant 0 : i32
    %c0_i32_0 = arith.constant 0 : i32
    return %arg0, %c0_i32 : i32, i32
  }
}

module attributes {stable_mosaic.version = 11 : i64} {
  func.func @_fused_matmul_kernel(%arg0: i32, %arg1: memref<8x128xf32, #tpu.memory_space<vmem>>, %arg2: memref<128x1xf32, #tpu.memory_space<vmem>>, %arg3: memref<1x1xf32, #tpu.memory_space<vmem>>, %arg4: memref<8x1xf32, #tpu.memory_space<vmem>>) attributes {dimension_semantics = [#tpu.dimension_semantics<parallel>], iteration_bounds = array<i64: 1>, scalar_prefetch = 0 : i64, scratch_operands = 0 : i64, tpu.core_type = #tpu.core_type<tc>, window_params = [{transform_indices = @transform_0, window_bounds = array<i64: 8, 128>}, {pipeline_mode = #tpu.pipeline_mode<synchronous>, transform_indices = @transform_1, window_bounds = array<i64: 128, 1>}, {pipeline_mode = #tpu.pipeline_mode<synchronous>, transform_indices = @transform_2, window_bounds = array<i64: 1, 1>}, {transform_indices = @transform_3, window_bounds = array<i64: 8, 1>}]} {
    %c0 = arith.constant 0 : index
    %c0_0 = arith.constant 0 : index
    %0 = vector.load %arg1[%c0, %c0_0] : memref<8x128xf32, #tpu.memory_space<vmem>>, vector<8x128xf32>
    %c0_1 = arith.constant 0 : index
    %c0_2 = arith.constant 0 : index
    %1 = vector.load %arg2[%c0_1, %c0_2] : memref<128x1xf32, #tpu.memory_space<vmem>>, vector<128x1xf32>
    %cst = arith.constant dense<0.000000e+00> : vector<8x1xf32>
    %2 = tpu.matmul %0, %1, %cst {dimension_numbers = #tpu.dot_dimension_numbers<[1], [0], [0], [1], [0, 0, 1, 1], [], []>} : vector<8x128xf32>, vector<128x1xf32>, vector<8x1xf32> -> vector<8x1xf32>
    %c0_3 = arith.constant 0 : index
    %c0_4 = arith.constant 0 : index
    %3 = vector.load %arg3[%c0_3, %c0_4] : memref<1x1xf32, #tpu.memory_space<vmem>>, vector<1x1xf32>
    %4 = vector.broadcast %3 : vector<1x1xf32> to vector<8x1xf32>
    %5 = arith.addf %2, %4 : vector<8x1xf32>
    %6 = math.tanh %5 : vector<8x1xf32>
    %c0_5 = arith.constant 0 : index
    %c0_6 = arith.constant 0 : index
    %7 = vector.load %arg4[%c0_5, %c0_6] : memref<8x1xf32, #tpu.memory_space<vmem>>, vector<8x1xf32>
    tpu.vector_store %arg4[%c0_5, %c0_6], %6 {strides = array<i32>} : memref<8x1xf32, #tpu.memory_space<vmem>>, vector<8x1xf32>,
    return
  }
  func.func @transform_0(%arg0: i32) -> (i32, i32) {
    %c0_i32 = arith.constant 0 : i32
    %c0_i32_0 = arith.constant 0 : i32
    return %arg0, %c0_i32 : i32, i32
  }
  func.func @transform_1(%arg0: i32) -> (i32, i32) {
    %c0_i32 = arith.constant 0 : i32
    %c0_i32_0 = arith.constant 0 : i32
    %c0_i32_1 = arith.constant 0 : i32
    return %c0_i32, %c0_i32_0 : i32, i32
  }
  func.func @transform_2(%arg0: i32) -> (i32, i32) {
    %c0_i32 = arith.constant 0 : i32
    %c0_i32_0 = arith.constant 0 : i32
    %c0_i32_1 = arith.constant 0 : i32
    return %c0_i32, %c0_i32_0 : i32, i32
  }
  func.func @transform_3(%arg0: i32) -> (i32, i32) {
    %c0_i32 = arith.constant 0 : i32
    %c0_i32_0 = arith.constant 0 : i32
    return %arg0, %c0_i32 : i32, i32
  }
}

module attributes {stable_mosaic.version = 11 : i64} {
  func.func @_fused_matmul_kernel(%arg0: i32, %arg1: memref<8x128xf32, #tpu.memory_space<vmem>>, %arg2: memref<128x64xf32, #tpu.memory_space<vmem>>, %arg3: memref<1x64xf32, #tpu.memory_space<vmem>>, %arg4: memref<8x64xf32, #tpu.memory_space<vmem>>) attributes {dimension_semantics = [#tpu.dimension_semantics<parallel>], iteration_bounds = array<i64: 1>, scalar_prefetch = 0 : i64, scratch_operands = 0 : i64, tpu.core_type = #tpu.core_type<tc>, window_params = [{transform_indices = @transform_0, window_bounds = array<i64: 8, 128>}, {pipeline_mode = #tpu.pipeline_mode<synchronous>, transform_indices = @transform_1, window_bounds = array<i64: 128, 64>}, {pipeline_mode = #tpu.pipeline_mode<synchronous>, transform_indices = @transform_2, window_bounds = array<i64: 1, 64>}, {transform_indices = @transform_3, window_bounds = array<i64: 8, 64>}]} {
    %c0 = arith.constant 0 : index
    %c0_0 = arith.constant 0 : index
    %0 = vector.load %arg1[%c0, %c0_0] : memref<8x128xf32, #tpu.memory_space<vmem>>, vector<8x128xf32>
    %c0_1 = arith.constant 0 : index
    %c0_2 = arith.constant 0 : index
    %1 = vector.load %arg2[%c0_1, %c0_2] : memref<128x64xf32, #tpu.memory_space<vmem>>, vector<128x64xf32>
    %cst = arith.constant dense<0.000000e+00> : vector<8x64xf32>
    %2 = tpu.matmul %0, %1, %cst {dimension_numbers = #tpu.dot_dimension_numbers<[1], [0], [0], [1], [0, 0, 1, 1], [], []>} : vector<8x128xf32>, vector<128x64xf32>, vector<8x64xf32> -> vector<8x64xf32>
    %c0_3 = arith.constant 0 : index
    %c0_4 = arith.constant 0 : index
    %3 = vector.load %arg3[%c0_3, %c0_4] : memref<1x64xf32, #tpu.memory_space<vmem>>, vector<1x64xf32>
    %4 = vector.broadcast %3 : vector<1x64xf32> to vector<8x64xf32>
    %5 = arith.addf %2, %4 : vector<8x64xf32>
    %c0_5 = arith.constant 0 : index
    %c0_6 = arith.constant 0 : index
    %6 = vector.load %arg4[%c0_5, %c0_6] : memref<8x64xf32, #tpu.memory_space<vmem>>, vector<8x64xf32>
    tpu.vector_store %arg4[%c0_5, %c0_6], %5 {strides = array<i32>} : memref<8x64xf32, #tpu.memory_space<vmem>>, vector<8x64xf32>,
    return
  }
  func.func @transform_0(%arg0: i32) -> (i32, i32) {
    %c0_i32 = arith.constant 0 : i32
    %c0_i32_0 = arith.constant 0 : i32
    return %arg0, %c0_i32 : i32, i32
  }
  func.func @transform_1(%arg0: i32) -> (i32, i32) {
    %c0_i32 = arith.constant 0 : i32
    %c0_i32_0 = arith.constant 0 : i32
    %c0_i32_1 = arith.constant 0 : i32
    return %c0_i32, %c0_i32_0 : i32, i32
  }
  func.func @transform_2(%arg0: i32) -> (i32, i32) {
    %c0_i32 = arith.constant 0 : i32
    %c0_i32_0 = arith.constant 0 : i32
    %c0_i32_1 = arith.constant 0 : i32
    return %c0_i32, %c0_i32_0 : i32, i32
  }
  func.func @transform_3(%arg0: i32) -> (i32, i32) {
    %c0_i32 = arith.constant 0 : i32
    %c0_i32_0 = arith.constant 0 : i32
    return %arg0, %c0_i32 : i32, i32
  }
}

</mosaic_0001>

<bundles_post_ra>
// kernel: forward_pallas.9
= control target key start
LH: loop header
LB: loop body
LE: loop exit
PB: predicated region body
PF: predicated region fallthrough
CT: control target
= control target key end

     0   :  { %vm87_vm0 = vcmask 1043456   ;;  %vm38_vm1 = vcmask 293888   ;;  %s596_s1 = inlined_call_operand.vmem [shape: f32[36,128], index: 1, kind: input, shape index: {}]   ;;  %s597_s0 = inlined_call_operand.vmem [shape: f32[128,36], index: 0, kind: input, shape index: {}]   ;;  %s598_s2 = inlined_call_operand.vmem [shape: f32[1,128], index: 2, kind: input, shape index: {}]   ;;  %s599_s3 = inlined_call_operand.vmem [shape: f32[1,128], index: 3, kind: input, shape index: {}]   ;;  %s600_s4 = inlined_call_operand.vmem [shape: f32[128,128], index: 4, kind: output, shape index: {}]  }
   0x1   :  { %v37_v0 = vld [vmem:[%s596_s1 + $0x20] sm:$0xf]  ;;  %v36_v1 = vld [vmem:[%s596_s1 + $0x18] sm:$0xff]  ;;  %v35_v2 = vld [vmem:[%s596_s1 + $0x10] sm:$0xff] }
   0x2   :  { %358 = vmatprep.subr.msk.mxu0 %vm87_vm0, %v37_v0  ;;  %392 = vmatprep.subr.msk.mxu1 %vm87_vm0, %v37_v0  ;;  %v34_v3 = vld [vmem:[%s596_s1 + $0x8] sm:$0xff]  ;;  %v33_v4 = vld [vmem:[%s596_s1] sm:$0xff]  ;;  %v19_v9 = vld [vmem:[%s597_s0 + $0x10] sm:$0xff] }
   0x3   :  { %359 = vmatpush3.msk.msra.mxu0 %vm87_vm0, %v37_v0  ;;  %397 = vmatpush3.msk.msra.mxu1 %vm87_vm0, %v37_v0  ;;  %v17_v5 = vld [vmem:[%s597_s0] sm:$0xff]  ;;  %v18_v7 = vld [vmem:[%s597_s0 + $0x8] sm:$0xff]  ;;  %v27_v10 = vld [vmem:[%s597_s0 + $0x50] sm:$0xff] }
   0x4   :  { %360 = vmatprep.subr.mxu0 %v36_v1  ;;  %393 = vmatprep.subr.mxu1 %v36_v1  ;;  %v25_v6 = vld [vmem:[%s597_s0 + $0x40] sm:$0xff]  ;;  %v26_v8 = vld [vmem:[%s597_s0 + $0x48] sm:$0xff]  ;;  %v20_v11 = vld [vmem:[%s597_s0 + $0x18] sm:$0xff] }
   0x5   :  { %361 = vmatpush3.msra.mxu0 %v36_v1  ;;  %398 = vmatpush3.msra.mxu1 %v36_v1  ;;  %v28_v12 = vld [vmem:[%s597_s0 + $0x58] sm:$0xff]  ;;  %v21_v13 = vld [vmem:[%s597_s0 + $0x20] sm:$0xff]  ;;  %v22_v15 = vld [vmem:[%s597_s0 + $0x28] sm:$0xff] }
   0x6   :  { %362 = vmatprep.subr.mxu0 %v35_v2  ;;  %394 = vmatprep.subr.mxu1 %v35_v2  ;;  %v29_v14 = vld [vmem:[%s597_s0 + $0x60] sm:$0xff]  ;;  %v30_v16 = vld [vmem:[%s597_s0 + $0x68] sm:$0xff]  ;;  %v23_v17 = vld [vmem:[%s597_s0 + $0x30] sm:$0xff] }
   0x7   :  { %363 = vmatpush3.msra.mxu0 %v35_v2  ;;  %399 = vmatpush3.msra.mxu1 %v35_v2  ;;  %v31_v18 = vld [vmem:[%s597_s0 + $0x70] sm:$0xff]  ;;  %v24_v19 = vld [vmem:[%s597_s0 + $0x38] sm:$0xff]  ;;  %v509_v21 = vld [vmem:[%s598_s2] ss:$0 sm:$0xff] }
   0x8   :  { %364 = vmatprep.subr.mxu0 %v34_v3  ;;  %395 = vmatprep.subr.mxu1 %v34_v3  ;;  %v32_v20 = vld [vmem:[%s597_s0 + $0x78] sm:$0xff]  ;;  %v514_v23 = vld [vmem:[%s599_s3] ss:$0 sm:$0xff] }
   0x9   :  { %365 = vmatpush3.msra.mxu0 %v34_v3  ;;  %400 = vmatpush3.msra.mxu1 %v34_v3 }
   0xa   :  { %366 = vmatprep.subr.mxu0 %v33_v4  ;;  %396 = vmatprep.subr.mxu1 %v33_v4 }
   0xb   :  { %367 = vmatpush3.msra.mxu0 %v33_v4  ;;  %401 = vmatpush3.msra.mxu1 %v33_v4 }
   0xc   :  { %368 = vmatprep.mubr.msk.f32.mxu0 %vm38_vm1, %v17_v5  ;;  %380 = vmatprep.mubr.msk.f32.mxu1 %vm38_vm1, %v25_v6 }
   0xd   :  { %369 = vmatmul.mubr.msk.f32.vlgmr.msra.gmra.mxu0 %vm38_vm1, %v18_v7  ;;  %381 = vmatmul.mubr.msk.f32.vlgmr.msra.gmra.mxu1 %vm38_vm1, %v26_v8 }
   0xe   :  { %371 = vmatprep.mubr.msk.f32.mxu0 %vm38_vm1, %v19_v9  ;;  %383 = vmatprep.mubr.msk.f32.mxu1 %vm38_vm1, %v27_v10 }
  0x11   :  { %372 = vmatmul.mubr.msk.f32.gmra.mxu0 %vm38_vm1, %v20_v11  ;;  %384 = vmatmul.mubr.msk.f32.gmra.mxu1 %vm38_vm1, %v28_v12 }
  0x12   :  { %374 = vmatprep.mubr.msk.f32.mxu0 %vm38_vm1, %v21_v13  ;;  %386 = vmatprep.mubr.msk.f32.mxu1 %vm38_vm1, %v29_v14 }
  0x15   :  { %375 = vmatmul.mubr.msk.f32.gmra.mxu0 %vm38_vm1, %v22_v15  ;;  %387 = vmatmul.mubr.msk.f32.gmra.mxu1 %vm38_vm1, %v30_v16 }
  0x16   :  { %377 = vmatprep.mubr.msk.f32.mxu0 %vm38_vm1, %v23_v17  ;;  %389 = vmatprep.mubr.msk.f32.mxu1 %vm38_vm1, %v31_v18 }
  0x19   :  { %378 = vmatmul.mubr.msk.f32.gmra.mxu0 %vm38_vm1, %v24_v19  ;;  %390 = vmatmul.mubr.msk.f32.gmra.mxu1 %vm38_vm1, %v32_v20 }
  0xcd   :  { %v370_v22 = vpop.f32.mrf.mxu0  ;;  %v382_v24 = vpop.f32.mrf.mxu1 }
  0xce   :  { %v244_v25 = vmul.f32 %v370_v22, %v509_v21  ;;  %v252_v26 = vmul.f32 %v382_v24, %v509_v21 }
  0xcf   :  { %v157_v27 = vpop.f32.mrf.mxu0  ;;  %v197_v28 = vpop.f32.mrf.mxu1 }
  0xd0   :  { %v267_v29 = vadd.f32 %v514_v23, %v244_v25  ;;  %v275_v30 = vadd.f32 %v514_v23, %v252_v26  ;;  %v243_v31 = vmul.f32 %v509_v21, %v157_v27  ;;  %v251_v32 = vmul.f32 %v509_v21, %v197_v28 }
  0xd1   :  { %v373_v33 = vpop.f32.mrf.mxu0  ;;  %v385_v34 = vpop.f32.mrf.mxu1 }
  0xd2   :  { %v283_v35 = vmax.f32 %v267_v29, 0.0  ;;  %v291_v36 = vmax.f32 %v275_v30, 0.0  ;;  %v266_v37 = vadd.f32 %v514_v23, %v243_v31  ;;  %v274_v38 = vadd.f32 %v514_v23, %v251_v32 }
  0xd3   :  { %v246_v39 = vmul.f32 %v373_v33, %v509_v21  ;;  %v254_v40 = vmul.f32 %v385_v34, %v509_v21  ;;  %v167_v41 = vpop.f32.mrf.mxu0  ;;  %v207_v42 = vpop.f32.mrf.mxu1 }
  0xd4   :  { %299 = vst [vmem:[%s600_s4 + $0x8] sm:$0xff] %v283_v35  ;;  %307 = vst [vmem:[%s600_s4 + $0x48] sm:$0xff] %v291_v36  ;;  %v282_v43 = vmax.f32 %v266_v37, 0.0  ;;  %v290_v44 = vmax.f32 %v274_v38, 0.0  ;;  %v245_v45 = vmul.f32 %v509_v21, %v167_v41  ;;  %v253_v46 = vmul.f32 %v509_v21, %v207_v42 }
  0xd5   :  { %v269_v47 = vadd.f32 %v514_v23, %v246_v39  ;;  %v277_v48 = vadd.f32 %v514_v23, %v254_v40  ;;  %v376_v49 = vpop.f32.mrf.mxu0  ;;  %v388_v50 = vpop.f32.mrf.mxu1 }
  0xd6   :  { %298 = vst [vmem:[%s600_s4] sm:$0xff] %v282_v43  ;;  %306 = vst [vmem:[%s600_s4 + $0x40] sm:$0xff] %v290_v44  ;;  %v268_v51 = vadd.f32 %v514_v23, %v245_v45  ;;  %v276_v52 = vadd.f32 %v514_v23, %v253_v46  ;;  %v248_v53 = vmul.f32 %v376_v49, %v509_v21 }
  0xd7   :  { %v256_v54 = vmul.f32 %v388_v50, %v509_v21  ;;  %v285_v55 = vmax.f32 %v269_v47, 0.0  ;;  %v293_v56 = vmax.f32 %v277_v48, 0.0  ;;  %v177_v57 = vpop.f32.mrf.mxu0  ;;  %v217_v58 = vpop.f32.mrf.mxu1 }
  0xd8   :  { %v284_v59 = vmax.f32 %v268_v51, 0.0  ;;  %v292_v60 = vmax.f32 %v276_v52, 0.0  ;;  %v271_v61 = vadd.f32 %v514_v23, %v248_v53  ;;  %v247_v63 = vmul.f32 %v509_v21, %v177_v57 }
  0xd9   :  { %v279_v62 = vadd.f32 %v514_v23, %v256_v54  ;;  %301 = vst [vmem:[%s600_s4 + $0x18] sm:$0xff] %v285_v55  ;;  %309 = vst [vmem:[%s600_s4 + $0x58] sm:$0xff] %v293_v56  ;;  %v255_v0 = vmul.f32 %v509_v21, %v217_v58  ;;  %v379_v1 = vpop.f32.mrf.mxu0  ;;  %v391_v2 = vpop.f32.mrf.mxu1 }
  0xda   :  { %300 = vst [vmem:[%s600_s4 + $0x10] sm:$0xff] %v284_v59  ;;  %308 = vst [vmem:[%s600_s4 + $0x50] sm:$0xff] %v292_v60  ;;  %v287_v3 = vmax.f32 %v271_v61, 0.0  ;;  %v250_v5 = vmul.f32 %v379_v1, %v509_v21  ;;  %v258_v6 = vmul.f32 %v391_v2, %v509_v21  ;;  %v270_v7 = vadd.f32 %v514_v23, %v247_v63 }
  0xdb   :  { %v295_v4 = vmax.f32 %v279_v62, 0.0  ;;  %v278_v8 = vadd.f32 %v514_v23, %v255_v0  ;;  %v187_v9 = vpop.f32.mrf.mxu0  ;;  %v227_v10 = vpop.f32.mrf.mxu1 }
  0xdc   :  { %303 = vst [vmem:[%s600_s4 + $0x28] sm:$0xff] %v287_v3  ;;  %v273_v11 = vadd.f32 %v514_v23, %v250_v5  ;;  %v281_v12 = vadd.f32 %v514_v23, %v258_v6  ;;  %v249_v13 = vmul.f32 %v509_v21, %v187_v9  ;;  %v257_v14 = vmul.f32 %v509_v21, %v227_v10 }
  0xdd   :  { %311 = vst [vmem:[%s600_s4 + $0x68] sm:$0xff] %v295_v4  ;;  %v286_v15 = vmax.f32 %v270_v7, 0.0  ;;  %v294_v16 = vmax.f32 %v278_v8, 0.0 }
  0xde   :  { %v289_v17 = vmax.f32 %v273_v11, 0.0  ;;  %v297_v18 = vmax.f32 %v281_v12, 0.0  ;;  %v272_v19 = vadd.f32 %v514_v23, %v249_v13  ;;  %v280_v20 = vadd.f32 %v514_v23, %v257_v14 }
  0xdf   :  { %302 = vst [vmem:[%s600_s4 + $0x20] sm:$0xff] %v286_v15  ;;  %310 = vst [vmem:[%s600_s4 + $0x60] sm:$0xff] %v294_v16 }
  0xe0   :  { %305 = vst [vmem:[%s600_s4 + $0x38] sm:$0xff] %v289_v17  ;;  %313 = vst [vmem:[%s600_s4 + $0x78] sm:$0xff] %v297_v18  ;;  %v288_v21 = vmax.f32 %v272_v19, 0.0  ;;  %v296_v22 = vmax.f32 %v280_v20, 0.0 }
  0xe2   :  { %304 = vst [vmem:[%s600_s4 + $0x30] sm:$0xff] %v288_v21  ;;  %312 = vst [vmem:[%s600_s4 + $0x70] sm:$0xff] %v296_v22 }

// kernel: forward_pallas.14
= control target key start
LH: loop header
LB: loop body
LE: loop exit
PB: predicated region body
PF: predicated region fallthrough
CT: control target
= control target key end

     0   :  { %vm256_vm0 = vcmask 23552   ;;  %s626_s1 = inlined_call_operand.vmem [shape: f32[128,3], index: 1, kind: input, shape index: {}]   ;;  %s627_s0 = inlined_call_operand.vmem [shape: f32[128,128], index: 0, kind: input, shape index: {}]   ;;  %s628_s2 = inlined_call_operand.vmem [shape: f32[1,3], index: 2, kind: input, shape index: {}]   ;;  %s629_s3 = inlined_call_operand.vmem [shape: f32[1,3], index: 3, kind: input, shape index: {}]   ;;  %s630_s4 = inlined_call_operand.vmem [shape: f32[128,3], index: 4, kind: output, shape index: {}]  }
   0x1   :  { %v48_v0 = vld [vmem:[%s626_s1 + $0x78] sm:$0xff]  ;;  %v47_v1 = vld [vmem:[%s626_s1 + $0x70] sm:$0xff]  ;;  %v46_v2 = vld [vmem:[%s626_s1 + $0x68] sm:$0xff] }
   0x2   :  { %311 = vmatprep.subr.mxu0 %v48_v0  ;;  %367 = vmatprep.subr.mxu1 %v48_v0  ;;  %v45_v3 = vld [vmem:[%s626_s1 + $0x60] sm:$0xff]  ;;  %v44_v4 = vld [vmem:[%s626_s1 + $0x58] sm:$0xff]  ;;  %v43_v5 = vld [vmem:[%s626_s1 + $0x50] sm:$0xff] }
   0x3   :  { %312 = vmatpush3.msra.mxu0 %v48_v0  ;;  %383 = vmatpush3.msra.mxu1 %v48_v0  ;;  %v42_v6 = vld [vmem:[%s626_s1 + $0x48] sm:$0xff]  ;;  %v41_v7 = vld [vmem:[%s626_s1 + $0x40] sm:$0xff]  ;;  %v40_v8 = vld [vmem:[%s626_s1 + $0x38] sm:$0xff] }
   0x4   :  { %313 = vmatprep.subr.mxu0 %v47_v1  ;;  %368 = vmatprep.subr.mxu1 %v47_v1  ;;  %v39_v9 = vld [vmem:[%s626_s1 + $0x30] sm:$0xff]  ;;  %v38_v10 = vld [vmem:[%s626_s1 + $0x28] sm:$0xff]  ;;  %v37_v11 = vld [vmem:[%s626_s1 + $0x20] sm:$0xff] }
   0x5   :  { %314 = vmatpush3.msra.mxu0 %v47_v1  ;;  %384 = vmatpush3.msra.mxu1 %v47_v1  ;;  %v36_v12 = vld [vmem:[%s626_s1 + $0x18] sm:$0xff]  ;;  %v35_v13 = vld [vmem:[%s626_s1 + $0x10] sm:$0xff]  ;;  %v34_v14 = vld [vmem:[%s626_s1 + $0x8] sm:$0xff] }
   0x6   :  { %315 = vmatprep.subr.mxu0 %v46_v2  ;;  %369 = vmatprep.subr.mxu1 %v46_v2  ;;  %v33_v15 = vld [vmem:[%s626_s1] sm:$0xff]  ;;  %v18_v18 = vld [vmem:[%s627_s0 + $0x8] sm:$0xff]  ;;  %v19_v20 = vld [vmem:[%s627_s0 + $0x10] sm:$0xff] }
   0x7   :  { %316 = vmatpush3.msra.mxu0 %v46_v2  ;;  %385 = vmatpush3.msra.mxu1 %v46_v2  ;;  %v17_v16 = vld [vmem:[%s627_s0] sm:$0xff]  ;;  %v26_v19 = vld [vmem:[%s627_s0 + $0x48] sm:$0xff]  ;;  %v27_v21 = vld [vmem:[%s627_s0 + $0x50] sm:$0xff] }
   0x8   :  { %317 = vmatprep.subr.mxu0 %v45_v3  ;;  %370 = vmatprep.subr.mxu1 %v45_v3  ;;  %v25_v17 = vld [vmem:[%s627_s0 + $0x40] sm:$0xff]  ;;  %v20_v22 = vld [vmem:[%s627_s0 + $0x18] sm:$0xff]  ;;  %v22_v26 = vld [vmem:[%s627_s0 + $0x28] sm:$0xff] }
   0x9   :  { %318 = vmatpush3.msra.mxu0 %v45_v3  ;;  %386 = vmatpush3.msra.mxu1 %v45_v3  ;;  %v28_v23 = vld [vmem:[%s627_s0 + $0x58] sm:$0xff]  ;;  %v21_v24 = vld [vmem:[%s627_s0 + $0x20] sm:$0xff]  ;;  %v30_v27 = vld [vmem:[%s627_s0 + $0x68] sm:$0xff] }
   0xa   :  { %319 = vmatprep.subr.mxu0 %v44_v4  ;;  %371 = vmatprep.subr.mxu1 %v44_v4  ;;  %v29_v25 = vld [vmem:[%s627_s0 + $0x60] sm:$0xff]  ;;  %v23_v28 = vld [vmem:[%s627_s0 + $0x30] sm:$0xff]  ;;  %v24_v30 = vld [vmem:[%s627_s0 + $0x38] sm:$0xff] }
   0xb   :  { %320 = vmatpush3.msra.mxu0 %v44_v4  ;;  %387 = vmatpush3.msra.mxu1 %v44_v4  ;;  %v31_v29 = vld [vmem:[%s627_s0 + $0x70] sm:$0xff]  ;;  %v32_v31 = vld [vmem:[%s627_s0 + $0x78] sm:$0xff]  ;;  %v523_v32 = vld [vmem:[%s628_s2] ss:$0 sm:$0xff] }
   0xc   :  { %321 = vmatprep.subr.mxu0 %v43_v5  ;;  %372 = vmatprep.subr.mxu1 %v43_v5  ;;  %v528_v34 = vld [vmem:[%s629_s3] ss:$0 sm:$0xff] }
   0xd   :  { %322 = vmatpush3.msra.mxu0 %v43_v5  ;;  %388 = vmatpush3.msra.mxu1 %v43_v5 }
   0xe   :  { %323 = vmatprep.subr.mxu0 %v42_v6  ;;  %373 = vmatprep.subr.mxu1 %v42_v6 }
   0xf   :  { %324 = vmatpush3.msra.mxu0 %v42_v6  ;;  %389 = vmatpush3.msra.mxu1 %v42_v6 }
  0x10   :  { %325 = vmatprep.subr.mxu0 %v41_v7  ;;  %374 = vmatprep.subr.mxu1 %v41_v7 }
  0x11   :  { %326 = vmatpush3.msra.mxu0 %v41_v7  ;;  %390 = vmatpush3.msra.mxu1 %v41_v7 }
  0x12   :  { %327 = vmatprep.subr.mxu0 %v40_v8  ;;  %375 = vmatprep.subr.mxu1 %v40_v8 }
  0x13   :  { %328 = vmatpush3.msra.mxu0 %v40_v8  ;;  %391 = vmatpush3.msra.mxu1 %v40_v8 }
  0x14   :  { %329 = vmatprep.subr.mxu0 %v39_v9  ;;  %376 = vmatprep.subr.mxu1 %v39_v9 }
  0x15   :  { %330 = vmatpush3.msra.mxu0 %v39_v9  ;;  %392 = vmatpush3.msra.mxu1 %v39_v9 }
  0x16   :  { %331 = vmatprep.subr.mxu0 %v38_v10  ;;  %377 = vmatprep.subr.mxu1 %v38_v10 }
  0x17   :  { %332 = vmatpush3.msra.mxu0 %v38_v10  ;;  %393 = vmatpush3.msra.mxu1 %v38_v10 }
  0x18   :  { %333 = vmatprep.subr.mxu0 %v37_v11  ;;  %378 = vmatprep.subr.mxu1 %v37_v11 }
  0x19   :  { %334 = vmatpush3.msra.mxu0 %v37_v11  ;;  %394 = vmatpush3.msra.mxu1 %v37_v11 }
  0x1a   :  { %335 = vmatprep.subr.mxu0 %v36_v12  ;;  %379 = vmatprep.subr.mxu1 %v36_v12 }
  0x1b   :  { %336 = vmatpush3.msra.mxu0 %v36_v12  ;;  %395 = vmatpush3.msra.mxu1 %v36_v12 }
  0x1c   :  { %337 = vmatprep.subr.mxu0 %v35_v13  ;;  %380 = vmatprep.subr.mxu1 %v35_v13 }
  0x1d   :  { %338 = vmatpush3.msra.mxu0 %v35_v13  ;;  %396 = vmatpush3.msra.mxu1 %v35_v13 }
  0x1e   :  { %339 = vmatprep.subr.mxu0 %v34_v14  ;;  %381 = vmatprep.subr.mxu1 %v34_v14 }
  0x1f   :  { %340 = vmatpush3.msra.mxu0 %v34_v14  ;;  %397 = vmatpush3.msra.mxu1 %v34_v14 }
  0x20   :  { %341 = vmatprep.subr.mxu0 %v33_v15  ;;  %382 = vmatprep.subr.mxu1 %v33_v15 }
  0x21   :  { %342 = vmatpush3.msra.mxu0 %v33_v15  ;;  %398 = vmatpush3.msra.mxu1 %v33_v15 }
  0x22   :  { %343 = vmatprep.mubr.f32.mxu0 %v17_v16  ;;  %355 = vmatprep.mubr.f32.mxu1 %v25_v17 }
  0x23   :  { %344 = vmatmul.mubr.f32.vlgmr.msra.gmra.mxu0 %v18_v18  ;;  %356 = vmatmul.mubr.f32.vlgmr.msra.gmra.mxu1 %v26_v19 }
  0x24   :  { %346 = vmatprep.mubr.f32.mxu0 %v19_v20  ;;  %358 = vmatprep.mubr.f32.mxu1 %v27_v21 }
  0x27   :  { %347 = vmatmul.mubr.f32.gmra.mxu0 %v20_v22  ;;  %359 = vmatmul.mubr.f32.gmra.mxu1 %v28_v23 }
  0x28   :  { %349 = vmatprep.mubr.f32.mxu0 %v21_v24  ;;  %361 = vmatprep.mubr.f32.mxu1 %v29_v25 }
  0x2b   :  { %350 = vmatmul.mubr.f32.gmra.mxu0 %v22_v26  ;;  %362 = vmatmul.mubr.f32.gmra.mxu1 %v30_v27 }
  0x2c   :  { %352 = vmatprep.mubr.f32.mxu0 %v23_v28  ;;  %364 = vmatprep.mubr.f32.mxu1 %v31_v29 }
  0x2f   :  { %353 = vmatmul.mubr.f32.gmra.mxu0 %v24_v30  ;;  %365 = vmatmul.mubr.f32.gmra.mxu1 %v32_v31 }
  0xe3   :  { %v345_v33 = vpop.f32.mrf.mxu0  ;;  %v357_v35 = vpop.f32.mrf.mxu1 }
  0xe4   :  { %v202_v36 = vmul.f32 %v345_v33, %v523_v32  ;;  %v210_v37 = vmul.f32 %v357_v35, %v523_v32 }
  0xe5   :  { %v115_v38 = vpop.f32.mrf.mxu0  ;;  %v155_v39 = vpop.f32.mrf.mxu1 }
  0xe6   :  { %v225_v40 = vadd.f32 %v528_v34, %v202_v36  ;;  %v233_v41 = vadd.f32 %v528_v34, %v210_v37  ;;  %v201_v42 = vmul.f32 %v523_v32, %v115_v38  ;;  %v209_v43 = vmul.f32 %v523_v32, %v155_v39 }
  0xe7   :  { %v348_v44 = vpop.f32.mrf.mxu0  ;;  %v360_v45 = vpop.f32.mrf.mxu1 }
  0xe8   :  { %v241_v46 = vmax.f32 %v225_v40, 0.0  ;;  %v249_v47 = vmax.f32 %v233_v41, 0.0  ;;  %v224_v48 = vadd.f32 %v528_v34, %v201_v42  ;;  %v232_v49 = vadd.f32 %v528_v34, %v209_v43 }
  0xe9   :  { %v204_v50 = vmul.f32 %v348_v44, %v523_v32  ;;  %v212_v51 = vmul.f32 %v360_v45, %v523_v32  ;;  %v125_v52 = vpop.f32.mrf.mxu0  ;;  %v165_v53 = vpop.f32.mrf.mxu1 }
  0xea   :  { %258 = vst.msk [vmem:[%s630_s4 + $0x8] sm:$0xff] %vm256_vm0, %v241_v46  ;;  %266 = vst.msk [vmem:[%s630_s4 + $0x48] sm:$0xff] %vm256_vm0, %v249_v47  ;;  %v240_v54 = vmax.f32 %v224_v48, 0.0  ;;  %v248_v55 = vmax.f32 %v232_v49, 0.0  ;;  %v203_v56 = vmul.f32 %v523_v32, %v125_v52  ;;  %v211_v57 = vmul.f32 %v523_v32, %v165_v53 }
  0xeb   :  { %v227_v58 = vadd.f32 %v528_v34, %v204_v50  ;;  %v235_v59 = vadd.f32 %v528_v34, %v212_v51  ;;  %v351_v60 = vpop.f32.mrf.mxu0  ;;  %v363_v61 = vpop.f32.mrf.mxu1 }
  0xec   :  { %257 = vst.msk [vmem:[%s630_s4] sm:$0xff] %vm256_vm0, %v240_v54  ;;  %265 = vst.msk [vmem:[%s630_s4 + $0x40] sm:$0xff] %vm256_vm0, %v248_v55  ;;  %v226_v62 = vadd.f32 %v528_v34, %v203_v56  ;;  %v234_v63 = vadd.f32 %v528_v34, %v211_v57  ;;  %v206_v0 = vmul.f32 %v351_v60, %v523_v32 }
  0xed   :  { %v214_v1 = vmul.f32 %v363_v61, %v523_v32  ;;  %v243_v2 = vmax.f32 %v227_v58, 0.0  ;;  %v251_v3 = vmax.f32 %v235_v59, 0.0  ;;  %v135_v4 = vpop.f32.mrf.mxu0  ;;  %v175_v5 = vpop.f32.mrf.mxu1 }
  0xee   :  { %v242_v6 = vmax.f32 %v226_v62, 0.0  ;;  %v250_v7 = vmax.f32 %v234_v63, 0.0  ;;  %v229_v8 = vadd.f32 %v528_v34, %v206_v0  ;;  %v205_v10 = vmul.f32 %v523_v32, %v135_v4 }
  0xef   :  { %v237_v9 = vadd.f32 %v528_v34, %v214_v1  ;;  %260 = vst.msk [vmem:[%s630_s4 + $0x18] sm:$0xff] %vm256_vm0, %v243_v2  ;;  %268 = vst.msk [vmem:[%s630_s4 + $0x58] sm:$0xff] %vm256_vm0, %v251_v3  ;;  %v213_v11 = vmul.f32 %v523_v32, %v175_v5  ;;  %v354_v12 = vpop.f32.mrf.mxu0  ;;  %v366_v13 = vpop.f32.mrf.mxu1 }
  0xf0   :  { %259 = vst.msk [vmem:[%s630_s4 + $0x10] sm:$0xff] %vm256_vm0, %v242_v6  ;;  %267 = vst.msk [vmem:[%s630_s4 + $0x50] sm:$0xff] %vm256_vm0, %v250_v7  ;;  %v245_v14 = vmax.f32 %v229_v8, 0.0  ;;  %v208_v16 = vmul.f32 %v354_v12, %v523_v32  ;;  %v216_v17 = vmul.f32 %v366_v13, %v523_v32  ;;  %v228_v18 = vadd.f32 %v528_v34, %v205_v10 }
  0xf1   :  { %v253_v15 = vmax.f32 %v237_v9, 0.0  ;;  %v236_v19 = vadd.f32 %v528_v34, %v213_v11  ;;  %v145_v20 = vpop.f32.mrf.mxu0  ;;  %v185_v21 = vpop.f32.mrf.mxu1 }
  0xf2   :  { %262 = vst.msk [vmem:[%s630_s4 + $0x28] sm:$0xff] %vm256_vm0, %v245_v14  ;;  %v231_v22 = vadd.f32 %v528_v34, %v208_v16  ;;  %v239_v23 = vadd.f32 %v528_v34, %v216_v17  ;;  %v207_v24 = vmul.f32 %v523_v32, %v145_v20  ;;  %v215_v25 = vmul.f32 %v523_v32, %v185_v21 }
  0xf3   :  { %270 = vst.msk [vmem:[%s630_s4 + $0x68] sm:$0xff] %vm256_vm0, %v253_v15  ;;  %v244_v26 = vmax.f32 %v228_v18, 0.0  ;;  %v252_v27 = vmax.f32 %v236_v19, 0.0 }
  0xf4   :  { %v247_v28 = vmax.f32 %v231_v22, 0.0  ;;  %v255_v29 = vmax.f32 %v239_v23, 0.0  ;;  %v230_v30 = vadd.f32 %v528_v34, %v207_v24  ;;  %v238_v31 = vadd.f32 %v528_v34, %v215_v25 }
  0xf5   :  { %261 = vst.msk [vmem:[%s630_s4 + $0x20] sm:$0xff] %vm256_vm0, %v244_v26  ;;  %269 = vst.msk [vmem:[%s630_s4 + $0x60] sm:$0xff] %vm256_vm0, %v252_v27 }
  0xf6   :  { %264 = vst.msk [vmem:[%s630_s4 + $0x38] sm:$0xff] %vm256_vm0, %v247_v28  ;;  %272 = vst.msk [vmem:[%s630_s4 + $0x78] sm:$0xff] %vm256_vm0, %v255_v29  ;;  %v246_v32 = vmax.f32 %v230_v30, 0.0  ;;  %v254_v33 = vmax.f32 %v238_v31, 0.0 }
  0xf8   :  { %263 = vst.msk [vmem:[%s630_s4 + $0x30] sm:$0xff] %vm256_vm0, %v246_v32  ;;  %271 = vst.msk [vmem:[%s630_s4 + $0x70] sm:$0xff] %vm256_vm0, %v254_v33 }

// kernel: forward_pallas.16
= control target key start
LH: loop header
LB: loop body
LE: loop exit
PB: predicated region body
PF: predicated region fallthrough
CT: control target
= control target key end

     0   :  { %v142_v0 = vmov 0.0   ;;  %vm143_vm0 = vmmov 0   ;;  %vm30_vm1 = vcmask 523264   ;;  %s197_s1 = inlined_call_operand.vmem [shape: f32[64,128], index: 1, kind: input, shape index: {}]   ;;  %s198_s0 = inlined_call_operand.vmem [shape: f32[8,64], index: 0, kind: input, shape index: {}]   ;;  %s199_s2 = inlined_call_operand.vmem [shape: f32[1,128], index: 2, kind: input, shape index: {}]   ;;  %s200_s3 = inlined_call_operand.vmem [shape: f32[8,128], index: 3, kind: output, shape index: {}]  }
   0x1   :  { %121 = vmatprep.subr.mxu0 %v142_v0  ;;  %v22_v1 = vld [vmem:[%s197_s1 + $0x38] sm:$0xff]  ;;  %v21_v2 = vld [vmem:[%s197_s1 + $0x30] sm:$0xff]  ;;  %137 = vmatprep.mubr.msk.f32.mxu0 %vm143_vm0, %v142_v0  ;;  %v20_v3 = vld [vmem:[%s197_s1 + $0x28] sm:$0xff] }
   0x2   :  { %122 = vmatpush3.msra.mxu0 %v22_v1  ;;  %v19_v4 = vld [vmem:[%s197_s1 + $0x20] sm:$0xff]  ;;  %v18_v5 = vld [vmem:[%s197_s1 + $0x18] sm:$0xff]  ;;  %v17_v6 = vld [vmem:[%s197_s1 + $0x10] sm:$0xff] }
   0x3   :  { %123 = vmatprep.subr.mxu0 %v142_v0  ;;  %v16_v7 = vld [vmem:[%s197_s1 + $0x8] sm:$0xff]  ;;  %v15_v8 = vld [vmem:[%s197_s1] sm:$0xff] }
   0x4   :  { %124 = vmatpush3.msra.mxu0 %v21_v2  ;;  %v14_v9 = vld [vmem:[%s198_s0] sm:$0xff] }
   0x5   :  { %125 = vmatprep.subr.mxu0 %v142_v0  ;;  %v110_v10 = vld [vmem:[%s199_s2] ss:$0 sm:$0xff] }
   0x6   :  { %126 = vmatpush3.msra.mxu0 %v20_v3 }
   0x7   :  { %127 = vmatprep.subr.mxu0 %v142_v0 }
   0x8   :  { %128 = vmatpush3.msra.mxu0 %v19_v4 }
   0x9   :  { %129 = vmatprep.subr.mxu0 %v142_v0 }
   0xa   :  { %130 = vmatpush3.msra.mxu0 %v18_v5 }
   0xb   :  { %131 = vmatprep.subr.mxu0 %v142_v0 }
   0xc   :  { %132 = vmatpush3.msra.mxu0 %v17_v6 }
   0xd   :  { %133 = vmatprep.subr.mxu0 %v142_v0 }
   0xe   :  { %134 = vmatpush3.msra.mxu0 %v16_v7 }
   0xf   :  { %135 = vmatprep.subr.mxu0 %v142_v0 }
  0x10   :  { %136 = vmatpush3.msra.mxu0 %v15_v8 }
  0x11   :  { %138 = vmatmul.mubr.msk.f32.vlgmr.msra.gmra.mxu0 %vm30_vm1, %v14_v9 }
  0xd1   :  { %v100_v11 = vpop.f32.mrf.mxu0 }
  0xd2   :  { %v101_v12 = vadd.f32 %v110_v10, %v100_v11 }
  0xd3   :  { %v139_v13 = vpop.f32.mrf.mxu0 }
  0xd4   :  { %v104_v14 = vmax.f32 %v101_v12, 0.0 }
  0xd6   :  { %105 = vst [vmem:[%s200_s3] sm:$0xff] %v104_v14 }

// kernel: forward_pallas.11
= control target key start
LH: loop header
LB: loop body
LE: loop exit
PB: predicated region body
PF: predicated region fallthrough
CT: control target
= control target key end

     0   :  { %s2744_s1 = inlined_call_operand.vmem [shape: f32[1152,128], index: 1, kind: input, shape index: {}]   ;;  %s2745_s0 = inlined_call_operand.vmem [shape: f32[128,1152], index: 0, kind: input, shape index: {}]   ;;  %s2746_s2 = inlined_call_operand.vmem [shape: f32[1,128], index: 2, kind: input, shape index: {}]   ;;  %s2747_s3 = inlined_call_operand.vmem [shape: f32[1,128], index: 3, kind: input, shape index: {}]   ;;  %s2748_s4 = inlined_call_operand.vmem [shape: f32[128,128], index: 4, kind: input, shape index: {}]   ;;  %s2749_s5 = inlined_call_operand.vmem [shape: f32[128,128], index: 5, kind: output, shape index: {}]  }
   0x1   :  { %v195_v0 = vld [vmem:[%s2744_s1 + $0xf8] sm:$0xff]  ;;  %v194_v4 = vld [vmem:[%s2744_s1 + $0xf0] sm:$0xff]  ;;  %v193_v8 = vld [vmem:[%s2744_s1 + $0xe8] sm:$0xff] }
   0x2   :  { %v227_v1 = vld [vmem:[%s2744_s1 + $0x1f8] sm:$0xff]  ;;  %1149 = vmatprep.subr.mxu0 %v195_v0  ;;  %v226_v5 = vld [vmem:[%s2744_s1 + $0x1f0] sm:$0xff]  ;;  %v225_v9 = vld [vmem:[%s2744_s1 + $0x1e8] sm:$0xff] }
   0x3   :  { %v179_v2 = vld [vmem:[%s2744_s1 + $0x78] sm:$0xff]  ;;  %1229 = vmatprep.subr.mxu1 %v227_v1  ;;  %v178_v6 = vld [vmem:[%s2744_s1 + $0x70] sm:$0xff]  ;;  %v177_v10 = vld [vmem:[%s2744_s1 + $0x68] sm:$0xff] }
   0x4   :  { %v211_v3 = vld [vmem:[%s2744_s1 + $0x178] sm:$0xff]  ;;  %1150 = vmatpush3.msra.mxu0 %v179_v2  ;;  %v210_v7 = vld [vmem:[%s2744_s1 + $0x170] sm:$0xff]  ;;  %v209_v11 = vld [vmem:[%s2744_s1 + $0x168] sm:$0xff] }
   0x5   :  { %1230 = vmatpush3.msra.mxu1 %v211_v3  ;;  %1151 = vmatprep.subr.mxu0 %v194_v4  ;;  %v192_v12 = vld [vmem:[%s2744_s1 + $0xe0] sm:$0xff]  ;;  %v191_v16 = vld [vmem:[%s2744_s1 + $0xd8] sm:$0xff]  ;;  %v190_v20 = vld [vmem:[%s2744_s1 + $0xd0] sm:$0xff] }
   0x6   :  { %1231 = vmatprep.subr.mxu1 %v226_v5  ;;  %1152 = vmatpush3.msra.mxu0 %v178_v6  ;;  %v224_v13 = vld [vmem:[%s2744_s1 + $0x1e0] sm:$0xff]  ;;  %v223_v17 = vld [vmem:[%s2744_s1 + $0x1d8] sm:$0xff]  ;;  %v222_v21 = vld [vmem:[%s2744_s1 + $0x1d0] sm:$0xff] }
   0x7   :  { %1232 = vmatpush3.msra.mxu1 %v210_v7  ;;  %1153 = vmatprep.subr.mxu0 %v193_v8  ;;  %v176_v14 = vld [vmem:[%s2744_s1 + $0x60] sm:$0xff]  ;;  %v175_v18 = vld [vmem:[%s2744_s1 + $0x58] sm:$0xff]  ;;  %v174_v22 = vld [vmem:[%s2744_s1 + $0x50] sm:$0xff] }
   0x8   :  { %1233 = vmatprep.subr.mxu1 %v225_v9  ;;  %v208_v15 = vld [vmem:[%s2744_s1 + $0x160] sm:$0xff]  ;;  %1154 = vmatpush3.msra.mxu0 %v177_v10  ;;  %v207_v19 = vld [vmem:[%s2744_s1 + $0x158] sm:$0xff]  ;;  %v206_v23 = vld [vmem:[%s2744_s1 + $0x150] sm:$0xff] }
   0x9   :  { %1234 = vmatpush3.msra.mxu1 %v209_v11  ;;  %1155 = vmatprep.subr.mxu0 %v192_v12  ;;  %v189_v24 = vld [vmem:[%s2744_s1 + $0xc8] sm:$0xff]  ;;  %v188_v28 = vld [vmem:[%s2744_s1 + $0xc0] sm:$0xff]  ;;  %v187_v32 = vld [vmem:[%s2744_s1 + $0xb8] sm:$0xff] }
   0xa   :  { %1235 = vmatprep.subr.mxu1 %v224_v13  ;;  %1156 = vmatpush3.msra.mxu0 %v176_v14  ;;  %v221_v25 = vld [vmem:[%s2744_s1 + $0x1c8] sm:$0xff]  ;;  %v220_v29 = vld [vmem:[%s2744_s1 + $0x1c0] sm:$0xff]  ;;  %v219_v33 = vld [vmem:[%s2744_s1 + $0x1b8] sm:$0xff] }
   0xb   :  { %1236 = vmatpush3.msra.mxu1 %v208_v15  ;;  %1157 = vmatprep.subr.mxu0 %v191_v16  ;;  %v173_v26 = vld [vmem:[%s2744_s1 + $0x48] sm:$0xff]  ;;  %v172_v30 = vld [vmem:[%s2744_s1 + $0x40] sm:$0xff]  ;;  %v171_v34 = vld [vmem:[%s2744_s1 + $0x38] sm:$0xff] }
   0xc   :  { %1237 = vmatprep.subr.mxu1 %v223_v17  ;;  %1158 = vmatpush3.msra.mxu0 %v175_v18  ;;  %v205_v27 = vld [vmem:[%s2744_s1 + $0x148] sm:$0xff]  ;;  %v204_v31 = vld [vmem:[%s2744_s1 + $0x140] sm:$0xff]  ;;  %v203_v35 = vld [vmem:[%s2744_s1 + $0x138] sm:$0xff] }
   0xd   :  { %1238 = vmatpush3.msra.mxu1 %v207_v19  ;;  %1159 = vmatprep.subr.mxu0 %v190_v20  ;;  %v186_v36 = vld [vmem:[%s2744_s1 + $0xb0] sm:$0xff]  ;;  %v185_v40 = vld [vmem:[%s2744_s1 + $0xa8] sm:$0xff]  ;;  %v184_v44 = vld [vmem:[%s2744_s1 + $0xa0] sm:$0xff] }
   0xe   :  { %1239 = vmatprep.subr.mxu1 %v222_v21  ;;  %1160 = vmatpush3.msra.mxu0 %v174_v22  ;;  %v218_v37 = vld [vmem:[%s2744_s1 + $0x1b0] sm:$0xff]  ;;  %v217_v41 = vld [vmem:[%s2744_s1 + $0x1a8] sm:$0xff]  ;;  %v216_v45 = vld [vmem:[%s2744_s1 + $0x1a0] sm:$0xff] }
   0xf   :  { %1240 = vmatpush3.msra.mxu1 %v206_v23  ;;  %1161 = vmatprep.subr.mxu0 %v189_v24  ;;  %v170_v38 = vld [vmem:[%s2744_s1 + $0x30] sm:$0xff]  ;;  %v169_v42 = vld [vmem:[%s2744_s1 + $0x28] sm:$0xff]  ;;  %v168_v46 = vld [vmem:[%s2744_s1 + $0x20] sm:$0xff] }
  0x10   :  { %1241 = vmatprep.subr.mxu1 %v221_v25  ;;  %1162 = vmatpush3.msra.mxu0 %v173_v26  ;;  %v202_v39 = vld [vmem:[%s2744_s1 + $0x130] sm:$0xff]  ;;  %v201_v43 = vld [vmem:[%s2744_s1 + $0x128] sm:$0xff]  ;;  %v200_v47 = vld [vmem:[%s2744_s1 + $0x120] sm:$0xff] }
  0x11   :  { %1242 = vmatpush3.msra.mxu1 %v205_v27  ;;  %1163 = vmatprep.subr.mxu0 %v188_v28  ;;  %v183_v48 = vld [vmem:[%s2744_s1 + $0x98] sm:$0xff]  ;;  %v182_v52 = vld [vmem:[%s2744_s1 + $0x90] sm:$0xff]  ;;  %v181_v56 = vld [vmem:[%s2744_s1 + $0x88] sm:$0xff] }
  0x12   :  { %1243 = vmatprep.subr.mxu1 %v220_v29  ;;  %1164 = vmatpush3.msra.mxu0 %v172_v30  ;;  %v215_v49 = vld [vmem:[%s2744_s1 + $0x198] sm:$0xff]  ;;  %v214_v53 = vld [vmem:[%s2744_s1 + $0x190] sm:$0xff]  ;;  %v213_v57 = vld [vmem:[%s2744_s1 + $0x188] sm:$0xff] }
  0x13   :  { %1244 = vmatpush3.msra.mxu1 %v204_v31  ;;  %1165 = vmatprep.subr.mxu0 %v187_v32  ;;  %v167_v50 = vld [vmem:[%s2744_s1 + $0x18] sm:$0xff]  ;;  %v166_v54 = vld [vmem:[%s2744_s1 + $0x10] sm:$0xff]  ;;  %v165_v58 = vld [vmem:[%s2744_s1 + $0x8] sm:$0xff] }
  0x14   :  { %1245 = vmatprep.subr.mxu1 %v219_v33  ;;  %1166 = vmatpush3.msra.mxu0 %v171_v34  ;;  %v199_v51 = vld [vmem:[%s2744_s1 + $0x118] sm:$0xff]  ;;  %v198_v55 = vld [vmem:[%s2744_s1 + $0x110] sm:$0xff]  ;;  %v197_v59 = vld [vmem:[%s2744_s1 + $0x108] sm:$0xff] }
  0x15   :  { %1246 = vmatpush3.msra.mxu1 %v203_v35  ;;  %1167 = vmatprep.subr.mxu0 %v186_v36  ;;  %v180_v60 = vld [vmem:[%s2744_s1 + $0x80] sm:$0xff]  ;;  %v21_v63 = vld [vmem:[%s2745_s0 + $0x8] sm:$0xff]  ;;  %v23_v1 = vld [vmem:[%s2745_s0 + $0x18] sm:$0xff] }
  0x16   :  { %1247 = vmatprep.subr.mxu1 %v218_v37  ;;  %1168 = vmatpush3.msra.mxu0 %v170_v38  ;;  %v212_v61 = vld [vmem:[%s2744_s1 + $0x180] sm:$0xff]  ;;  %v22_v3 = vld [vmem:[%s2745_s0 + $0x10] sm:$0xff]  ;;  %v259_v4 = vld [vmem:[%s2744_s1 + $0x2f8] sm:$0xff] }
  0x17   :  { %1248 = vmatpush3.msra.mxu1 %v202_v39  ;;  %1169 = vmatprep.subr.mxu0 %v185_v40  ;;  %v164_v62 = vld [vmem:[%s2744_s1] sm:$0xff]  ;;  %v291_v5 = vld [vmem:[%s2744_s1 + $0x3f8] sm:$0xff]  ;;  %v30_v8 = vld [vmem:[%s2745_s0 + $0x50] sm:$0xff] }
  0x18   :  { %1249 = vmatprep.subr.mxu1 %v217_v41  ;;  %1170 = vmatpush3.msra.mxu0 %v169_v42  ;;  %v196_v0 = vld [vmem:[%s2744_s1 + $0x100] sm:$0xff]  ;;  %v243_v6 = vld [vmem:[%s2744_s1 + $0x278] sm:$0xff]  ;;  %v29_v10 = vld [vmem:[%s2745_s0 + $0x48] sm:$0xff] }
  0x19   :  { %1250 = vmatpush3.msra.mxu1 %v201_v43  ;;  %1171 = vmatprep.subr.mxu0 %v184_v44  ;;  %v20_v2 = vld [vmem:[%s2745_s0] sm:$0xff]  ;;  %v275_v7 = vld [vmem:[%s2744_s1 + $0x378] sm:$0xff]  ;;  %v258_v12 = vld [vmem:[%s2744_s1 + $0x2f0] sm:$0xff] }
  0x1a   :  { %1251 = vmatprep.subr.mxu1 %v216_v45  ;;  %1172 = vmatpush3.msra.mxu0 %v168_v46  ;;  %v32_v9 = vld [vmem:[%s2745_s0 + $0x60] sm:$0xff]  ;;  %v31_v11 = vld [vmem:[%s2745_s0 + $0x58] sm:$0xff]  ;;  %v290_v13 = vld [vmem:[%s2744_s1 + $0x3f0] sm:$0xff] }
  0x1b   :  { %1252 = vmatpush3.msra.mxu1 %v200_v47  ;;  %1173 = vmatprep.subr.mxu0 %v183_v48  ;;  %v242_v14 = vld [vmem:[%s2744_s1 + $0x270] sm:$0xff]  ;;  %v39_v16 = vld [vmem:[%s2745_s0 + $0x98] sm:$0xff]  ;;  %v41_v17 = vld [vmem:[%s2745_s0 + $0xa8] sm:$0xff] }
  0x1c   :  { %1253 = vmatprep.subr.mxu1 %v215_v49  ;;  %1174 = vmatpush3.msra.mxu0 %v167_v50  ;;  %v274_v15 = vld [vmem:[%s2744_s1 + $0x370] sm:$0xff]  ;;  %v40_v19 = vld [vmem:[%s2745_s0 + $0xa0] sm:$0xff]  ;;  %v257_v20 = vld [vmem:[%s2744_s1 + $0x2e8] sm:$0xff] }
  0x1d   :  { %1254 = vmatpush3.msra.mxu1 %v199_v51  ;;  %1175 = vmatprep.subr.mxu0 %v182_v52  ;;  %v38_v18 = vld [vmem:[%s2745_s0 + $0x90] sm:$0xff]  ;;  %v289_v21 = vld [vmem:[%s2744_s1 + $0x3e8] sm:$0xff]  ;;  %v48_v24 = vld [vmem:[%s2745_s0 + $0xe0] sm:$0xff] }
  0x1e   :  { %1255 = vmatprep.subr.mxu1 %v214_v53  ;;  %1176 = vmatpush3.msra.mxu0 %v166_v54  ;;  %v241_v22 = vld [vmem:[%s2744_s1 + $0x268] sm:$0xff]  ;;  %v50_v25 = vld [vmem:[%s2745_s0 + $0xf0] sm:$0xff]  ;;  %v47_v26 = vld [vmem:[%s2745_s0 + $0xd8] sm:$0xff] }
  0x1f   :  { %1256 = vmatpush3.msra.mxu1 %v198_v55  ;;  %1177 = vmatprep.subr.mxu0 %v181_v56  ;;  %v273_v23 = vld [vmem:[%s2744_s1 + $0x368] sm:$0xff]  ;;  %v256_v28 = vld [vmem:[%s2744_s1 + $0x2e0] sm:$0xff]  ;;  %v59_v33 = vld [vmem:[%s2745_s0 + $0x138] sm:$0xff] }
  0x20   :  { %1257 = vmatprep.subr.mxu1 %v213_v57  ;;  %1178 = vmatpush3.msra.mxu0 %v165_v58  ;;  %v49_v27 = vld [vmem:[%s2745_s0 + $0xe8] sm:$0xff]  ;;  %v288_v29 = vld [vmem:[%s2744_s1 + $0x3e0] sm:$0xff]  ;;  %v58_v35 = vld [vmem:[%s2745_s0 + $0x130] sm:$0xff] }
  0x21   :  { %1258 = vmatpush3.msra.mxu1 %v197_v59  ;;  %1179 = vmatprep.subr.mxu0 %v180_v60  ;;  %v240_v30 = vld [vmem:[%s2744_s1 + $0x260] sm:$0xff]  ;;  %v57_v32 = vld [vmem:[%s2745_s0 + $0x128] sm:$0xff]  ;;  %v255_v36 = vld [vmem:[%s2744_s1 + $0x2d8] sm:$0xff] }
  0x22   :  { %1259 = vmatprep.subr.mxu1 %v212_v61  ;;  %1180 = vmatpush3.msra.mxu0 %v164_v62  ;;  %v272_v31 = vld [vmem:[%s2744_s1 + $0x360] sm:$0xff]  ;;  %v287_v37 = vld [vmem:[%s2744_s1 + $0x3d8] sm:$0xff]  ;;  %v66_v40 = vld [vmem:[%s2745_s0 + $0x170] sm:$0xff] }
  0x23   :  { %372 = vmatprep.mubr.f32.mxu0 %v21_v63  ;;  %1260 = vmatpush3.msra.mxu1 %v196_v0  ;;  %v56_v34 = vld [vmem:[%s2745_s0 + $0x120] sm:$0xff]  ;;  %v239_v38 = vld [vmem:[%s2744_s1 + $0x258] sm:$0xff]  ;;  %v65_v42 = vld [vmem:[%s2745_s0 + $0x168] sm:$0xff] }
  0x24   :  { %517 = vmatprep.mubr.f32.mxu1 %v23_v1  ;;  %373 = vmatmul.mubr.f32.vlgmr.msra.gmra.mxu0 %v20_v2  ;;  %v271_v39 = vld [vmem:[%s2744_s1 + $0x358] sm:$0xff]  ;;  %v68_v41 = vld [vmem:[%s2745_s0 + $0x180] sm:$0xff]  ;;  %v254_v44 = vld [vmem:[%s2744_s1 + $0x2d0] sm:$0xff] }
  0x25   :  { %518 = vmatmul.mubr.f32.vlgmr.msra.gmra.mxu1 %v22_v3  ;;  %1309 = vmatprep.subr.mxu0 %v259_v4  ;;  %v67_v43 = vld [vmem:[%s2745_s0 + $0x178] sm:$0xff]  ;;  %v286_v45 = vld [vmem:[%s2744_s1 + $0x3d0] sm:$0xff]  ;;  %v77_v49 = vld [vmem:[%s2745_s0 + $0x1c8] sm:$0xff] }
  0x26   :  { %1389 = vmatprep.subr.mxu1 %v291_v5  ;;  %1310 = vmatpush3.msra.mxu0 %v243_v6  ;;  %v238_v46 = vld [vmem:[%s2744_s1 + $0x250] sm:$0xff]  ;;  %v75_v48 = vld [vmem:[%s2745_s0 + $0x1b8] sm:$0xff]  ;;  %v76_v51 = vld [vmem:[%s2745_s0 + $0x1c0] sm:$0xff] }
  0x27   :  { %1390 = vmatpush3.msra.mxu1 %v275_v7  ;;  %377 = vmatprep.mubr.f32.mxu0 %v30_v8  ;;  %v270_v47 = vld [vmem:[%s2744_s1 + $0x350] sm:$0xff]  ;;  %v253_v52 = vld [vmem:[%s2744_s1 + $0x2c8] sm:$0xff]  ;;  %v84_v56 = vld [vmem:[%s2745_s0 + $0x200] sm:$0xff] }
  0x28   :  { %522 = vmatprep.mubr.f32.mxu1 %v32_v9  ;;  %378 = vmatmul.mubr.f32.gmra.mxu0 %v29_v10  ;;  %v74_v50 = vld [vmem:[%s2745_s0 + $0x1b0] sm:$0xff]  ;;  %v285_v53 = vld [vmem:[%s2744_s1 + $0x3c8] sm:$0xff]  ;;  %v83_v58 = vld [vmem:[%s2745_s0 + $0x1f8] sm:$0xff] }
  0x29   :  { %523 = vmatmul.mubr.f32.gmra.mxu1 %v31_v11  ;;  %1311 = vmatprep.subr.mxu0 %v258_v12  ;;  %v237_v54 = vld [vmem:[%s2744_s1 + $0x248] sm:$0xff]  ;;  %v86_v57 = vld [vmem:[%s2745_s0 + $0x210] sm:$0xff]  ;;  %v252_v60 = vld [vmem:[%s2744_s1 + $0x2c0] sm:$0xff] }
  0x2a   :  { %1391 = vmatprep.subr.mxu1 %v290_v13  ;;  %1312 = vmatpush3.msra.mxu0 %v242_v14  ;;  %v269_v55 = vld [vmem:[%s2744_s1 + $0x348] sm:$0xff]  ;;  %v284_v61 = vld [vmem:[%s2744_s1 + $0x3c0] sm:$0xff]  ;;  %v95_v1 = vld [vmem:[%s2745_s0 + $0x258] sm:$0xff] }
  0x2b   :  { %1392 = vmatpush3.msra.mxu1 %v274_v15  ;;  %382 = vmatprep.mubr.f32.mxu0 %v39_v16  ;;  %v85_v59 = vld [vmem:[%s2745_s0 + $0x208] sm:$0xff]  ;;  %v236_v62 = vld [vmem:[%s2744_s1 + $0x240] sm:$0xff]  ;;  %v94_v3 = vld [vmem:[%s2745_s0 + $0x250] sm:$0xff] }
  0x2c   :  { %527 = vmatprep.mubr.f32.mxu1 %v41_v17  ;;  %383 = vmatmul.mubr.f32.gmra.mxu0 %v38_v18  ;;  %v268_v63 = vld [vmem:[%s2744_s1 + $0x340] sm:$0xff]  ;;  %v93_v0 = vld [vmem:[%s2745_s0 + $0x248] sm:$0xff]  ;;  %v251_v4 = vld [vmem:[%s2744_s1 + $0x2b8] sm:$0xff] }
  0x2d   :  { %528 = vmatmul.mubr.f32.gmra.mxu1 %v40_v19  ;;  %1313 = vmatprep.subr.mxu0 %v257_v20  ;;  %v92_v2 = vld [vmem:[%s2745_s0 + $0x240] sm:$0xff]  ;;  %v283_v5 = vld [vmem:[%s2744_s1 + $0x3b8] sm:$0xff]  ;;  %v102_v8 = vld [vmem:[%s2745_s0 + $0x290] sm:$0xff] }
  0x2e   :  { %1393 = vmatprep.subr.mxu1 %v289_v21  ;;  %1314 = vmatpush3.msra.mxu0 %v241_v22  ;;  %v235_v6 = vld [vmem:[%s2744_s1 + $0x238] sm:$0xff]  ;;  %v104_v9 = vld [vmem:[%s2745_s0 + $0x2a0] sm:$0xff]  ;;  %v101_v10 = vld [vmem:[%s2745_s0 + $0x288] sm:$0xff] }
  0x2f   :  { %1394 = vmatpush3.msra.mxu1 %v273_v23  ;;  %387 = vmatprep.mubr.f32.mxu0 %v48_v24  ;;  %v267_v7 = vld [vmem:[%s2744_s1 + $0x338] sm:$0xff]  ;;  %v250_v12 = vld [vmem:[%s2744_s1 + $0x2b0] sm:$0xff]  ;;  %v113_v17 = vld [vmem:[%s2745_s0 + $0x2e8] sm:$0xff] }
  0x30   :  { %532 = vmatprep.mubr.f32.mxu1 %v50_v25  ;;  %388 = vmatmul.mubr.f32.gmra.mxu0 %v47_v26  ;;  %v103_v11 = vld [vmem:[%s2745_s0 + $0x298] sm:$0xff]  ;;  %v282_v13 = vld [vmem:[%s2744_s1 + $0x3b0] sm:$0xff]  ;;  %v112_v19 = vld [vmem:[%s2745_s0 + $0x2e0] sm:$0xff] }
  0x31   :  { %533 = vmatmul.mubr.f32.gmra.mxu1 %v49_v27  ;;  %1315 = vmatprep.subr.mxu0 %v256_v28  ;;  %v234_v14 = vld [vmem:[%s2744_s1 + $0x230] sm:$0xff]  ;;  %v111_v16 = vld [vmem:[%s2745_s0 + $0x2d8] sm:$0xff]  ;;  %v249_v20 = vld [vmem:[%s2744_s1 + $0x2a8] sm:$0xff] }
  0x32   :  { %1395 = vmatprep.subr.mxu1 %v288_v29  ;;  %1316 = vmatpush3.msra.mxu0 %v240_v30  ;;  %v266_v15 = vld [vmem:[%s2744_s1 + $0x330] sm:$0xff]  ;;  %v281_v21 = vld [vmem:[%s2744_s1 + $0x3a8] sm:$0xff]  ;;  %v120_v24 = vld [vmem:[%s2745_s0 + $0x320] sm:$0xff] }
  0x33   :  { %1396 = vmatpush3.msra.mxu1 %v272_v31  ;;  %392 = vmatprep.mubr.f32.mxu0 %v57_v32  ;;  %v110_v18 = vld [vmem:[%s2745_s0 + $0x2d0] sm:$0xff]  ;;  %v233_v22 = vld [vmem:[%s2744_s1 + $0x228] sm:$0xff]  ;;  %v119_v26 = vld [vmem:[%s2745_s0 + $0x318] sm:$0xff] }
  0x34   :  { %537 = vmatprep.mubr.f32.mxu1 %v59_v33  ;;  %393 = vmatmul.mubr.f32.gmra.mxu0 %v56_v34  ;;  %v265_v23 = vld [vmem:[%s2744_s1 + $0x328] sm:$0xff]  ;;  %v122_v25 = vld [vmem:[%s2745_s0 + $0x330] sm:$0xff]  ;;  %v248_v28 = vld [vmem:[%s2744_s1 + $0x2a0] sm:$0xff] }
  0x35   :  { %538 = vmatmul.mubr.f32.gmra.mxu1 %v58_v35  ;;  %1317 = vmatprep.subr.mxu0 %v255_v36  ;;  %v121_v27 = vld [vmem:[%s2745_s0 + $0x328] sm:$0xff]  ;;  %v280_v29 = vld [vmem:[%s2744_s1 + $0x3a0] sm:$0xff]  ;;  %v131_v33 = vld [vmem:[%s2745_s0 + $0x378] sm:$0xff] }
  0x36   :  { %1397 = vmatprep.subr.mxu1 %v287_v37  ;;  %1318 = vmatpush3.msra.mxu0 %v239_v38  ;;  %v232_v30 = vld [vmem:[%s2744_s1 + $0x220] sm:$0xff]  ;;  %v129_v32 = vld [vmem:[%s2745_s0 + $0x368] sm:$0xff]  ;;  %v130_v35 = vld [vmem:[%s2745_s0 + $0x370] sm:$0xff] }
  0x37   :  { %1398 = vmatpush3.msra.mxu1 %v271_v39  ;;  %397 = vmatprep.mubr.f32.mxu0 %v66_v40  ;;  %v264_v31 = vld [vmem:[%s2744_s1 + $0x320] sm:$0xff]  ;;  %v247_v36 = vld [vmem:[%s2744_s1 + $0x298] sm:$0xff]  ;;  %v138_v40 = vld [vmem:[%s2745_s0 + $0x3b0] sm:$0xff] }
  0x38   :  { %542 = vmatprep.mubr.f32.mxu1 %v68_v41  ;;  %398 = vmatmul.mubr.f32.gmra.mxu0 %v65_v42  ;;  %v128_v34 = vld [vmem:[%s2745_s0 + $0x360] sm:$0xff]  ;;  %v279_v37 = vld [vmem:[%s2744_s1 + $0x398] sm:$0xff]  ;;  %v137_v42 = vld [vmem:[%s2745_s0 + $0x3a8] sm:$0xff] }
  0x39   :  { %543 = vmatmul.mubr.f32.gmra.mxu1 %v67_v43  ;;  %1319 = vmatprep.subr.mxu0 %v254_v44  ;;  %v231_v38 = vld [vmem:[%s2744_s1 + $0x218] sm:$0xff]  ;;  %v140_v41 = vld [vmem:[%s2745_s0 + $0x3c0] sm:$0xff]  ;;  %v246_v44 = vld [vmem:[%s2744_s1 + $0x290] sm:$0xff] }
  0x3a   :  { %1399 = vmatprep.subr.mxu1 %v286_v45  ;;  %1320 = vmatpush3.msra.mxu0 %v238_v46  ;;  %v263_v39 = vld [vmem:[%s2744_s1 + $0x318] sm:$0xff]  ;;  %v278_v45 = vld [vmem:[%s2744_s1 + $0x390] sm:$0xff] }
  0x3b   :  { %1400 = vmatpush3.msra.mxu1 %v270_v47  ;;  %402 = vmatprep.mubr.f32.mxu0 %v75_v48  ;;  %v139_v43 = vld [vmem:[%s2745_s0 + $0x3b8] sm:$0xff]  ;;  %v230_v46 = vld [vmem:[%s2744_s1 + $0x210] sm:$0xff] }
  0x3c   :  { %547 = vmatprep.mubr.f32.mxu1 %v77_v49  ;;  %403 = vmatmul.mubr.f32.gmra.mxu0 %v74_v50  ;;  %v262_v47 = vld [vmem:[%s2744_s1 + $0x310] sm:$0xff]  ;;  %v147_v48 = vld [vmem:[%s2745_s0 + $0x3f8] sm:$0xff]  ;;  %v149_v49 = vld [vmem:[%s2745_s0 + $0x408] sm:$0xff] }
  0x3d   :  { %548 = vmatmul.mubr.f32.gmra.mxu1 %v76_v51  ;;  %1321 = vmatprep.subr.mxu0 %v253_v52  ;;  %v146_v50 = vld [vmem:[%s2745_s0 + $0x3f0] sm:$0xff]  ;;  %v148_v51 = vld [vmem:[%s2745_s0 + $0x400] sm:$0xff]  ;;  %v245_v52 = vld [vmem:[%s2744_s1 + $0x288] sm:$0xff] }
  0x3e   :  { %1401 = vmatprep.subr.mxu1 %v285_v53  ;;  %1322 = vmatpush3.msra.mxu0 %v237_v54  ;;  %v277_v53 = vld [vmem:[%s2744_s1 + $0x388] sm:$0xff] }
  0x3f   :  { %1402 = vmatpush3.msra.mxu1 %v269_v55  ;;  %407 = vmatprep.mubr.f32.mxu0 %v84_v56  ;;  %v229_v54 = vld [vmem:[%s2744_s1 + $0x208] sm:$0xff]  ;;  %v156_v56 = vld [vmem:[%s2745_s0 + $0x440] sm:$0xff] }
  0x40   :  { %552 = vmatprep.mubr.f32.mxu1 %v86_v57  ;;  %408 = vmatmul.mubr.f32.gmra.mxu0 %v83_v58  ;;  %v261_v55 = vld [vmem:[%s2744_s1 + $0x308] sm:$0xff]  ;;  %v158_v57 = vld [vmem:[%s2745_s0 + $0x450] sm:$0xff]  ;;  %v155_v58 = vld [vmem:[%s2745_s0 + $0x438] sm:$0xff] }
  0x41   :  { %553 = vmatmul.mubr.f32.gmra.mxu1 %v85_v59  ;;  %1323 = vmatprep.subr.mxu0 %v252_v60  ;;  %v157_v59 = vld [vmem:[%s2745_s0 + $0x448] sm:$0xff]  ;;  %v244_v60 = vld [vmem:[%s2744_s1 + $0x280] sm:$0xff] }
  0x42   :  { %1403 = vmatprep.subr.mxu1 %v284_v61  ;;  %1324 = vmatpush3.msra.mxu0 %v236_v62  ;;  %v276_v61 = vld [vmem:[%s2744_s1 + $0x380] sm:$0xff] }
  0x43   :  { %1404 = vmatpush3.msra.mxu1 %v268_v63  ;;  %412 = vmatprep.mubr.f32.mxu0 %v93_v0  ;;  %v228_v62 = vld [vmem:[%s2744_s1 + $0x200] sm:$0xff]  ;;  %v25_v0 = vld [vmem:[%s2745_s0 + $0x28] sm:$0xff] }
  0x44   :  { %557 = vmatprep.mubr.f32.mxu1 %v95_v1  ;;  %413 = vmatmul.mubr.f32.gmra.mxu0 %v92_v2  ;;  %v260_v63 = vld [vmem:[%s2744_s1 + $0x300] sm:$0xff]  ;;  %v27_v1 = vld [vmem:[%s2745_s0 + $0x38] sm:$0xff] }
  0x45   :  { %558 = vmatmul.mubr.f32.gmra.mxu1 %v94_v3  ;;  %1325 = vmatprep.subr.mxu0 %v251_v4  ;;  %v24_v2 = vld [vmem:[%s2745_s0 + $0x20] sm:$0xff]  ;;  %v26_v3 = vld [vmem:[%s2745_s0 + $0x30] sm:$0xff]  ;;  %v307_v4 = vld [vmem:[%s2744_s1 + $0x478] sm:$0xff] }
  0x46   :  { %1405 = vmatprep.subr.mxu1 %v283_v5  ;;  %1326 = vmatpush3.msra.mxu0 %v235_v6  ;;  %v34_v5 = vld [vmem:[%s2745_s0 + $0x70] sm:$0xff]  ;;  %v36_v6 = vld [vmem:[%s2745_s0 + $0x80] sm:$0xff] }
  0x47   :  { %1406 = vmatpush3.msra.mxu1 %v267_v7  ;;  %417 = vmatprep.mubr.f32.mxu0 %v102_v8  ;;  %v33_v7 = vld [vmem:[%s2745_s0 + $0x68] sm:$0xff]  ;;  %v35_v8 = vld [vmem:[%s2745_s0 + $0x78] sm:$0xff] }
  0x48   :  { %562 = vmatprep.mubr.f32.mxu1 %v104_v9  ;;  %418 = vmatmul.mubr.f32.gmra.mxu0 %v101_v10  ;;  %v306_v9 = vld [vmem:[%s2744_s1 + $0x470] sm:$0xff]  ;;  %v43_v10 = vld [vmem:[%s2745_s0 + $0xb8] sm:$0xff] }
  0x49   :  { %563 = vmatmul.mubr.f32.gmra.mxu1 %v103_v11  ;;  %1327 = vmatprep.subr.mxu0 %v250_v12  ;;  %v45_v11 = vld [vmem:[%s2745_s0 + $0xc8] sm:$0xff]  ;;  %v42_v12 = vld [vmem:[%s2745_s0 + $0xb0] sm:$0xff] }
  0x4a   :  { %1407 = vmatprep.subr.mxu1 %v282_v13  ;;  %1328 = vmatpush3.msra.mxu0 %v234_v14  ;;  %v44_v13 = vld [vmem:[%s2745_s0 + $0xc0] sm:$0xff]  ;;  %v305_v14 = vld [vmem:[%s2744_s1 + $0x468] sm:$0xff] }
  0x4b   :  { %1408 = vmatpush3.msra.mxu1 %v266_v15  ;;  %422 = vmatprep.mubr.f32.mxu0 %v111_v16  ;;  %v52_v15 = vld [vmem:[%s2745_s0 + $0x100] sm:$0xff]  ;;  %v54_v16 = vld [vmem:[%s2745_s0 + $0x110] sm:$0xff] }
  0x4c   :  { %567 = vmatprep.mubr.f32.mxu1 %v113_v17  ;;  %423 = vmatmul.mubr.f32.gmra.mxu0 %v110_v18  ;;  %v51_v17 = vld [vmem:[%s2745_s0 + $0xf8] sm:$0xff]  ;;  %v53_v18 = vld [vmem:[%s2745_s0 + $0x108] sm:$0xff] }
  0x4d   :  { %568 = vmatmul.mubr.f32.gmra.mxu1 %v112_v19  ;;  %1329 = vmatprep.subr.mxu0 %v249_v20  ;;  %v304_v19 = vld [vmem:[%s2744_s1 + $0x460] sm:$0xff]  ;;  %v61_v20 = vld [vmem:[%s2745_s0 + $0x148] sm:$0xff] }
  0x4e   :  { %1409 = vmatprep.subr.mxu1 %v281_v21  ;;  %1330 = vmatpush3.msra.mxu0 %v233_v22  ;;  %v63_v21 = vld [vmem:[%s2745_s0 + $0x158] sm:$0xff]  ;;  %v60_v22 = vld [vmem:[%s2745_s0 + $0x140] sm:$0xff] }
  0x4f   :  { %1410 = vmatpush3.msra.mxu1 %v265_v23  ;;  %427 = vmatprep.mubr.f32.mxu0 %v120_v24  ;;  %v62_v23 = vld [vmem:[%s2745_s0 + $0x150] sm:$0xff]  ;;  %v303_v24 = vld [vmem:[%s2744_s1 + $0x458] sm:$0xff] }
  0x50   :  { %572 = vmatprep.mubr.f32.mxu1 %v122_v25  ;;  %428 = vmatmul.mubr.f32.gmra.mxu0 %v119_v26  ;;  %v70_v25 = vld [vmem:[%s2745_s0 + $0x190] sm:$0xff]  ;;  %v72_v26 = vld [vmem:[%s2745_s0 + $0x1a0] sm:$0xff] }
  0x51   :  { %573 = vmatmul.mubr.f32.gmra.mxu1 %v121_v27  ;;  %1331 = vmatprep.subr.mxu0 %v248_v28  ;;  %v69_v27 = vld [vmem:[%s2745_s0 + $0x188] sm:$0xff]  ;;  %v71_v28 = vld [vmem:[%s2745_s0 + $0x198] sm:$0xff] }
  0x52   :  { %1411 = vmatprep.subr.mxu1 %v280_v29  ;;  %1332 = vmatpush3.msra.mxu0 %v232_v30  ;;  %v302_v29 = vld [vmem:[%s2744_s1 + $0x450] sm:$0xff]  ;;  %v79_v30 = vld [vmem:[%s2745_s0 + $0x1d8] sm:$0xff] }
  0x53   :  { %1412 = vmatpush3.msra.mxu1 %v264_v31  ;;  %432 = vmatprep.mubr.f32.mxu0 %v129_v32  ;;  %v81_v31 = vld [vmem:[%s2745_s0 + $0x1e8] sm:$0xff]  ;;  %v78_v32 = vld [vmem:[%s2745_s0 + $0x1d0] sm:$0xff] }
  0x54   :  { %577 = vmatprep.mubr.f32.mxu1 %v131_v33  ;;  %433 = vmatmul.mubr.f32.gmra.mxu0 %v128_v34  ;;  %v80_v33 = vld [vmem:[%s2745_s0 + $0x1e0] sm:$0xff]  ;;  %v301_v34 = vld [vmem:[%s2744_s1 + $0x448] sm:$0xff] }
  0x55   :  { %578 = vmatmul.mubr.f32.gmra.mxu1 %v130_v35  ;;  %1333 = vmatprep.subr.mxu0 %v247_v36  ;;  %v88_v35 = vld [vmem:[%s2745_s0 + $0x220] sm:$0xff]  ;;  %v90_v36 = vld [vmem:[%s2745_s0 + $0x230] sm:$0xff] }
  0x56   :  { %1413 = vmatprep.subr.mxu1 %v279_v37  ;;  %1334 = vmatpush3.msra.mxu0 %v231_v38  ;;  %v87_v37 = vld [vmem:[%s2745_s0 + $0x218] sm:$0xff]  ;;  %v89_v38 = vld [vmem:[%s2745_s0 + $0x228] sm:$0xff] }
  0x57   :  { %1414 = vmatpush3.msra.mxu1 %v263_v39  ;;  %437 = vmatprep.mubr.f32.mxu0 %v138_v40  ;;  %v300_v39 = vld [vmem:[%s2744_s1 + $0x440] sm:$0xff]  ;;  %v97_v40 = vld [vmem:[%s2745_s0 + $0x268] sm:$0xff] }
  0x58   :  { %582 = vmatprep.mubr.f32.mxu1 %v140_v41  ;;  %438 = vmatmul.mubr.f32.gmra.mxu0 %v137_v42  ;;  %v99_v41 = vld [vmem:[%s2745_s0 + $0x278] sm:$0xff]  ;;  %v96_v42 = vld [vmem:[%s2745_s0 + $0x260] sm:$0xff] }
  0x59   :  { %583 = vmatmul.mubr.f32.gmra.mxu1 %v139_v43  ;;  %1335 = vmatprep.subr.mxu0 %v246_v44  ;;  %v98_v43 = vld [vmem:[%s2745_s0 + $0x270] sm:$0xff]  ;;  %v299_v44 = vld [vmem:[%s2744_s1 + $0x438] sm:$0xff] }
  0x5a   :  { %1415 = vmatprep.subr.mxu1 %v278_v45  ;;  %1336 = vmatpush3.msra.mxu0 %v230_v46  ;;  %v106_v45 = vld [vmem:[%s2745_s0 + $0x2b0] sm:$0xff]  ;;  %v108_v46 = vld [vmem:[%s2745_s0 + $0x2c0] sm:$0xff] }
  0x5b   :  { %1416 = vmatpush3.msra.mxu1 %v262_v47  ;;  %442 = vmatprep.mubr.f32.mxu0 %v147_v48  ;;  %v105_v47 = vld [vmem:[%s2745_s0 + $0x2a8] sm:$0xff]  ;;  %v107_v48 = vld [vmem:[%s2745_s0 + $0x2b8] sm:$0xff] }
  0x5c   :  { %587 = vmatprep.mubr.f32.mxu1 %v149_v49  ;;  %443 = vmatmul.mubr.f32.gmra.mxu0 %v146_v50  ;;  %v298_v49 = vld [vmem:[%s2744_s1 + $0x430] sm:$0xff]  ;;  %v115_v50 = vld [vmem:[%s2745_s0 + $0x2f8] sm:$0xff] }
  0x5d   :  { %588 = vmatmul.mubr.f32.gmra.mxu1 %v148_v51  ;;  %1337 = vmatprep.subr.mxu0 %v245_v52  ;;  %v117_v51 = vld [vmem:[%s2745_s0 + $0x308] sm:$0xff]  ;;  %v114_v52 = vld [vmem:[%s2745_s0 + $0x2f0] sm:$0xff] }
  0x5e   :  { %1417 = vmatprep.subr.mxu1 %v277_v53  ;;  %1338 = vmatpush3.msra.mxu0 %v229_v54  ;;  %v116_v53 = vld [vmem:[%s2745_s0 + $0x300] sm:$0xff]  ;;  %v297_v54 = vld [vmem:[%s2744_s1 + $0x428] sm:$0xff] }
  0x5f   :  { %1418 = vmatpush3.msra.mxu1 %v261_v55  ;;  %447 = vmatprep.mubr.f32.mxu0 %v156_v56  ;;  %v124_v55 = vld [vmem:[%s2745_s0 + $0x340] sm:$0xff]  ;;  %v126_v56 = vld [vmem:[%s2745_s0 + $0x350] sm:$0xff] }
  0x60   :  { %592 = vmatprep.mubr.f32.mxu1 %v158_v57  ;;  %448 = vmatmul.mubr.f32.gmra.mxu0 %v155_v58  ;;  %v123_v57 = vld [vmem:[%s2745_s0 + $0x338] sm:$0xff]  ;;  %v125_v58 = vld [vmem:[%s2745_s0 + $0x348] sm:$0xff] }
  0x61   :  { %593 = vmatmul.mubr.f32.gmra.mxu1 %v157_v59  ;;  %1339 = vmatprep.subr.mxu0 %v244_v60  ;;  %v296_v59 = vld [vmem:[%s2744_s1 + $0x420] sm:$0xff]  ;;  %v133_v60 = vld [vmem:[%s2745_s0 + $0x388] sm:$0xff] }
  0x62   :  { %1419 = vmatprep.subr.mxu1 %v276_v61  ;;  %1340 = vmatpush3.msra.mxu0 %v228_v62  ;;  %v135_v61 = vld [vmem:[%s2745_s0 + $0x398] sm:$0xff]  ;;  %v132_v62 = vld [vmem:[%s2745_s0 + $0x380] sm:$0xff] }
  0x63   :  { %1420 = vmatpush3.msra.mxu1 %v260_v63  ;;  %662 = vmatprep.mubr.f32.mxu0 %v25_v0  ;;  %v134_v63 = vld [vmem:[%s2745_s0 + $0x390] sm:$0xff]  ;;  %v295_v0 = vld [vmem:[%s2744_s1 + $0x418] sm:$0xff] }
  0x64   :  { %807 = vmatprep.mubr.f32.mxu1 %v27_v1  ;;  %663 = vmatmul.mubr.f32.vlgmr.msra.gmra.mxu0 %v24_v2  ;;  %v142_v1 = vld [vmem:[%s2745_s0 + $0x3d0] sm:$0xff]  ;;  %v144_v2 = vld [vmem:[%s2745_s0 + $0x3e0] sm:$0xff] }
  0x65   :  { %808 = vmatmul.mubr.f32.vlgmr.msra.gmra.mxu1 %v26_v3  ;;  %1501 = vmatprep.subr.mxu0 %v307_v4  ;;  %v141_v3 = vld [vmem:[%s2745_s0 + $0x3c8] sm:$0xff] }
  0x66   :  { %1557 = vmatprep.subr.mxu1 %v307_v4  ;;  %1502 = vmatpush3.msra.mxu0 %v307_v4 }
  0x67   :  { %1573 = vmatpush3.msra.mxu1 %v307_v4  ;;  %667 = vmatprep.mubr.f32.mxu0 %v34_v5  ;;  %v143_v4 = vld [vmem:[%s2745_s0 + $0x3d8] sm:$0xff]  ;;  %v294_v5 = vld [vmem:[%s2744_s1 + $0x410] sm:$0xff] }
  0x68   :  { %812 = vmatprep.mubr.f32.mxu1 %v36_v6  ;;  %668 = vmatmul.mubr.f32.gmra.mxu0 %v33_v7  ;;  %v151_v6 = vld [vmem:[%s2745_s0 + $0x418] sm:$0xff]  ;;  %v153_v7 = vld [vmem:[%s2745_s0 + $0x428] sm:$0xff] }
  0x69   :  { %813 = vmatmul.mubr.f32.gmra.mxu1 %v35_v8  ;;  %1503 = vmatprep.subr.mxu0 %v306_v9  ;;  %v150_v8 = vld [vmem:[%s2745_s0 + $0x410] sm:$0xff] }
  0x6a   :  { %1558 = vmatprep.subr.mxu1 %v306_v9  ;;  %1504 = vmatpush3.msra.mxu0 %v306_v9 }
  0x6b   :  { %1574 = vmatpush3.msra.mxu1 %v306_v9  ;;  %672 = vmatprep.mubr.f32.mxu0 %v43_v10  ;;  %v152_v9 = vld [vmem:[%s2745_s0 + $0x420] sm:$0xff]  ;;  %v293_v10 = vld [vmem:[%s2744_s1 + $0x408] sm:$0xff] }
  0x6c   :  { %817 = vmatprep.mubr.f32.mxu1 %v45_v11  ;;  %673 = vmatmul.mubr.f32.gmra.mxu0 %v42_v12  ;;  %v160_v11 = vld [vmem:[%s2745_s0 + $0x460] sm:$0xff]  ;;  %v162_v12 = vld [vmem:[%s2745_s0 + $0x470] sm:$0xff] }
  0x6d   :  { %818 = vmatmul.mubr.f32.gmra.mxu1 %v44_v13  ;;  %1505 = vmatprep.subr.mxu0 %v305_v14  ;;  %v159_v13 = vld [vmem:[%s2745_s0 + $0x458] sm:$0xff] }
  0x6e   :  { %1559 = vmatprep.subr.mxu1 %v305_v14  ;;  %1506 = vmatpush3.msra.mxu0 %v305_v14 }
  0x6f   :  { %1575 = vmatpush3.msra.mxu1 %v305_v14  ;;  %677 = vmatprep.mubr.f32.mxu0 %v52_v15  ;;  %v161_v14 = vld [vmem:[%s2745_s0 + $0x468] sm:$0xff]  ;;  %v292_v15 = vld [vmem:[%s2744_s1 + $0x400] sm:$0xff] }
  0x70   :  { %822 = vmatprep.mubr.f32.mxu1 %v54_v16  ;;  %678 = vmatmul.mubr.f32.gmra.mxu0 %v51_v17  ;;  %v28_v16 = vld [vmem:[%s2745_s0 + $0x40] sm:$0xff] }
  0x71   :  { %823 = vmatmul.mubr.f32.gmra.mxu1 %v53_v18  ;;  %1507 = vmatprep.subr.mxu0 %v304_v19  ;;  %v100_v17 = vld [vmem:[%s2745_s0 + $0x280] sm:$0xff]  ;;  %v37_v18 = vld [vmem:[%s2745_s0 + $0x88] sm:$0xff] }
  0x72   :  { %1560 = vmatprep.subr.mxu1 %v304_v19  ;;  %1508 = vmatpush3.msra.mxu0 %v304_v19 }
  0x73   :  { %1576 = vmatpush3.msra.mxu1 %v304_v19  ;;  %682 = vmatprep.mubr.f32.mxu0 %v61_v20  ;;  %v109_v19 = vld [vmem:[%s2745_s0 + $0x2c8] sm:$0xff]  ;;  %v46_v20 = vld [vmem:[%s2745_s0 + $0xd0] sm:$0xff] }
  0x74   :  { %827 = vmatprep.mubr.f32.mxu1 %v63_v21  ;;  %683 = vmatmul.mubr.f32.gmra.mxu0 %v60_v22  ;;  %v118_v21 = vld [vmem:[%s2745_s0 + $0x310] sm:$0xff]  ;;  %v55_v22 = vld [vmem:[%s2745_s0 + $0x118] sm:$0xff] }
  0x75   :  { %828 = vmatmul.mubr.f32.gmra.mxu1 %v62_v23  ;;  %1509 = vmatprep.subr.mxu0 %v303_v24  ;;  %v127_v23 = vld [vmem:[%s2745_s0 + $0x358] sm:$0xff] }
  0x76   :  { %1561 = vmatprep.subr.mxu1 %v303_v24  ;;  %1510 = vmatpush3.msra.mxu0 %v303_v24 }
  0x77   :  { %1577 = vmatpush3.msra.mxu1 %v303_v24  ;;  %687 = vmatprep.mubr.f32.mxu0 %v70_v25  ;;  %v64_v24 = vld [vmem:[%s2745_s0 + $0x160] sm:$0xff] }
  0x78   :  { %832 = vmatprep.mubr.f32.mxu1 %v72_v26  ;;  %688 = vmatmul.mubr.f32.gmra.mxu0 %v69_v27  ;;  %v136_v25 = vld [vmem:[%s2745_s0 + $0x3a0] sm:$0xff]  ;;  %v73_v26 = vld [vmem:[%s2745_s0 + $0x1a8] sm:$0xff] }
  0x79   :  { %833 = vmatmul.mubr.f32.gmra.mxu1 %v71_v28  ;;  %1511 = vmatprep.subr.mxu0 %v302_v29  ;;  %v145_v27 = vld [vmem:[%s2745_s0 + $0x3e8] sm:$0xff]  ;;  %v82_v28 = vld [vmem:[%s2745_s0 + $0x1f0] sm:$0xff] }
  0x7a   :  { %1562 = vmatprep.subr.mxu1 %v302_v29  ;;  %1512 = vmatpush3.msra.mxu0 %v302_v29 }
  0x7b   :  { %1578 = vmatpush3.msra.mxu1 %v302_v29  ;;  %692 = vmatprep.mubr.f32.mxu0 %v79_v30  ;;  %v154_v29 = vld [vmem:[%s2745_s0 + $0x430] sm:$0xff]  ;;  %v91_v30 = vld [vmem:[%s2745_s0 + $0x238] sm:$0xff] }
  0x7c   :  { %837 = vmatprep.mubr.f32.mxu1 %v81_v31  ;;  %693 = vmatmul.mubr.f32.gmra.mxu0 %v78_v32  ;;  %v163_v31 = vld [vmem:[%s2745_s0 + $0x478] sm:$0xff] }
  0x7d   :  { %838 = vmatmul.mubr.f32.gmra.mxu1 %v80_v33  ;;  %1513 = vmatprep.subr.mxu0 %v301_v34 }
  0x7e   :  { %1563 = vmatprep.subr.mxu1 %v301_v34  ;;  %1514 = vmatpush3.msra.mxu0 %v301_v34 }
  0x7f   :  { %1579 = vmatpush3.msra.mxu1 %v301_v34  ;;  %697 = vmatprep.mubr.f32.mxu0 %v88_v35 }
  0x80   :  { %842 = vmatprep.mubr.f32.mxu1 %v90_v36  ;;  %698 = vmatmul.mubr.f32.gmra.mxu0 %v87_v37 }
  0x81   :  { %843 = vmatmul.mubr.f32.gmra.mxu1 %v89_v38  ;;  %1515 = vmatprep.subr.mxu0 %v300_v39 }
  0x82   :  { %1564 = vmatprep.subr.mxu1 %v300_v39  ;;  %1516 = vmatpush3.msra.mxu0 %v300_v39 }
  0x83   :  { %1580 = vmatpush3.msra.mxu1 %v300_v39  ;;  %702 = vmatprep.mubr.f32.mxu0 %v97_v40 }
  0x84   :  { %847 = vmatprep.mubr.f32.mxu1 %v99_v41  ;;  %703 = vmatmul.mubr.f32.gmra.mxu0 %v96_v42 }
  0x85   :  { %848 = vmatmul.mubr.f32.gmra.mxu1 %v98_v43  ;;  %1517 = vmatprep.subr.mxu0 %v299_v44 }
  0x86   :  { %1565 = vmatprep.subr.mxu1 %v299_v44  ;;  %1518 = vmatpush3.msra.mxu0 %v299_v44 }
  0x87   :  { %1581 = vmatpush3.msra.mxu1 %v299_v44  ;;  %707 = vmatprep.mubr.f32.mxu0 %v106_v45 }
  0x88   :  { %852 = vmatprep.mubr.f32.mxu1 %v108_v46  ;;  %708 = vmatmul.mubr.f32.gmra.mxu0 %v105_v47 }
  0x89   :  { %853 = vmatmul.mubr.f32.gmra.mxu1 %v107_v48  ;;  %1519 = vmatprep.subr.mxu0 %v298_v49 }
  0x8a   :  { %1566 = vmatprep.subr.mxu1 %v298_v49  ;;  %1520 = vmatpush3.msra.mxu0 %v298_v49 }
  0x8b   :  { %1582 = vmatpush3.msra.mxu1 %v298_v49  ;;  %712 = vmatprep.mubr.f32.mxu0 %v115_v50 }
  0x8c   :  { %857 = vmatprep.mubr.f32.mxu1 %v117_v51  ;;  %713 = vmatmul.mubr.f32.gmra.mxu0 %v114_v52 }
  0x8d   :  { %858 = vmatmul.mubr.f32.gmra.mxu1 %v116_v53  ;;  %1521 = vmatprep.subr.mxu0 %v297_v54 }
  0x8e   :  { %1567 = vmatprep.subr.mxu1 %v297_v54  ;;  %1522 = vmatpush3.msra.mxu0 %v297_v54 }
  0x8f   :  { %1583 = vmatpush3.msra.mxu1 %v297_v54  ;;  %717 = vmatprep.mubr.f32.mxu0 %v124_v55 }
  0x90   :  { %862 = vmatprep.mubr.f32.mxu1 %v126_v56  ;;  %718 = vmatmul.mubr.f32.gmra.mxu0 %v123_v57 }
  0x91   :  { %863 = vmatmul.mubr.f32.gmra.mxu1 %v125_v58  ;;  %1523 = vmatprep.subr.mxu0 %v296_v59 }
  0x92   :  { %1568 = vmatprep.subr.mxu1 %v296_v59  ;;  %1524 = vmatpush3.msra.mxu0 %v296_v59 }
  0x93   :  { %1584 = vmatpush3.msra.mxu1 %v296_v59  ;;  %722 = vmatprep.mubr.f32.mxu0 %v133_v60 }
  0x94   :  { %867 = vmatprep.mubr.f32.mxu1 %v135_v61  ;;  %723 = vmatmul.mubr.f32.gmra.mxu0 %v132_v62 }
  0x95   :  { %868 = vmatmul.mubr.f32.gmra.mxu1 %v134_v63  ;;  %1525 = vmatprep.subr.mxu0 %v295_v0 }
  0x96   :  { %1569 = vmatprep.subr.mxu1 %v295_v0  ;;  %1526 = vmatpush3.msra.mxu0 %v295_v0 }
  0x97   :  { %1585 = vmatpush3.msra.mxu1 %v295_v0  ;;  %727 = vmatprep.mubr.f32.mxu0 %v142_v1 }
  0x98   :  { %872 = vmatprep.mubr.f32.mxu1 %v144_v2  ;;  %728 = vmatmul.mubr.f32.gmra.mxu0 %v141_v3 }
  0x99   :  { %873 = vmatmul.mubr.f32.gmra.mxu1 %v143_v4  ;;  %1527 = vmatprep.subr.mxu0 %v294_v5 }
  0x9a   :  { %1570 = vmatprep.subr.mxu1 %v294_v5  ;;  %1528 = vmatpush3.msra.mxu0 %v294_v5 }
  0x9b   :  { %1586 = vmatpush3.msra.mxu1 %v294_v5  ;;  %732 = vmatprep.mubr.f32.mxu0 %v151_v6 }
  0x9c   :  { %877 = vmatprep.mubr.f32.mxu1 %v153_v7  ;;  %733 = vmatmul.mubr.f32.gmra.mxu0 %v150_v8 }
  0x9d   :  { %878 = vmatmul.mubr.f32.gmra.mxu1 %v152_v9  ;;  %1529 = vmatprep.subr.mxu0 %v293_v10 }
  0x9e   :  { %1571 = vmatprep.subr.mxu1 %v293_v10  ;;  %1530 = vmatpush3.msra.mxu0 %v293_v10 }
  0x9f   :  { %1587 = vmatpush3.msra.mxu1 %v293_v10  ;;  %737 = vmatprep.mubr.f32.mxu0 %v160_v11 }
  0xa0   :  { %882 = vmatprep.mubr.f32.mxu1 %v162_v12  ;;  %738 = vmatmul.mubr.f32.gmra.mxu0 %v159_v13 }
  0xa1   :  { %883 = vmatmul.mubr.f32.gmra.mxu1 %v161_v14  ;;  %1531 = vmatprep.subr.mxu0 %v292_v15 }
  0xa2   :  { %1572 = vmatprep.subr.mxu1 %v292_v15  ;;  %1532 = vmatpush3.msra.mxu0 %v292_v15 }
  0xa3   :  { %1588 = vmatpush3.msra.mxu1 %v292_v15  ;;  %1533 = vmatprep.mubr.f32.mxu0 %v28_v16 }
  0xa4   :  { %1545 = vmatprep.mubr.f32.mxu1 %v100_v17  ;;  %1534 = vmatmul.mubr.f32.vlgmr.msra.gmra.mxu0 %v37_v18 }
  0xa5   :  { %1546 = vmatmul.mubr.f32.vlgmr.msra.gmra.mxu1 %v109_v19  ;;  %1536 = vmatprep.mubr.f32.mxu0 %v46_v20 }
  0xa6   :  { %1548 = vmatprep.mubr.f32.mxu1 %v118_v21 }
  0xa8   :  { %1537 = vmatmul.mubr.f32.gmra.mxu0 %v55_v22 }
  0xa9   :  { %1549 = vmatmul.mubr.f32.gmra.mxu1 %v127_v23  ;;  %1539 = vmatprep.mubr.f32.mxu0 %v64_v24 }
  0xaa   :  { %1551 = vmatprep.mubr.f32.mxu1 %v136_v25 }
  0xac   :  { %1540 = vmatmul.mubr.f32.gmra.mxu0 %v73_v26 }
  0xad   :  { %1552 = vmatmul.mubr.f32.gmra.mxu1 %v145_v27  ;;  %1542 = vmatprep.mubr.f32.mxu0 %v82_v28 }
  0xae   :  { %1554 = vmatprep.mubr.f32.mxu1 %v154_v29 }
  0xb0   :  { %1543 = vmatmul.mubr.f32.gmra.mxu0 %v91_v30 }
  0xb1   :  { %1555 = vmatmul.mubr.f32.gmra.mxu1 %v163_v31 }
  0xe4   :  { %v1181_v32 = vpop.f32.mrf.mxu0 }
  0xe5   :  { %v1261_v33 = vpop.f32.mrf.mxu1 }
  0xe6   :  { %v1182_v34 = vpop.f32.mrf.mxu0 }
  0xe7   :  { %v1262_v35 = vpop.f32.mrf.mxu1  ;;  %v1183_v36 = vadd.f32 %v1182_v34, %v1181_v32 }
  0xe8   :  { %v1263_v37 = vadd.f32 %v1262_v35, %v1261_v33  ;;  %v1184_v38 = vpop.f32.mrf.mxu0 }
  0xe9   :  { %v1264_v39 = vpop.f32.mrf.mxu1 }
  0xea   :  { %v2483_v40 = vadd.f32 %v1263_v37, %v1183_v36  ;;  %v1185_v41 = vpop.f32.mrf.mxu0 }
  0xeb   :  { %v1265_v42 = vpop.f32.mrf.mxu1  ;;  %v1186_v43 = vadd.f32 %v1185_v41, %v1184_v38 }
  0xec   :  { %v1266_v44 = vadd.f32 %v1265_v42, %v1264_v39  ;;  %v1187_v45 = vpop.f32.mrf.mxu0 }
  0xed   :  { %v1267_v46 = vpop.f32.mrf.mxu1 }
  0xee   :  { %v2485_v47 = vadd.f32 %v1266_v44, %v1186_v43  ;;  %v1188_v48 = vpop.f32.mrf.mxu0 }
  0xef   :  { %v1268_v49 = vpop.f32.mrf.mxu1  ;;  %v1189_v50 = vadd.f32 %v1188_v48, %v1187_v45 }
  0xf0   :  { %v1269_v51 = vadd.f32 %v1268_v49, %v1267_v46  ;;  %v1190_v52 = vpop.f32.mrf.mxu0 }
  0xf1   :  { %v1270_v53 = vpop.f32.mrf.mxu1 }
  0xf2   :  { %v2487_v54 = vadd.f32 %v1269_v51, %v1189_v50  ;;  %v1191_v55 = vpop.f32.mrf.mxu0 }
  0xf3   :  { %v1271_v56 = vpop.f32.mrf.mxu1  ;;  %v1192_v57 = vadd.f32 %v1191_v55, %v1190_v52 }
  0xf4   :  { %v1272_v58 = vadd.f32 %v1271_v56, %v1270_v53  ;;  %v1193_v59 = vpop.f32.mrf.mxu0 }
  0xf5   :  { %v1273_v60 = vpop.f32.mrf.mxu1 }
  0xf6   :  { %v2489_v61 = vadd.f32 %v1272_v58, %v1192_v57  ;;  %v1194_v62 = vpop.f32.mrf.mxu0 }
  0xf7   :  { %v1274_v63 = vpop.f32.mrf.mxu1  ;;  %v1195_v0 = vadd.f32 %v1194_v62, %v1193_v59 }
  0xf8   :  { %v1275_v1 = vadd.f32 %v1274_v63, %v1273_v60  ;;  %v1196_v2 = vpop.f32.mrf.mxu0 }
  0xf9   :  { %v1276_v3 = vpop.f32.mrf.mxu1 }
  0xfa   :  { %v2491_v4 = vadd.f32 %v1275_v1, %v1195_v0  ;;  %v1197_v5 = vpop.f32.mrf.mxu0 }
  0xfb   :  { %v1277_v6 = vpop.f32.mrf.mxu1  ;;  %v1198_v7 = vadd.f32 %v1197_v5, %v1196_v2 }
  0xfc   :  { %v1278_v8 = vadd.f32 %v1277_v6, %v1276_v3  ;;  %v1199_v9 = vpop.f32.mrf.mxu0 }
  0xfd   :  { %v1279_v10 = vpop.f32.mrf.mxu1 }
  0xfe   :  { %v2493_v11 = vadd.f32 %v1278_v8, %v1198_v7  ;;  %v1200_v12 = vpop.f32.mrf.mxu0 }
  0xff   :  { %v1280_v13 = vpop.f32.mrf.mxu1  ;;  %v1201_v14 = vadd.f32 %v1200_v12, %v1199_v9 }
 0x100   :  { %v1281_v15 = vadd.f32 %v1280_v13, %v1279_v10  ;;  %v1202_v16 = vpop.f32.mrf.mxu0 }
 0x101   :  { %v1282_v17 = vpop.f32.mrf.mxu1 }
 0x102   :  { %v2495_v18 = vadd.f32 %v1281_v15, %v1201_v14  ;;  %v1203_v19 = vpop.f32.mrf.mxu0 }
 0x103   :  { %v1283_v20 = vpop.f32.mrf.mxu1  ;;  %v1204_v21 = vadd.f32 %v1203_v19, %v1202_v16 }
 0x104   :  { %v1284_v22 = vadd.f32 %v1283_v20, %v1282_v17  ;;  %v1205_v23 = vpop.f32.mrf.mxu0 }
 0x105   :  { %v1285_v24 = vpop.f32.mrf.mxu1 }
 0x106   :  { %v2497_v25 = vadd.f32 %v1284_v22, %v1204_v21  ;;  %v1206_v26 = vpop.f32.mrf.mxu0 }
 0x107   :  { %v1286_v27 = vpop.f32.mrf.mxu1  ;;  %v1207_v28 = vadd.f32 %v1206_v26, %v1205_v23 }
 0x108   :  { %v1287_v29 = vadd.f32 %v1286_v27, %v1285_v24  ;;  %v1208_v30 = vpop.f32.mrf.mxu0 }
 0x109   :  { %v1288_v31 = vpop.f32.mrf.mxu1 }
 0x10a   :  { %v2499_v32 = vadd.f32 %v1287_v29, %v1207_v28  ;;  %v1209_v33 = vpop.f32.mrf.mxu0 }
 0x10b   :  { %v1289_v34 = vpop.f32.mrf.mxu1  ;;  %v1210_v35 = vadd.f32 %v1209_v33, %v1208_v30 }
 0x10c   :  { %2750 = vst [vmem:[#allocation2_spill] sm:$0xff] %v2499_v32  ;;  %v1290_v36 = vadd.f32 %v1289_v34, %v1288_v31  ;;  %v1211_v37 = vpop.f32.mrf.mxu0 }
 0x10d   :  { %v1291_v38 = vpop.f32.mrf.mxu1 }
 0x10e   :  { %v2501_v39 = vadd.f32 %v1290_v36, %v1210_v35  ;;  %v1212_v41 = vpop.f32.mrf.mxu0 }
 0x10f   :  { %v1292_v42 = vpop.f32.mrf.mxu1  ;;  %v1213_v43 = vadd.f32 %v1212_v41, %v1211_v37 }
 0x110   :  { %v1293_v44 = vadd.f32 %v1292_v42, %v1291_v38  ;;  %v1214_v45 = vpop.f32.mrf.mxu0 }
 0x111   :  { %v1294_v46 = vpop.f32.mrf.mxu1 }
 0x112   :  { %v2503_v48 = vadd.f32 %v1293_v44, %v1213_v43  ;;  %v1215_v49 = vpop.f32.mrf.mxu0 }
 0x113   :  { %v1295_v50 = vpop.f32.mrf.mxu1  ;;  %v1216_v51 = vadd.f32 %v1215_v49, %v1214_v45 }
 0x114   :  { %2751 = vst [vmem:[#allocation3_spill] sm:$0xff] %v2503_v48  ;;  %v1296_v52 = vadd.f32 %v1295_v50, %v1294_v46  ;;  %v1217_v53 = vpop.f32.mrf.mxu0 }
 0x115   :  { %v1297_v55 = vpop.f32.mrf.mxu1 }
 0x116   :  { %v2505_v56 = vadd.f32 %v1296_v52, %v1216_v51  ;;  %v1218_v57 = vpop.f32.mrf.mxu0 }
 0x117   :  { %v1298_v58 = vpop.f32.mrf.mxu1  ;;  %v1219_v59 = vadd.f32 %v1218_v57, %v1217_v53 }
 0x118   :  { %2752 = vst [vmem:[#allocation4_spill] sm:$0xff] %v2505_v56  ;;  %v1299_v60 = vadd.f32 %v1298_v58, %v1297_v55  ;;  %v1220_v62 = vpop.f32.mrf.mxu0 }
 0x119   :  { %v1300_v63 = vpop.f32.mrf.mxu1 }
 0x11a   :  { %v2507_v0 = vadd.f32 %v1299_v60, %v1219_v59  ;;  %v1221_v1 = vpop.f32.mrf.mxu0 }
 0x11b   :  { %v1301_v2 = vpop.f32.mrf.mxu1  ;;  %v1222_v3 = vadd.f32 %v1221_v1, %v1220_v62 }
 0x11c   :  { %2753 = vst [vmem:[#allocation5_spill] sm:$0xff] %v2507_v0  ;;  %v1302_v5 = vadd.f32 %v1301_v2, %v1300_v63  ;;  %v1223_v6 = vpop.f32.mrf.mxu0 }
 0x11d   :  { %v1303_v7 = vpop.f32.mrf.mxu1 }
 0x11e   :  { %v2509_v8 = vadd.f32 %v1302_v5, %v1222_v3  ;;  %v1224_v9 = vpop.f32.mrf.mxu0 }
 0x11f   :  { %v1304_v10 = vpop.f32.mrf.mxu1  ;;  %v1225_v12 = vadd.f32 %v1224_v9, %v1223_v6 }
 0x120   :  { %2754 = vst [vmem:[#allocation6_spill] sm:$0xff] %v2509_v8  ;;  %v1305_v13 = vadd.f32 %v1304_v10, %v1303_v7  ;;  %v1226_v14 = vpop.f32.mrf.mxu0 }
 0x121   :  { %v1306_v15 = vpop.f32.mrf.mxu1 }
 0x122   :  { %v2511_v16 = vadd.f32 %v1305_v13, %v1225_v12  ;;  %v1227_v17 = vpop.f32.mrf.mxu0 }
 0x123   :  { %v1307_v19 = vpop.f32.mrf.mxu1  ;;  %v1228_v20 = vadd.f32 %v1227_v17, %v1226_v14 }
 0x124   :  { %2755 = vst [vmem:[#allocation7_spill] sm:$0xff] %v2511_v16  ;;  %v1308_v21 = vadd.f32 %v1307_v19, %v1306_v15  ;;  %v1341_v22 = vpop.f32.mrf.mxu0 }
 0x125   :  { %v1421_v23 = vpop.f32.mrf.mxu1 }
 0x126   :  { %v2513_v24 = vadd.f32 %v1308_v21, %v1228_v20  ;;  %v1342_v26 = vpop.f32.mrf.mxu0 }
 0x127   :  { %v1422_v27 = vpop.f32.mrf.mxu1 }
 0x128   :  { %2756 = vst [vmem:[#allocation8_spill] sm:$0xff] %v2513_v24  ;;  %v1344_v28 = vpop.f32.mrf.mxu0  ;;  %v1343_v24 = vadd.f32 %v1342_v26, %v1341_v22 }
 0x129   :  { %v2515_v29 = vpop.f32.mrf.mxu1 }
 0x12a   :  { %v1345_v30 = vpop.f32.mrf.mxu0 }
 0x12b   :  { %v1425_v31 = vpop.f32.mrf.mxu1  ;;  %v1346_v0 = vadd.f32 %v1345_v30, %v1344_v28 }
 0x12c   :  { %v1347_v33 = vpop.f32.mrf.mxu0 }
 0x12d   :  { %v2517_v34 = vpop.f32.mrf.mxu1 }
 0x12e   :  { %v1348_v35 = vpop.f32.mrf.mxu0 }
 0x12f   :  { %v1428_v36 = vpop.f32.mrf.mxu1  ;;  %v1349_v56 = vadd.f32 %v1348_v35, %v1347_v33  ;;  %v1426_v35 = vadd.f32 %v1425_v31, %v2515_v29 }
 0x130   :  { %v1350_v37 = vpop.f32.mrf.mxu0 }
 0x131   :  { %v1430_v38 = vpop.f32.mrf.mxu1  ;;  %v675_v22 = vadd.f32 %v1349_v56, %v2487_v54 }
 0x132   :  { %v1351_v41 = vpop.f32.mrf.mxu0 }
 0x133   :  { %v1431_v42 = vpop.f32.mrf.mxu1 }
 0x134   :  { %v1353_v43 = vpop.f32.mrf.mxu0 }
 0x135   :  { %v1433_v44 = vpop.f32.mrf.mxu1 }
 0x136   :  { %v1354_v45 = vpop.f32.mrf.mxu0 }
 0x137   :  { %v1434_v46 = vpop.f32.mrf.mxu1 }
 0x138   :  { %v1356_v49 = vpop.f32.mrf.mxu0 }
 0x139   :  { %v2519_v50 = vpop.f32.mrf.mxu1 }
 0x13a   :  { %v1357_v51 = vpop.f32.mrf.mxu0 }
 0x13b   :  { %v2521_v52 = vpop.f32.mrf.mxu1  ;;  %v1358_v32 = vadd.f32 %v1357_v51, %v1356_v49 }
 0x13c   :  { %v1359_v53 = vpop.f32.mrf.mxu0 }
 0x13d   :  { %v2523_v55 = vpop.f32.mrf.mxu1  ;;  %v690_v54 = vadd.f32 %v1358_v32, %v2493_v11 }
 0x13e   :  { %v1360_v57 = vpop.f32.mrf.mxu0 }
 0x13f   :  { %v2525_v58 = vpop.f32.mrf.mxu1  ;;  %v1361_v28 = vadd.f32 %v1360_v57, %v1359_v53 }
 0x140   :  { %v1362_v59 = vpop.f32.mrf.mxu0  ;;  %v1441_v11 = vadd.f32 %v2525_v58, %v2523_v55 }
 0x141   :  { %v2527_v60 = vpop.f32.mrf.mxu1  ;;  %v695_v49 = vadd.f32 %v1361_v28, %v2495_v18  ;;  %v2765_v18 = vld [vmem:[#allocation2_spill] sm:$0xff] }
 0x142   :  { %2757 = vst [vmem:[#allocation9_spill] sm:$0xff] %v2527_v60  ;;  %v1363_v62 = vpop.f32.mrf.mxu0  ;;  %v2777_v28 = vld [vmem:[#allocation6_spill] sm:$0xff] }
 0x143   :  { %v2529_v63 = vpop.f32.mrf.mxu1 }
 0x144   :  { %2758 = vst [vmem:[#allocation10_spill] sm:$0xff] %v2529_v63  ;;  %v1365_v1 = vpop.f32.mrf.mxu0  ;;  %v665_v63 = vadd.f32 %v1343_v24, %v2483_v40  ;;  %v1429_v24 = vadd.f32 %v1428_v36, %v2517_v34  ;;  %v1438_v34 = vadd.f32 %v2521_v52, %v2519_v50  ;;  %v2768_v50 = vld [vmem:[#allocation3_spill] sm:$0xff] }
 0x145   :  { %v2531_v2 = vpop.f32.mrf.mxu1 }
 0x146   :  { %2759 = vst [vmem:[#allocation11_spill] sm:$0xff] %v2531_v2  ;;  %v1366_v3 = vpop.f32.mrf.mxu0  ;;  %v2560_v53 = vadd.f32 %v1429_v24, %v675_v22  ;;  %v2776_v22 = vld [vmem:[#allocation5_spill] sm:$0xff] }
 0x147   :  { %v2533_v5 = vpop.f32.mrf.mxu1 }
 0x148   :  { %2760 = vst [vmem:[#allocation12_spill] sm:$0xff] %v2533_v5  ;;  %v1368_v6 = vpop.f32.mrf.mxu0  ;;  %v1352_v5 = vadd.f32 %v1351_v41, %v1350_v37  ;;  %v1364_v41 = vadd.f32 %v1363_v62, %v1362_v59 }
 0x149   :  { %v1448_v7 = vpop.f32.mrf.mxu1  ;;  %v2766_v62 = vld [vmem:[#allocation9_spill] sm:$0xff] }
 0x14a   :  { %v1369_v9 = vpop.f32.mrf.mxu0  ;;  %v680_v26 = vadd.f32 %v1352_v5, %v2489_v61  ;;  %v700_v36 = vadd.f32 %v1364_v41, %v2497_v25  ;;  %v2574_v25 = vadd.f32 %v1438_v34, %v690_v54  ;;  %v2778_v54 = vld [vmem:[#allocation7_spill] sm:$0xff] }
 0x14b   :  { %v1449_v10 = vpop.f32.mrf.mxu1  ;;  %v1370_v40 = vadd.f32 %v1369_v9, %v1368_v6  ;;  %v2771_v9 = vld [vmem:[#allocation4_spill] sm:$0xff] }
 0x14c   :  { %v1371_v12 = vpop.f32.mrf.mxu0 }
 0x14d   :  { %v2535_v13 = vpop.f32.mrf.mxu1 }
 0x14e   :  { %2761 = vst [vmem:[#allocation13_spill] sm:$0xff] %v2535_v13  ;;  %v1372_v14 = vpop.f32.mrf.mxu0  ;;  %v1355_v13 = vadd.f32 %v1354_v45, %v1353_v43  ;;  %v1432_v43 = vadd.f32 %v1431_v42, %v1430_v38  ;;  %v1367_v45 = vadd.f32 %v1366_v3, %v1365_v1  ;;  %v710_v38 = vadd.f32 %v1370_v40, %v2501_v39  ;;  %v2769_v39 = vld [vmem:[#allocation11_spill] sm:$0xff] }
 0x14f   :  { %v2537_v15 = vpop.f32.mrf.mxu1  ;;  %v1373_v61 = vadd.f32 %v1372_v14, %v1371_v12  ;;  %v1450_v3 = vadd.f32 %v1449_v10, %v1448_v7  ;;  %v2770_v5 = vld [vmem:[#allocation12_spill] sm:$0xff] }
 0x150   :  { %2762 = vst [vmem:[#allocation14_spill] sm:$0xff] %v2537_v15  ;;  %v1374_v17 = vpop.f32.mrf.mxu0  ;;  %v685_v37 = vadd.f32 %v1355_v13, %v2491_v4  ;;  %v2558_v4 = vadd.f32 %v1432_v43, %v680_v26  ;;  %v705_v32 = vadd.f32 %v1367_v45, %v2765_v18  ;;  %v1447_v6 = vadd.f32 %v2770_v5, %v2769_v39 }
 0x151   :  { %v2539_v19 = vpop.f32.mrf.mxu1  ;;  %v715_v52 = vadd.f32 %v1373_v61, %v2768_v50 }
 0x152   :  { %2763 = vst [vmem:[#allocation15_spill] sm:$0xff] %v2539_v19  ;;  %v1375_v20 = vpop.f32.mrf.mxu0  ;;  %v670_v19 = vadd.f32 %v1346_v0, %v2485_v47  ;;  %v850_v40 = vadd.f32 %v1447_v6, %v705_v32  ;;  %v1088_v32 = vld [vmem:[%s2748_s4 + $0x48] sm:$0xff] }
 0x153   :  { %v2541_v21 = vpop.f32.mrf.mxu1  ;;  %v1376_v51 = vadd.f32 %v1375_v20, %v1374_v17 }
 0x154   :  { %2764 = vst [vmem:[#allocation16_spill] sm:$0xff] %v2541_v21  ;;  %v1377_v16 = vpop.f32.mrf.mxu0  ;;  %v1423_v21 = vadd.f32 %v1422_v27, %v1421_v23  ;;  %v1435_v27 = vadd.f32 %v1434_v46, %v1433_v44  ;;  %v815_v56 = vadd.f32 %v1426_v35, %v670_v19  ;;  %v855_v19 = vadd.f32 %v1450_v3, %v710_v38 }
 0x155   :  { %v2543_v8 = vpop.f32.mrf.mxu1  ;;  %v720_v12 = vadd.f32 %v1376_v51, %v2771_v9 }
 0x156   :  { %v1378_v2 = vpop.f32.mrf.mxu0  ;;  %v810_v23 = vadd.f32 %v1423_v21, %v665_v63  ;;  %v2566_v42 = vadd.f32 %v1435_v27, %v685_v37  ;;  %v2767_v63 = vld [vmem:[#allocation10_spill] sm:$0xff] }
 0x157   :  { %v2545_v48 = vpop.f32.mrf.mxu1  ;;  %v1379_v44 = vadd.f32 %v1378_v2, %v1377_v16  ;;  %v1444_v1 = vadd.f32 %v2767_v63, %v2766_v62  ;;  %v2579_v16 = vadd.f32 %v1441_v11, %v695_v49  ;;  %v2772_v2 = vld [vmem:[#allocation13_spill] sm:$0xff]  ;;  %v2773_v14 = vld [vmem:[#allocation14_spill] sm:$0xff]  ;;  %v2779_v49 = vld [vmem:[#allocation8_spill] sm:$0xff] }
 0x158   :  { %v1380_v15 = vpop.f32.mrf.mxu0  ;;  %v2592_v37 = vld [vmem:[%s2746_s2] ss:$0 sm:$0xff]  ;;  %v1459_v24 = vadd.f32 %v2545_v48, %v2543_v8 }
 0x159   :  { %v2548_v60 = vpop.f32.mrf.mxu1  ;;  %v2583_v7 = vadd.f32 %v1444_v1, %v700_v36  ;;  %v2774_v10 = vld [vmem:[#allocation15_spill] sm:$0xff]  ;;  %v725_v26 = vadd.f32 %v1379_v44, %v2776_v22  ;;  %v1082_v22 = vld [vmem:[%s2748_s4 + $0x18] sm:$0xff] }
 0x15a   :  { %v1381_v30 = vpop.f32.mrf.mxu0 }
 0x15b   :  { %v1461_v33 = vpop.f32.mrf.mxu1  ;;  %v1382_v46 = vadd.f32 %v1381_v30, %v1380_v15  ;;  %v1453_v15 = vadd.f32 %v2773_v14, %v2772_v2  ;;  %v2775_v20 = vld [vmem:[#allocation16_spill] sm:$0xff]  ;;  %v870_v62 = vadd.f32 %v1459_v24, %v725_v26  ;;  %v1090_v26 = vld [vmem:[%s2748_s4 + $0x58] sm:$0xff] }
 0x15c   :  { %v1383_v47 = vpop.f32.mrf.mxu0  ;;  %v1456_v21 = vadd.f32 %v2775_v20, %v2774_v10  ;;  %v1462_v27 = vadd.f32 %v1461_v33, %v2548_v60  ;;  %v1080_v33 = vld [vmem:[%s2748_s4 + $0x8] sm:$0xff] }
 0x15d   :  { %v1463_v0 = vpop.f32.mrf.mxu1  ;;  %v730_v30 = vadd.f32 %v1382_v46, %v2777_v28 }
 0x15e   :  { %v1384_v29 = vpop.f32.mrf.mxu0  ;;  %v865_v38 = vadd.f32 %v1456_v21, %v720_v12 }
 0x15f   :  { %v1464_v31 = vpop.f32.mrf.mxu1  ;;  %v1385_v55 = vadd.f32 %v1384_v29, %v1383_v47  ;;  %v860_v47 = vadd.f32 %v1453_v15, %v715_v52  ;;  %v2602_v29 = vld [vmem:[%s2747_s3] ss:$0 sm:$0xff] }
 0x160   :  { %v1386_v57 = vpop.f32.mrf.mxu0  ;;  %v1465_v18 = vadd.f32 %v1464_v31, %v1463_v0  ;;  %v1079_v31 = vld [vmem:[%s2748_s4] sm:$0xff] }
 0x161   :  { %v1466_v59 = vpop.f32.mrf.mxu1  ;;  %v735_v61 = vadd.f32 %v1385_v55, %v2778_v54 }
 0x162   :  { %v1387_v58 = vpop.f32.mrf.mxu0 }
 0x163   :  { %v1467_v13 = vpop.f32.mrf.mxu1  ;;  %v1388_v17 = vadd.f32 %v1387_v58, %v1386_v57  ;;  %v875_v57 = vadd.f32 %v1462_v27, %v730_v30  ;;  %v2625_v6 = vadd.f32 %v1465_v18, %v735_v61 }
 0x164   :  { %v1535_v35 = vpop.f32.mrf.mxu0  ;;  %v1468_v60 = vadd.f32 %v1467_v13, %v1466_v59  ;;  %v1087_v59 = vld [vmem:[%s2748_s4 + $0x40] sm:$0xff] }
 0x165   :  { %v1547_v41 = vpop.f32.mrf.mxu1  ;;  %v960_v43 = vadd.f32 %v1535_v35, %v815_v56  ;;  %v740_v51 = vadd.f32 %v1388_v17, %v2779_v49 }
 0x166   :  { %v1000_v45 = vadd.f32 %v1547_v41, %v855_v19  ;;  %v954_v34 = vpop.f32.mrf.mxu0 }
 0x167   :  { %v994_v36 = vpop.f32.mrf.mxu1  ;;  %v1041_v11 = vmul.f32 %v2592_v37, %v960_v43  ;;  %v955_v8 = vadd.f32 %v954_v34, %v810_v23  ;;  %v2623_v5 = vadd.f32 %v1468_v60, %v740_v51 }
 0x168   :  { %v1049_v48 = vmul.f32 %v2592_v37, %v1000_v45  ;;  %v995_v56 = vadd.f32 %v994_v36, %v850_v40  ;;  %v1538_v44 = vpop.f32.mrf.mxu0  ;;  %v1081_v45 = vld [vmem:[%s2748_s4 + $0x10] sm:$0xff] }
 0x169   :  { %v1550_v46 = vpop.f32.mrf.mxu1  ;;  %v1064_v63 = vadd.f32 %v2602_v29, %v1041_v11  ;;  %v1040_v23 = vmul.f32 %v2592_v37, %v955_v8  ;;  %v970_v3 = vadd.f32 %v1538_v44, %v2558_v4  ;;  %v1092_v44 = vld [vmem:[%s2748_s4 + $0x68] sm:$0xff] }
 0x16a   :  { %v1072_v1 = vadd.f32 %v2602_v29, %v1049_v48  ;;  %v1048_v0 = vmul.f32 %v2592_v37, %v995_v56  ;;  %v1010_v50 = vadd.f32 %v1550_v46, %v865_v38  ;;  %v964_v52 = vpop.f32.mrf.mxu0 }
 0x16b   :  { %v1004_v39 = vpop.f32.mrf.mxu1  ;;  %v1096_v9 = vadd.f32 %v1080_v33, %v1064_v63  ;;  %v1063_v55 = vadd.f32 %v2602_v29, %v1040_v23  ;;  %v1043_v13 = vmul.f32 %v2592_v37, %v970_v3  ;;  %v965_v14 = vadd.f32 %v964_v52, %v2560_v53 }
 0x16c   :  { %v1104_v12 = vadd.f32 %v1088_v32, %v1072_v1  ;;  %v1071_v58 = vadd.f32 %v2602_v29, %v1048_v0  ;;  %v1051_v2 = vmul.f32 %v2592_v37, %v1010_v50  ;;  %v1005_v4 = vadd.f32 %v1004_v39, %v860_v47  ;;  %v1541_v15 = vpop.f32.mrf.mxu0  ;;  %v1089_v47 = vld [vmem:[%s2748_s4 + $0x50] sm:$0xff]  ;;  %v1084_v32 = vld [vmem:[%s2748_s4 + $0x28] sm:$0xff] }
 0x16d   :  { %v1553_v17 = vpop.f32.mrf.mxu1  ;;  %v1112_v19 = vmax.f32 %v1096_v9, 0.0  ;;  %v1095_v20 = vadd.f32 %v1079_v31, %v1063_v55  ;;  %v1066_v28 = vadd.f32 %v2602_v29, %v1043_v13  ;;  %v1042_v53 = vmul.f32 %v2592_v37, %v965_v14  ;;  %v1083_v31 = vld [vmem:[%s2748_s4 + $0x20] sm:$0xff] }
 0x16e   :  { %v1120_v10 = vmax.f32 %v1104_v12, 0.0  ;;  %v1103_v21 = vadd.f32 %v1087_v59, %v1071_v58  ;;  %v1074_v30 = vadd.f32 %v2602_v29, %v1051_v2  ;;  %v1050_v35 = vmul.f32 %v2592_v37, %v1005_v4  ;;  %v974_v41 = vpop.f32.mrf.mxu0  ;;  %v1091_v59 = vld [vmem:[%s2748_s4 + $0x60] sm:$0xff] }
 0x16f   :  { %v1014_v40 = vpop.f32.mrf.mxu1  ;;  %1128 = vst [vmem:[%s2749_s5 + $0x8] sm:$0xff] %v1112_v19  ;;  %v1111_v24 = vmax.f32 %v1095_v20, 0.0  ;;  %v980_v27 = vadd.f32 %v1541_v15, %v2574_v25  ;;  %v1020_v54 = vadd.f32 %v1553_v17, %v875_v57  ;;  %v1098_v61 = vadd.f32 %v1082_v22, %v1066_v28  ;;  %v1086_v15 = vld [vmem:[%s2748_s4 + $0x38] sm:$0xff]  ;;  %v1085_v22 = vld [vmem:[%s2748_s4 + $0x30] sm:$0xff] }
 0x170   :  { %1136 = vst [vmem:[%s2749_s5 + $0x48] sm:$0xff] %v1120_v10  ;;  %v1119_v43 = vmax.f32 %v1103_v21, 0.0  ;;  %v1106_v49 = vadd.f32 %v1090_v26, %v1074_v30  ;;  %v1065_v51 = vadd.f32 %v2602_v29, %v1042_v53  ;;  %v1073_v34 = vadd.f32 %v2602_v29, %v1050_v35  ;;  %v1544_v36 = vpop.f32.mrf.mxu0  ;;  %v1094_v17 = vld [vmem:[%s2748_s4 + $0x78] sm:$0xff]  ;;  %v1093_v26 = vld [vmem:[%s2748_s4 + $0x70] sm:$0xff] }
 0x171   :  { %v1556_v38 = vpop.f32.mrf.mxu1  ;;  %1127 = vst [vmem:[%s2749_s5] sm:$0xff] %v1111_v24  ;;  %v1045_v11 = vmul.f32 %v2592_v37, %v980_v27  ;;  %v1053_v25 = vmul.f32 %v2592_v37, %v1020_v54  ;;  %v975_v48 = vadd.f32 %v974_v41, %v2566_v42  ;;  %v1015_v8 = vadd.f32 %v1014_v40, %v870_v62 }
 0x172   :  { %1135 = vst [vmem:[%s2749_s5 + $0x40] sm:$0xff] %v1119_v43  ;;  %v1114_v56 = vmax.f32 %v1098_v61, 0.0  ;;  %v1122_v18 = vmax.f32 %v1106_v49, 0.0  ;;  %v1097_v60 = vadd.f32 %v1081_v45, %v1065_v51  ;;  %v1105_v33 = vadd.f32 %v1089_v47, %v1073_v34  ;;  %v984_v62 = vpop.f32.mrf.mxu0 }
 0x173   :  { %v1068_v46 = vadd.f32 %v2602_v29, %v1045_v11  ;;  %v1076_v57 = vadd.f32 %v2602_v29, %v1053_v25  ;;  %v1044_v63 = vmul.f32 %v2592_v37, %v975_v48  ;;  %v1052_v42 = vmul.f32 %v2592_v37, %v1015_v8  ;;  %v1024_v1 = vpop.f32.mrf.mxu1 }
 0x174   :  { %1130 = vst [vmem:[%s2749_s5 + $0x18] sm:$0xff] %v1114_v56  ;;  %1138 = vst [vmem:[%s2749_s5 + $0x58] sm:$0xff] %v1122_v18  ;;  %v1113_v23 = vmax.f32 %v1097_v60, 0.0  ;;  %v1121_v0 = vmax.f32 %v1105_v33, 0.0  ;;  %v990_v3 = vadd.f32 %v1544_v36, %v2583_v7  ;;  %v1030_v50 = vadd.f32 %v1556_v38, %v2623_v5 }
 0x175   :  { %v1100_v52 = vadd.f32 %v1084_v32, %v1068_v46  ;;  %v1108_v39 = vadd.f32 %v1092_v44, %v1076_v57  ;;  %v1067_v9 = vadd.f32 %v2602_v29, %v1044_v63  ;;  %v1075_v12 = vadd.f32 %v2602_v29, %v1052_v42 }
 0x176   :  { %1129 = vst [vmem:[%s2749_s5 + $0x10] sm:$0xff] %v1113_v23  ;;  %1137 = vst [vmem:[%s2749_s5 + $0x50] sm:$0xff] %v1121_v0  ;;  %v1047_v55 = vmul.f32 %v2592_v37, %v990_v3  ;;  %v1055_v7 = vmul.f32 %v2592_v37, %v1030_v50  ;;  %v985_v5 = vadd.f32 %v984_v62, %v2579_v16 }
 0x177   :  { %v1025_v58 = vadd.f32 %v1024_v1, %v2625_v6  ;;  %v1116_v13 = vmax.f32 %v1100_v52, 0.0  ;;  %v1124_v2 = vmax.f32 %v1108_v39, 0.0  ;;  %v1099_v14 = vadd.f32 %v1083_v31, %v1067_v9 }
 0x178   :  { %v1107_v4 = vadd.f32 %v1091_v59, %v1075_v12  ;;  %v1070_v19 = vadd.f32 %v2602_v29, %v1047_v55  ;;  %v1078_v10 = vadd.f32 %v2602_v29, %v1055_v7  ;;  %v1046_v16 = vmul.f32 %v2592_v37, %v985_v5 }
 0x179   :  { %v1054_v6 = vmul.f32 %v2592_v37, %v1025_v58  ;;  %1132 = vst [vmem:[%s2749_s5 + $0x28] sm:$0xff] %v1116_v13  ;;  %1140 = vst [vmem:[%s2749_s5 + $0x68] sm:$0xff] %v1124_v2  ;;  %v1115_v20 = vmax.f32 %v1099_v14, 0.0 }
 0x17a   :  { %v1123_v21 = vmax.f32 %v1107_v4, 0.0  ;;  %v1102_v28 = vadd.f32 %v1086_v15, %v1070_v19  ;;  %v1110_v37 = vadd.f32 %v1094_v17, %v1078_v10  ;;  %v1069_v30 = vadd.f32 %v2602_v29, %v1046_v16 }
 0x17b   :  { %v1077_v53 = vadd.f32 %v2602_v29, %v1054_v6  ;;  %1131 = vst [vmem:[%s2749_s5 + $0x20] sm:$0xff] %v1115_v20 }
 0x17c   :  { %1139 = vst [vmem:[%s2749_s5 + $0x60] sm:$0xff] %v1123_v21  ;;  %v1118_v35 = vmax.f32 %v1102_v28, 0.0  ;;  %v1126_v41 = vmax.f32 %v1110_v37, 0.0  ;;  %v1101_v40 = vadd.f32 %v1085_v22, %v1069_v30 }
 0x17d   :  { %v1109_v24 = vadd.f32 %v1093_v26, %v1077_v53 }
 0x17e   :  { %1134 = vst [vmem:[%s2749_s5 + $0x38] sm:$0xff] %v1118_v35  ;;  %1142 = vst [vmem:[%s2749_s5 + $0x78] sm:$0xff] %v1126_v41  ;;  %v1117_v29 = vmax.f32 %v1101_v40, 0.0 }
 0x17f   :  { %v1125_v43 = vmax.f32 %v1109_v24, 0.0 }
 0x180   :  { %1133 = vst [vmem:[%s2749_s5 + $0x30] sm:$0xff] %v1117_v29 }
 0x181   :  { %1141 = vst [vmem:[%s2749_s5 + $0x70] sm:$0xff] %v1125_v43 }

// kernel: forward_pallas.10
= control target key start
LH: loop header
LB: loop body
LE: loop exit
PB: predicated region body
PF: predicated region fallthrough
CT: control target
= control target key end

     0   :  { %s2647_s1 = inlined_call_operand.vmem [shape: f32[1152,128], index: 1, kind: input, shape index: {}]   ;;  %s2648_s0 = inlined_call_operand.vmem [shape: f32[128,1152], index: 0, kind: input, shape index: {}]   ;;  %s2649_s2 = inlined_call_operand.vmem [shape: f32[1,128], index: 2, kind: input, shape index: {}]   ;;  %s2650_s3 = inlined_call_operand.vmem [shape: f32[1,128], index: 3, kind: input, shape index: {}]   ;;  %s2651_s4 = inlined_call_operand.vmem [shape: f32[128,128], index: 4, kind: output, shape index: {}]  }
   0x1   :  { %v192_v0 = vld [vmem:[%s2647_s1 + $0xf8] sm:$0xff]  ;;  %v191_v4 = vld [vmem:[%s2647_s1 + $0xf0] sm:$0xff]  ;;  %v190_v8 = vld [vmem:[%s2647_s1 + $0xe8] sm:$0xff] }
   0x2   :  { %v224_v1 = vld [vmem:[%s2647_s1 + $0x1f8] sm:$0xff]  ;;  %1114 = vmatprep.subr.mxu0 %v192_v0  ;;  %v223_v5 = vld [vmem:[%s2647_s1 + $0x1f0] sm:$0xff]  ;;  %v222_v9 = vld [vmem:[%s2647_s1 + $0x1e8] sm:$0xff] }
   0x3   :  { %v176_v2 = vld [vmem:[%s2647_s1 + $0x78] sm:$0xff]  ;;  %1194 = vmatprep.subr.mxu1 %v224_v1  ;;  %v175_v6 = vld [vmem:[%s2647_s1 + $0x70] sm:$0xff]  ;;  %v174_v10 = vld [vmem:[%s2647_s1 + $0x68] sm:$0xff] }
   0x4   :  { %v208_v3 = vld [vmem:[%s2647_s1 + $0x178] sm:$0xff]  ;;  %1115 = vmatpush3.msra.mxu0 %v176_v2  ;;  %v207_v7 = vld [vmem:[%s2647_s1 + $0x170] sm:$0xff]  ;;  %v206_v11 = vld [vmem:[%s2647_s1 + $0x168] sm:$0xff] }
   0x5   :  { %1195 = vmatpush3.msra.mxu1 %v208_v3  ;;  %1116 = vmatprep.subr.mxu0 %v191_v4  ;;  %v189_v12 = vld [vmem:[%s2647_s1 + $0xe0] sm:$0xff]  ;;  %v188_v16 = vld [vmem:[%s2647_s1 + $0xd8] sm:$0xff]  ;;  %v187_v20 = vld [vmem:[%s2647_s1 + $0xd0] sm:$0xff] }
   0x6   :  { %1196 = vmatprep.subr.mxu1 %v223_v5  ;;  %1117 = vmatpush3.msra.mxu0 %v175_v6  ;;  %v221_v13 = vld [vmem:[%s2647_s1 + $0x1e0] sm:$0xff]  ;;  %v220_v17 = vld [vmem:[%s2647_s1 + $0x1d8] sm:$0xff]  ;;  %v219_v21 = vld [vmem:[%s2647_s1 + $0x1d0] sm:$0xff] }
   0x7   :  { %1197 = vmatpush3.msra.mxu1 %v207_v7  ;;  %1118 = vmatprep.subr.mxu0 %v190_v8  ;;  %v173_v14 = vld [vmem:[%s2647_s1 + $0x60] sm:$0xff]  ;;  %v172_v18 = vld [vmem:[%s2647_s1 + $0x58] sm:$0xff]  ;;  %v171_v22 = vld [vmem:[%s2647_s1 + $0x50] sm:$0xff] }
   0x8   :  { %1198 = vmatprep.subr.mxu1 %v222_v9  ;;  %v205_v15 = vld [vmem:[%s2647_s1 + $0x160] sm:$0xff]  ;;  %1119 = vmatpush3.msra.mxu0 %v174_v10  ;;  %v204_v19 = vld [vmem:[%s2647_s1 + $0x158] sm:$0xff]  ;;  %v203_v23 = vld [vmem:[%s2647_s1 + $0x150] sm:$0xff] }
   0x9   :  { %1199 = vmatpush3.msra.mxu1 %v206_v11  ;;  %1120 = vmatprep.subr.mxu0 %v189_v12  ;;  %v186_v24 = vld [vmem:[%s2647_s1 + $0xc8] sm:$0xff]  ;;  %v185_v28 = vld [vmem:[%s2647_s1 + $0xc0] sm:$0xff]  ;;  %v184_v32 = vld [vmem:[%s2647_s1 + $0xb8] sm:$0xff] }
   0xa   :  { %1200 = vmatprep.subr.mxu1 %v221_v13  ;;  %1121 = vmatpush3.msra.mxu0 %v173_v14  ;;  %v218_v25 = vld [vmem:[%s2647_s1 + $0x1c8] sm:$0xff]  ;;  %v217_v29 = vld [vmem:[%s2647_s1 + $0x1c0] sm:$0xff]  ;;  %v216_v33 = vld [vmem:[%s2647_s1 + $0x1b8] sm:$0xff] }
   0xb   :  { %1201 = vmatpush3.msra.mxu1 %v205_v15  ;;  %1122 = vmatprep.subr.mxu0 %v188_v16  ;;  %v170_v26 = vld [vmem:[%s2647_s1 + $0x48] sm:$0xff]  ;;  %v169_v30 = vld [vmem:[%s2647_s1 + $0x40] sm:$0xff]  ;;  %v168_v34 = vld [vmem:[%s2647_s1 + $0x38] sm:$0xff] }
   0xc   :  { %1202 = vmatprep.subr.mxu1 %v220_v17  ;;  %1123 = vmatpush3.msra.mxu0 %v172_v18  ;;  %v202_v27 = vld [vmem:[%s2647_s1 + $0x148] sm:$0xff]  ;;  %v201_v31 = vld [vmem:[%s2647_s1 + $0x140] sm:$0xff]  ;;  %v200_v35 = vld [vmem:[%s2647_s1 + $0x138] sm:$0xff] }
   0xd   :  { %1203 = vmatpush3.msra.mxu1 %v204_v19  ;;  %1124 = vmatprep.subr.mxu0 %v187_v20  ;;  %v183_v36 = vld [vmem:[%s2647_s1 + $0xb0] sm:$0xff]  ;;  %v182_v40 = vld [vmem:[%s2647_s1 + $0xa8] sm:$0xff]  ;;  %v181_v44 = vld [vmem:[%s2647_s1 + $0xa0] sm:$0xff] }
   0xe   :  { %1204 = vmatprep.subr.mxu1 %v219_v21  ;;  %1125 = vmatpush3.msra.mxu0 %v171_v22  ;;  %v215_v37 = vld [vmem:[%s2647_s1 + $0x1b0] sm:$0xff]  ;;  %v214_v41 = vld [vmem:[%s2647_s1 + $0x1a8] sm:$0xff]  ;;  %v213_v45 = vld [vmem:[%s2647_s1 + $0x1a0] sm:$0xff] }
   0xf   :  { %1205 = vmatpush3.msra.mxu1 %v203_v23  ;;  %1126 = vmatprep.subr.mxu0 %v186_v24  ;;  %v167_v38 = vld [vmem:[%s2647_s1 + $0x30] sm:$0xff]  ;;  %v166_v42 = vld [vmem:[%s2647_s1 + $0x28] sm:$0xff]  ;;  %v165_v46 = vld [vmem:[%s2647_s1 + $0x20] sm:$0xff] }
  0x10   :  { %1206 = vmatprep.subr.mxu1 %v218_v25  ;;  %1127 = vmatpush3.msra.mxu0 %v170_v26  ;;  %v199_v39 = vld [vmem:[%s2647_s1 + $0x130] sm:$0xff]  ;;  %v198_v43 = vld [vmem:[%s2647_s1 + $0x128] sm:$0xff]  ;;  %v197_v47 = vld [vmem:[%s2647_s1 + $0x120] sm:$0xff] }
  0x11   :  { %1207 = vmatpush3.msra.mxu1 %v202_v27  ;;  %1128 = vmatprep.subr.mxu0 %v185_v28  ;;  %v180_v48 = vld [vmem:[%s2647_s1 + $0x98] sm:$0xff]  ;;  %v179_v52 = vld [vmem:[%s2647_s1 + $0x90] sm:$0xff]  ;;  %v178_v56 = vld [vmem:[%s2647_s1 + $0x88] sm:$0xff] }
  0x12   :  { %1208 = vmatprep.subr.mxu1 %v217_v29  ;;  %1129 = vmatpush3.msra.mxu0 %v169_v30  ;;  %v212_v49 = vld [vmem:[%s2647_s1 + $0x198] sm:$0xff]  ;;  %v211_v53 = vld [vmem:[%s2647_s1 + $0x190] sm:$0xff]  ;;  %v210_v57 = vld [vmem:[%s2647_s1 + $0x188] sm:$0xff] }
  0x13   :  { %1209 = vmatpush3.msra.mxu1 %v201_v31  ;;  %1130 = vmatprep.subr.mxu0 %v184_v32  ;;  %v164_v50 = vld [vmem:[%s2647_s1 + $0x18] sm:$0xff]  ;;  %v163_v54 = vld [vmem:[%s2647_s1 + $0x10] sm:$0xff]  ;;  %v162_v58 = vld [vmem:[%s2647_s1 + $0x8] sm:$0xff] }
  0x14   :  { %1210 = vmatprep.subr.mxu1 %v216_v33  ;;  %1131 = vmatpush3.msra.mxu0 %v168_v34  ;;  %v196_v51 = vld [vmem:[%s2647_s1 + $0x118] sm:$0xff]  ;;  %v195_v55 = vld [vmem:[%s2647_s1 + $0x110] sm:$0xff]  ;;  %v194_v59 = vld [vmem:[%s2647_s1 + $0x108] sm:$0xff] }
  0x15   :  { %1211 = vmatpush3.msra.mxu1 %v200_v35  ;;  %1132 = vmatprep.subr.mxu0 %v183_v36  ;;  %v177_v60 = vld [vmem:[%s2647_s1 + $0x80] sm:$0xff]  ;;  %v18_v63 = vld [vmem:[%s2648_s0 + $0x8] sm:$0xff]  ;;  %v20_v1 = vld [vmem:[%s2648_s0 + $0x18] sm:$0xff] }
  0x16   :  { %1212 = vmatprep.subr.mxu1 %v215_v37  ;;  %1133 = vmatpush3.msra.mxu0 %v167_v38  ;;  %v209_v61 = vld [vmem:[%s2647_s1 + $0x180] sm:$0xff]  ;;  %v19_v3 = vld [vmem:[%s2648_s0 + $0x10] sm:$0xff]  ;;  %v256_v4 = vld [vmem:[%s2647_s1 + $0x2f8] sm:$0xff] }
  0x17   :  { %1213 = vmatpush3.msra.mxu1 %v199_v39  ;;  %1134 = vmatprep.subr.mxu0 %v182_v40  ;;  %v161_v62 = vld [vmem:[%s2647_s1] sm:$0xff]  ;;  %v288_v5 = vld [vmem:[%s2647_s1 + $0x3f8] sm:$0xff]  ;;  %v27_v8 = vld [vmem:[%s2648_s0 + $0x50] sm:$0xff] }
  0x18   :  { %1214 = vmatprep.subr.mxu1 %v214_v41  ;;  %1135 = vmatpush3.msra.mxu0 %v166_v42  ;;  %v193_v0 = vld [vmem:[%s2647_s1 + $0x100] sm:$0xff]  ;;  %v240_v6 = vld [vmem:[%s2647_s1 + $0x278] sm:$0xff]  ;;  %v26_v10 = vld [vmem:[%s2648_s0 + $0x48] sm:$0xff] }
  0x19   :  { %1215 = vmatpush3.msra.mxu1 %v198_v43  ;;  %1136 = vmatprep.subr.mxu0 %v181_v44  ;;  %v17_v2 = vld [vmem:[%s2648_s0] sm:$0xff]  ;;  %v272_v7 = vld [vmem:[%s2647_s1 + $0x378] sm:$0xff]  ;;  %v255_v12 = vld [vmem:[%s2647_s1 + $0x2f0] sm:$0xff] }
  0x1a   :  { %1216 = vmatprep.subr.mxu1 %v213_v45  ;;  %1137 = vmatpush3.msra.mxu0 %v165_v46  ;;  %v29_v9 = vld [vmem:[%s2648_s0 + $0x60] sm:$0xff]  ;;  %v28_v11 = vld [vmem:[%s2648_s0 + $0x58] sm:$0xff]  ;;  %v287_v13 = vld [vmem:[%s2647_s1 + $0x3f0] sm:$0xff] }
  0x1b   :  { %1217 = vmatpush3.msra.mxu1 %v197_v47  ;;  %1138 = vmatprep.subr.mxu0 %v180_v48  ;;  %v239_v14 = vld [vmem:[%s2647_s1 + $0x270] sm:$0xff]  ;;  %v36_v16 = vld [vmem:[%s2648_s0 + $0x98] sm:$0xff]  ;;  %v38_v17 = vld [vmem:[%s2648_s0 + $0xa8] sm:$0xff] }
  0x1c   :  { %1218 = vmatprep.subr.mxu1 %v212_v49  ;;  %1139 = vmatpush3.msra.mxu0 %v164_v50  ;;  %v271_v15 = vld [vmem:[%s2647_s1 + $0x370] sm:$0xff]  ;;  %v37_v19 = vld [vmem:[%s2648_s0 + $0xa0] sm:$0xff]  ;;  %v254_v20 = vld [vmem:[%s2647_s1 + $0x2e8] sm:$0xff] }
  0x1d   :  { %1219 = vmatpush3.msra.mxu1 %v196_v51  ;;  %1140 = vmatprep.subr.mxu0 %v179_v52  ;;  %v35_v18 = vld [vmem:[%s2648_s0 + $0x90] sm:$0xff]  ;;  %v286_v21 = vld [vmem:[%s2647_s1 + $0x3e8] sm:$0xff]  ;;  %v45_v24 = vld [vmem:[%s2648_s0 + $0xe0] sm:$0xff] }
  0x1e   :  { %1220 = vmatprep.subr.mxu1 %v211_v53  ;;  %1141 = vmatpush3.msra.mxu0 %v163_v54  ;;  %v238_v22 = vld [vmem:[%s2647_s1 + $0x268] sm:$0xff]  ;;  %v47_v25 = vld [vmem:[%s2648_s0 + $0xf0] sm:$0xff]  ;;  %v44_v26 = vld [vmem:[%s2648_s0 + $0xd8] sm:$0xff] }
  0x1f   :  { %1221 = vmatpush3.msra.mxu1 %v195_v55  ;;  %1142 = vmatprep.subr.mxu0 %v178_v56  ;;  %v270_v23 = vld [vmem:[%s2647_s1 + $0x368] sm:$0xff]  ;;  %v253_v28 = vld [vmem:[%s2647_s1 + $0x2e0] sm:$0xff]  ;;  %v56_v33 = vld [vmem:[%s2648_s0 + $0x138] sm:$0xff] }
  0x20   :  { %1222 = vmatprep.subr.mxu1 %v210_v57  ;;  %1143 = vmatpush3.msra.mxu0 %v162_v58  ;;  %v46_v27 = vld [vmem:[%s2648_s0 + $0xe8] sm:$0xff]  ;;  %v285_v29 = vld [vmem:[%s2647_s1 + $0x3e0] sm:$0xff]  ;;  %v55_v35 = vld [vmem:[%s2648_s0 + $0x130] sm:$0xff] }
  0x21   :  { %1223 = vmatpush3.msra.mxu1 %v194_v59  ;;  %1144 = vmatprep.subr.mxu0 %v177_v60  ;;  %v237_v30 = vld [vmem:[%s2647_s1 + $0x260] sm:$0xff]  ;;  %v54_v32 = vld [vmem:[%s2648_s0 + $0x128] sm:$0xff]  ;;  %v252_v36 = vld [vmem:[%s2647_s1 + $0x2d8] sm:$0xff] }
  0x22   :  { %1224 = vmatprep.subr.mxu1 %v209_v61  ;;  %1145 = vmatpush3.msra.mxu0 %v161_v62  ;;  %v269_v31 = vld [vmem:[%s2647_s1 + $0x360] sm:$0xff]  ;;  %v284_v37 = vld [vmem:[%s2647_s1 + $0x3d8] sm:$0xff]  ;;  %v63_v40 = vld [vmem:[%s2648_s0 + $0x170] sm:$0xff] }
  0x23   :  { %369 = vmatprep.mubr.f32.mxu0 %v18_v63  ;;  %1225 = vmatpush3.msra.mxu1 %v193_v0  ;;  %v53_v34 = vld [vmem:[%s2648_s0 + $0x120] sm:$0xff]  ;;  %v236_v38 = vld [vmem:[%s2647_s1 + $0x258] sm:$0xff]  ;;  %v62_v42 = vld [vmem:[%s2648_s0 + $0x168] sm:$0xff] }
  0x24   :  { %514 = vmatprep.mubr.f32.mxu1 %v20_v1  ;;  %370 = vmatmul.mubr.f32.vlgmr.msra.gmra.mxu0 %v17_v2  ;;  %v268_v39 = vld [vmem:[%s2647_s1 + $0x358] sm:$0xff]  ;;  %v65_v41 = vld [vmem:[%s2648_s0 + $0x180] sm:$0xff]  ;;  %v251_v44 = vld [vmem:[%s2647_s1 + $0x2d0] sm:$0xff] }
  0x25   :  { %515 = vmatmul.mubr.f32.vlgmr.msra.gmra.mxu1 %v19_v3  ;;  %1274 = vmatprep.subr.mxu0 %v256_v4  ;;  %v64_v43 = vld [vmem:[%s2648_s0 + $0x178] sm:$0xff]  ;;  %v283_v45 = vld [vmem:[%s2647_s1 + $0x3d0] sm:$0xff]  ;;  %v74_v49 = vld [vmem:[%s2648_s0 + $0x1c8] sm:$0xff] }
  0x26   :  { %1354 = vmatprep.subr.mxu1 %v288_v5  ;;  %1275 = vmatpush3.msra.mxu0 %v240_v6  ;;  %v235_v46 = vld [vmem:[%s2647_s1 + $0x250] sm:$0xff]  ;;  %v72_v48 = vld [vmem:[%s2648_s0 + $0x1b8] sm:$0xff]  ;;  %v73_v51 = vld [vmem:[%s2648_s0 + $0x1c0] sm:$0xff] }
  0x27   :  { %1355 = vmatpush3.msra.mxu1 %v272_v7  ;;  %374 = vmatprep.mubr.f32.mxu0 %v27_v8  ;;  %v267_v47 = vld [vmem:[%s2647_s1 + $0x350] sm:$0xff]  ;;  %v250_v52 = vld [vmem:[%s2647_s1 + $0x2c8] sm:$0xff]  ;;  %v81_v56 = vld [vmem:[%s2648_s0 + $0x200] sm:$0xff] }
  0x28   :  { %519 = vmatprep.mubr.f32.mxu1 %v29_v9  ;;  %375 = vmatmul.mubr.f32.gmra.mxu0 %v26_v10  ;;  %v71_v50 = vld [vmem:[%s2648_s0 + $0x1b0] sm:$0xff]  ;;  %v282_v53 = vld [vmem:[%s2647_s1 + $0x3c8] sm:$0xff]  ;;  %v80_v58 = vld [vmem:[%s2648_s0 + $0x1f8] sm:$0xff] }
  0x29   :  { %520 = vmatmul.mubr.f32.gmra.mxu1 %v28_v11  ;;  %1276 = vmatprep.subr.mxu0 %v255_v12  ;;  %v234_v54 = vld [vmem:[%s2647_s1 + $0x248] sm:$0xff]  ;;  %v83_v57 = vld [vmem:[%s2648_s0 + $0x210] sm:$0xff]  ;;  %v249_v60 = vld [vmem:[%s2647_s1 + $0x2c0] sm:$0xff] }
  0x2a   :  { %1356 = vmatprep.subr.mxu1 %v287_v13  ;;  %1277 = vmatpush3.msra.mxu0 %v239_v14  ;;  %v266_v55 = vld [vmem:[%s2647_s1 + $0x348] sm:$0xff]  ;;  %v281_v61 = vld [vmem:[%s2647_s1 + $0x3c0] sm:$0xff]  ;;  %v92_v1 = vld [vmem:[%s2648_s0 + $0x258] sm:$0xff] }
  0x2b   :  { %1357 = vmatpush3.msra.mxu1 %v271_v15  ;;  %379 = vmatprep.mubr.f32.mxu0 %v36_v16  ;;  %v82_v59 = vld [vmem:[%s2648_s0 + $0x208] sm:$0xff]  ;;  %v233_v62 = vld [vmem:[%s2647_s1 + $0x240] sm:$0xff]  ;;  %v91_v3 = vld [vmem:[%s2648_s0 + $0x250] sm:$0xff] }
  0x2c   :  { %524 = vmatprep.mubr.f32.mxu1 %v38_v17  ;;  %380 = vmatmul.mubr.f32.gmra.mxu0 %v35_v18  ;;  %v265_v63 = vld [vmem:[%s2647_s1 + $0x340] sm:$0xff]  ;;  %v90_v0 = vld [vmem:[%s2648_s0 + $0x248] sm:$0xff]  ;;  %v248_v4 = vld [vmem:[%s2647_s1 + $0x2b8] sm:$0xff] }
  0x2d   :  { %525 = vmatmul.mubr.f32.gmra.mxu1 %v37_v19  ;;  %1278 = vmatprep.subr.mxu0 %v254_v20  ;;  %v89_v2 = vld [vmem:[%s2648_s0 + $0x240] sm:$0xff]  ;;  %v280_v5 = vld [vmem:[%s2647_s1 + $0x3b8] sm:$0xff]  ;;  %v99_v8 = vld [vmem:[%s2648_s0 + $0x290] sm:$0xff] }
  0x2e   :  { %1358 = vmatprep.subr.mxu1 %v286_v21  ;;  %1279 = vmatpush3.msra.mxu0 %v238_v22  ;;  %v232_v6 = vld [vmem:[%s2647_s1 + $0x238] sm:$0xff]  ;;  %v101_v9 = vld [vmem:[%s2648_s0 + $0x2a0] sm:$0xff]  ;;  %v98_v10 = vld [vmem:[%s2648_s0 + $0x288] sm:$0xff] }
  0x2f   :  { %1359 = vmatpush3.msra.mxu1 %v270_v23  ;;  %384 = vmatprep.mubr.f32.mxu0 %v45_v24  ;;  %v264_v7 = vld [vmem:[%s2647_s1 + $0x338] sm:$0xff]  ;;  %v247_v12 = vld [vmem:[%s2647_s1 + $0x2b0] sm:$0xff]  ;;  %v110_v17 = vld [vmem:[%s2648_s0 + $0x2e8] sm:$0xff] }
  0x30   :  { %529 = vmatprep.mubr.f32.mxu1 %v47_v25  ;;  %385 = vmatmul.mubr.f32.gmra.mxu0 %v44_v26  ;;  %v100_v11 = vld [vmem:[%s2648_s0 + $0x298] sm:$0xff]  ;;  %v279_v13 = vld [vmem:[%s2647_s1 + $0x3b0] sm:$0xff]  ;;  %v109_v19 = vld [vmem:[%s2648_s0 + $0x2e0] sm:$0xff] }
  0x31   :  { %530 = vmatmul.mubr.f32.gmra.mxu1 %v46_v27  ;;  %1280 = vmatprep.subr.mxu0 %v253_v28  ;;  %v231_v14 = vld [vmem:[%s2647_s1 + $0x230] sm:$0xff]  ;;  %v108_v16 = vld [vmem:[%s2648_s0 + $0x2d8] sm:$0xff]  ;;  %v246_v20 = vld [vmem:[%s2647_s1 + $0x2a8] sm:$0xff] }
  0x32   :  { %1360 = vmatprep.subr.mxu1 %v285_v29  ;;  %1281 = vmatpush3.msra.mxu0 %v237_v30  ;;  %v263_v15 = vld [vmem:[%s2647_s1 + $0x330] sm:$0xff]  ;;  %v278_v21 = vld [vmem:[%s2647_s1 + $0x3a8] sm:$0xff]  ;;  %v117_v24 = vld [vmem:[%s2648_s0 + $0x320] sm:$0xff] }
  0x33   :  { %1361 = vmatpush3.msra.mxu1 %v269_v31  ;;  %389 = vmatprep.mubr.f32.mxu0 %v54_v32  ;;  %v107_v18 = vld [vmem:[%s2648_s0 + $0x2d0] sm:$0xff]  ;;  %v230_v22 = vld [vmem:[%s2647_s1 + $0x228] sm:$0xff]  ;;  %v116_v26 = vld [vmem:[%s2648_s0 + $0x318] sm:$0xff] }
  0x34   :  { %534 = vmatprep.mubr.f32.mxu1 %v56_v33  ;;  %390 = vmatmul.mubr.f32.gmra.mxu0 %v53_v34  ;;  %v262_v23 = vld [vmem:[%s2647_s1 + $0x328] sm:$0xff]  ;;  %v119_v25 = vld [vmem:[%s2648_s0 + $0x330] sm:$0xff]  ;;  %v245_v28 = vld [vmem:[%s2647_s1 + $0x2a0] sm:$0xff] }
  0x35   :  { %535 = vmatmul.mubr.f32.gmra.mxu1 %v55_v35  ;;  %1282 = vmatprep.subr.mxu0 %v252_v36  ;;  %v118_v27 = vld [vmem:[%s2648_s0 + $0x328] sm:$0xff]  ;;  %v277_v29 = vld [vmem:[%s2647_s1 + $0x3a0] sm:$0xff]  ;;  %v128_v33 = vld [vmem:[%s2648_s0 + $0x378] sm:$0xff] }
  0x36   :  { %1362 = vmatprep.subr.mxu1 %v284_v37  ;;  %1283 = vmatpush3.msra.mxu0 %v236_v38  ;;  %v229_v30 = vld [vmem:[%s2647_s1 + $0x220] sm:$0xff]  ;;  %v126_v32 = vld [vmem:[%s2648_s0 + $0x368] sm:$0xff]  ;;  %v127_v35 = vld [vmem:[%s2648_s0 + $0x370] sm:$0xff] }
  0x37   :  { %1363 = vmatpush3.msra.mxu1 %v268_v39  ;;  %394 = vmatprep.mubr.f32.mxu0 %v63_v40  ;;  %v261_v31 = vld [vmem:[%s2647_s1 + $0x320] sm:$0xff]  ;;  %v244_v36 = vld [vmem:[%s2647_s1 + $0x298] sm:$0xff]  ;;  %v135_v40 = vld [vmem:[%s2648_s0 + $0x3b0] sm:$0xff] }
  0x38   :  { %539 = vmatprep.mubr.f32.mxu1 %v65_v41  ;;  %395 = vmatmul.mubr.f32.gmra.mxu0 %v62_v42  ;;  %v125_v34 = vld [vmem:[%s2648_s0 + $0x360] sm:$0xff]  ;;  %v276_v37 = vld [vmem:[%s2647_s1 + $0x398] sm:$0xff]  ;;  %v134_v42 = vld [vmem:[%s2648_s0 + $0x3a8] sm:$0xff] }
  0x39   :  { %540 = vmatmul.mubr.f32.gmra.mxu1 %v64_v43  ;;  %1284 = vmatprep.subr.mxu0 %v251_v44  ;;  %v228_v38 = vld [vmem:[%s2647_s1 + $0x218] sm:$0xff]  ;;  %v137_v41 = vld [vmem:[%s2648_s0 + $0x3c0] sm:$0xff]  ;;  %v243_v44 = vld [vmem:[%s2647_s1 + $0x290] sm:$0xff] }
  0x3a   :  { %1364 = vmatprep.subr.mxu1 %v283_v45  ;;  %1285 = vmatpush3.msra.mxu0 %v235_v46  ;;  %v260_v39 = vld [vmem:[%s2647_s1 + $0x318] sm:$0xff]  ;;  %v275_v45 = vld [vmem:[%s2647_s1 + $0x390] sm:$0xff] }
  0x3b   :  { %1365 = vmatpush3.msra.mxu1 %v267_v47  ;;  %399 = vmatprep.mubr.f32.mxu0 %v72_v48  ;;  %v136_v43 = vld [vmem:[%s2648_s0 + $0x3b8] sm:$0xff]  ;;  %v227_v46 = vld [vmem:[%s2647_s1 + $0x210] sm:$0xff] }
  0x3c   :  { %544 = vmatprep.mubr.f32.mxu1 %v74_v49  ;;  %400 = vmatmul.mubr.f32.gmra.mxu0 %v71_v50  ;;  %v259_v47 = vld [vmem:[%s2647_s1 + $0x310] sm:$0xff]  ;;  %v144_v48 = vld [vmem:[%s2648_s0 + $0x3f8] sm:$0xff]  ;;  %v146_v49 = vld [vmem:[%s2648_s0 + $0x408] sm:$0xff] }
  0x3d   :  { %545 = vmatmul.mubr.f32.gmra.mxu1 %v73_v51  ;;  %1286 = vmatprep.subr.mxu0 %v250_v52  ;;  %v143_v50 = vld [vmem:[%s2648_s0 + $0x3f0] sm:$0xff]  ;;  %v145_v51 = vld [vmem:[%s2648_s0 + $0x400] sm:$0xff]  ;;  %v242_v52 = vld [vmem:[%s2647_s1 + $0x288] sm:$0xff] }
  0x3e   :  { %1366 = vmatprep.subr.mxu1 %v282_v53  ;;  %1287 = vmatpush3.msra.mxu0 %v234_v54  ;;  %v274_v53 = vld [vmem:[%s2647_s1 + $0x388] sm:$0xff] }
  0x3f   :  { %1367 = vmatpush3.msra.mxu1 %v266_v55  ;;  %404 = vmatprep.mubr.f32.mxu0 %v81_v56  ;;  %v226_v54 = vld [vmem:[%s2647_s1 + $0x208] sm:$0xff]  ;;  %v153_v56 = vld [vmem:[%s2648_s0 + $0x440] sm:$0xff] }
  0x40   :  { %549 = vmatprep.mubr.f32.mxu1 %v83_v57  ;;  %405 = vmatmul.mubr.f32.gmra.mxu0 %v80_v58  ;;  %v258_v55 = vld [vmem:[%s2647_s1 + $0x308] sm:$0xff]  ;;  %v155_v57 = vld [vmem:[%s2648_s0 + $0x450] sm:$0xff]  ;;  %v152_v58 = vld [vmem:[%s2648_s0 + $0x438] sm:$0xff] }
  0x41   :  { %550 = vmatmul.mubr.f32.gmra.mxu1 %v82_v59  ;;  %1288 = vmatprep.subr.mxu0 %v249_v60  ;;  %v154_v59 = vld [vmem:[%s2648_s0 + $0x448] sm:$0xff]  ;;  %v241_v60 = vld [vmem:[%s2647_s1 + $0x280] sm:$0xff] }
  0x42   :  { %1368 = vmatprep.subr.mxu1 %v281_v61  ;;  %1289 = vmatpush3.msra.mxu0 %v233_v62  ;;  %v273_v61 = vld [vmem:[%s2647_s1 + $0x380] sm:$0xff] }
  0x43   :  { %1369 = vmatpush3.msra.mxu1 %v265_v63  ;;  %409 = vmatprep.mubr.f32.mxu0 %v90_v0  ;;  %v225_v62 = vld [vmem:[%s2647_s1 + $0x200] sm:$0xff]  ;;  %v22_v0 = vld [vmem:[%s2648_s0 + $0x28] sm:$0xff] }
  0x44   :  { %554 = vmatprep.mubr.f32.mxu1 %v92_v1  ;;  %410 = vmatmul.mubr.f32.gmra.mxu0 %v89_v2  ;;  %v257_v63 = vld [vmem:[%s2647_s1 + $0x300] sm:$0xff]  ;;  %v24_v1 = vld [vmem:[%s2648_s0 + $0x38] sm:$0xff] }
  0x45   :  { %555 = vmatmul.mubr.f32.gmra.mxu1 %v91_v3  ;;  %1290 = vmatprep.subr.mxu0 %v248_v4  ;;  %v21_v2 = vld [vmem:[%s2648_s0 + $0x20] sm:$0xff]  ;;  %v23_v3 = vld [vmem:[%s2648_s0 + $0x30] sm:$0xff]  ;;  %v304_v4 = vld [vmem:[%s2647_s1 + $0x478] sm:$0xff] }
  0x46   :  { %1370 = vmatprep.subr.mxu1 %v280_v5  ;;  %1291 = vmatpush3.msra.mxu0 %v232_v6  ;;  %v31_v5 = vld [vmem:[%s2648_s0 + $0x70] sm:$0xff]  ;;  %v33_v6 = vld [vmem:[%s2648_s0 + $0x80] sm:$0xff] }
  0x47   :  { %1371 = vmatpush3.msra.mxu1 %v264_v7  ;;  %414 = vmatprep.mubr.f32.mxu0 %v99_v8  ;;  %v30_v7 = vld [vmem:[%s2648_s0 + $0x68] sm:$0xff]  ;;  %v32_v8 = vld [vmem:[%s2648_s0 + $0x78] sm:$0xff] }
  0x48   :  { %559 = vmatprep.mubr.f32.mxu1 %v101_v9  ;;  %415 = vmatmul.mubr.f32.gmra.mxu0 %v98_v10  ;;  %v303_v9 = vld [vmem:[%s2647_s1 + $0x470] sm:$0xff]  ;;  %v40_v10 = vld [vmem:[%s2648_s0 + $0xb8] sm:$0xff] }
  0x49   :  { %560 = vmatmul.mubr.f32.gmra.mxu1 %v100_v11  ;;  %1292 = vmatprep.subr.mxu0 %v247_v12  ;;  %v42_v11 = vld [vmem:[%s2648_s0 + $0xc8] sm:$0xff]  ;;  %v39_v12 = vld [vmem:[%s2648_s0 + $0xb0] sm:$0xff] }
  0x4a   :  { %1372 = vmatprep.subr.mxu1 %v279_v13  ;;  %1293 = vmatpush3.msra.mxu0 %v231_v14  ;;  %v41_v13 = vld [vmem:[%s2648_s0 + $0xc0] sm:$0xff]  ;;  %v302_v14 = vld [vmem:[%s2647_s1 + $0x468] sm:$0xff] }
  0x4b   :  { %1373 = vmatpush3.msra.mxu1 %v263_v15  ;;  %419 = vmatprep.mubr.f32.mxu0 %v108_v16  ;;  %v49_v15 = vld [vmem:[%s2648_s0 + $0x100] sm:$0xff]  ;;  %v51_v16 = vld [vmem:[%s2648_s0 + $0x110] sm:$0xff] }
  0x4c   :  { %564 = vmatprep.mubr.f32.mxu1 %v110_v17  ;;  %420 = vmatmul.mubr.f32.gmra.mxu0 %v107_v18  ;;  %v48_v17 = vld [vmem:[%s2648_s0 + $0xf8] sm:$0xff]  ;;  %v50_v18 = vld [vmem:[%s2648_s0 + $0x108] sm:$0xff] }
  0x4d   :  { %565 = vmatmul.mubr.f32.gmra.mxu1 %v109_v19  ;;  %1294 = vmatprep.subr.mxu0 %v246_v20  ;;  %v301_v19 = vld [vmem:[%s2647_s1 + $0x460] sm:$0xff]  ;;  %v58_v20 = vld [vmem:[%s2648_s0 + $0x148] sm:$0xff] }
  0x4e   :  { %1374 = vmatprep.subr.mxu1 %v278_v21  ;;  %1295 = vmatpush3.msra.mxu0 %v230_v22  ;;  %v60_v21 = vld [vmem:[%s2648_s0 + $0x158] sm:$0xff]  ;;  %v57_v22 = vld [vmem:[%s2648_s0 + $0x140] sm:$0xff] }
  0x4f   :  { %1375 = vmatpush3.msra.mxu1 %v262_v23  ;;  %424 = vmatprep.mubr.f32.mxu0 %v117_v24  ;;  %v59_v23 = vld [vmem:[%s2648_s0 + $0x150] sm:$0xff]  ;;  %v300_v24 = vld [vmem:[%s2647_s1 + $0x458] sm:$0xff] }
  0x50   :  { %569 = vmatprep.mubr.f32.mxu1 %v119_v25  ;;  %425 = vmatmul.mubr.f32.gmra.mxu0 %v116_v26  ;;  %v67_v25 = vld [vmem:[%s2648_s0 + $0x190] sm:$0xff]  ;;  %v69_v26 = vld [vmem:[%s2648_s0 + $0x1a0] sm:$0xff] }
  0x51   :  { %570 = vmatmul.mubr.f32.gmra.mxu1 %v118_v27  ;;  %1296 = vmatprep.subr.mxu0 %v245_v28  ;;  %v66_v27 = vld [vmem:[%s2648_s0 + $0x188] sm:$0xff]  ;;  %v68_v28 = vld [vmem:[%s2648_s0 + $0x198] sm:$0xff] }
  0x52   :  { %1376 = vmatprep.subr.mxu1 %v277_v29  ;;  %1297 = vmatpush3.msra.mxu0 %v229_v30  ;;  %v299_v29 = vld [vmem:[%s2647_s1 + $0x450] sm:$0xff]  ;;  %v76_v30 = vld [vmem:[%s2648_s0 + $0x1d8] sm:$0xff] }
  0x53   :  { %1377 = vmatpush3.msra.mxu1 %v261_v31  ;;  %429 = vmatprep.mubr.f32.mxu0 %v126_v32  ;;  %v78_v31 = vld [vmem:[%s2648_s0 + $0x1e8] sm:$0xff]  ;;  %v75_v32 = vld [vmem:[%s2648_s0 + $0x1d0] sm:$0xff] }
  0x54   :  { %574 = vmatprep.mubr.f32.mxu1 %v128_v33  ;;  %430 = vmatmul.mubr.f32.gmra.mxu0 %v125_v34  ;;  %v77_v33 = vld [vmem:[%s2648_s0 + $0x1e0] sm:$0xff]  ;;  %v298_v34 = vld [vmem:[%s2647_s1 + $0x448] sm:$0xff] }
  0x55   :  { %575 = vmatmul.mubr.f32.gmra.mxu1 %v127_v35  ;;  %1298 = vmatprep.subr.mxu0 %v244_v36  ;;  %v85_v35 = vld [vmem:[%s2648_s0 + $0x220] sm:$0xff]  ;;  %v87_v36 = vld [vmem:[%s2648_s0 + $0x230] sm:$0xff] }
  0x56   :  { %1378 = vmatprep.subr.mxu1 %v276_v37  ;;  %1299 = vmatpush3.msra.mxu0 %v228_v38  ;;  %v84_v37 = vld [vmem:[%s2648_s0 + $0x218] sm:$0xff]  ;;  %v86_v38 = vld [vmem:[%s2648_s0 + $0x228] sm:$0xff] }
  0x57   :  { %1379 = vmatpush3.msra.mxu1 %v260_v39  ;;  %434 = vmatprep.mubr.f32.mxu0 %v135_v40  ;;  %v297_v39 = vld [vmem:[%s2647_s1 + $0x440] sm:$0xff]  ;;  %v94_v40 = vld [vmem:[%s2648_s0 + $0x268] sm:$0xff] }
  0x58   :  { %579 = vmatprep.mubr.f32.mxu1 %v137_v41  ;;  %435 = vmatmul.mubr.f32.gmra.mxu0 %v134_v42  ;;  %v96_v41 = vld [vmem:[%s2648_s0 + $0x278] sm:$0xff]  ;;  %v93_v42 = vld [vmem:[%s2648_s0 + $0x260] sm:$0xff] }
  0x59   :  { %580 = vmatmul.mubr.f32.gmra.mxu1 %v136_v43  ;;  %1300 = vmatprep.subr.mxu0 %v243_v44  ;;  %v95_v43 = vld [vmem:[%s2648_s0 + $0x270] sm:$0xff]  ;;  %v296_v44 = vld [vmem:[%s2647_s1 + $0x438] sm:$0xff] }
  0x5a   :  { %1380 = vmatprep.subr.mxu1 %v275_v45  ;;  %1301 = vmatpush3.msra.mxu0 %v227_v46  ;;  %v103_v45 = vld [vmem:[%s2648_s0 + $0x2b0] sm:$0xff]  ;;  %v105_v46 = vld [vmem:[%s2648_s0 + $0x2c0] sm:$0xff] }
  0x5b   :  { %1381 = vmatpush3.msra.mxu1 %v259_v47  ;;  %439 = vmatprep.mubr.f32.mxu0 %v144_v48  ;;  %v102_v47 = vld [vmem:[%s2648_s0 + $0x2a8] sm:$0xff]  ;;  %v104_v48 = vld [vmem:[%s2648_s0 + $0x2b8] sm:$0xff] }
  0x5c   :  { %584 = vmatprep.mubr.f32.mxu1 %v146_v49  ;;  %440 = vmatmul.mubr.f32.gmra.mxu0 %v143_v50  ;;  %v295_v49 = vld [vmem:[%s2647_s1 + $0x430] sm:$0xff]  ;;  %v112_v50 = vld [vmem:[%s2648_s0 + $0x2f8] sm:$0xff] }
  0x5d   :  { %585 = vmatmul.mubr.f32.gmra.mxu1 %v145_v51  ;;  %1302 = vmatprep.subr.mxu0 %v242_v52  ;;  %v114_v51 = vld [vmem:[%s2648_s0 + $0x308] sm:$0xff]  ;;  %v111_v52 = vld [vmem:[%s2648_s0 + $0x2f0] sm:$0xff] }
  0x5e   :  { %1382 = vmatprep.subr.mxu1 %v274_v53  ;;  %1303 = vmatpush3.msra.mxu0 %v226_v54  ;;  %v113_v53 = vld [vmem:[%s2648_s0 + $0x300] sm:$0xff]  ;;  %v294_v54 = vld [vmem:[%s2647_s1 + $0x428] sm:$0xff] }
  0x5f   :  { %1383 = vmatpush3.msra.mxu1 %v258_v55  ;;  %444 = vmatprep.mubr.f32.mxu0 %v153_v56  ;;  %v121_v55 = vld [vmem:[%s2648_s0 + $0x340] sm:$0xff]  ;;  %v123_v56 = vld [vmem:[%s2648_s0 + $0x350] sm:$0xff] }
  0x60   :  { %589 = vmatprep.mubr.f32.mxu1 %v155_v57  ;;  %445 = vmatmul.mubr.f32.gmra.mxu0 %v152_v58  ;;  %v120_v57 = vld [vmem:[%s2648_s0 + $0x338] sm:$0xff]  ;;  %v122_v58 = vld [vmem:[%s2648_s0 + $0x348] sm:$0xff] }
  0x61   :  { %590 = vmatmul.mubr.f32.gmra.mxu1 %v154_v59  ;;  %1304 = vmatprep.subr.mxu0 %v241_v60  ;;  %v293_v59 = vld [vmem:[%s2647_s1 + $0x420] sm:$0xff]  ;;  %v130_v60 = vld [vmem:[%s2648_s0 + $0x388] sm:$0xff] }
  0x62   :  { %1384 = vmatprep.subr.mxu1 %v273_v61  ;;  %1305 = vmatpush3.msra.mxu0 %v225_v62  ;;  %v132_v61 = vld [vmem:[%s2648_s0 + $0x398] sm:$0xff]  ;;  %v129_v62 = vld [vmem:[%s2648_s0 + $0x380] sm:$0xff] }
  0x63   :  { %1385 = vmatpush3.msra.mxu1 %v257_v63  ;;  %659 = vmatprep.mubr.f32.mxu0 %v22_v0  ;;  %v131_v63 = vld [vmem:[%s2648_s0 + $0x390] sm:$0xff]  ;;  %v292_v0 = vld [vmem:[%s2647_s1 + $0x418] sm:$0xff] }
  0x64   :  { %804 = vmatprep.mubr.f32.mxu1 %v24_v1  ;;  %660 = vmatmul.mubr.f32.vlgmr.msra.gmra.mxu0 %v21_v2  ;;  %v139_v1 = vld [vmem:[%s2648_s0 + $0x3d0] sm:$0xff]  ;;  %v141_v2 = vld [vmem:[%s2648_s0 + $0x3e0] sm:$0xff] }
  0x65   :  { %805 = vmatmul.mubr.f32.vlgmr.msra.gmra.mxu1 %v23_v3  ;;  %1466 = vmatprep.subr.mxu0 %v304_v4  ;;  %v138_v3 = vld [vmem:[%s2648_s0 + $0x3c8] sm:$0xff] }
  0x66   :  { %1522 = vmatprep.subr.mxu1 %v304_v4  ;;  %1467 = vmatpush3.msra.mxu0 %v304_v4 }
  0x67   :  { %1538 = vmatpush3.msra.mxu1 %v304_v4  ;;  %664 = vmatprep.mubr.f32.mxu0 %v31_v5  ;;  %v140_v4 = vld [vmem:[%s2648_s0 + $0x3d8] sm:$0xff]  ;;  %v291_v5 = vld [vmem:[%s2647_s1 + $0x410] sm:$0xff] }
  0x68   :  { %809 = vmatprep.mubr.f32.mxu1 %v33_v6  ;;  %665 = vmatmul.mubr.f32.gmra.mxu0 %v30_v7  ;;  %v148_v6 = vld [vmem:[%s2648_s0 + $0x418] sm:$0xff]  ;;  %v150_v7 = vld [vmem:[%s2648_s0 + $0x428] sm:$0xff] }
  0x69   :  { %810 = vmatmul.mubr.f32.gmra.mxu1 %v32_v8  ;;  %1468 = vmatprep.subr.mxu0 %v303_v9  ;;  %v147_v8 = vld [vmem:[%s2648_s0 + $0x410] sm:$0xff] }
  0x6a   :  { %1523 = vmatprep.subr.mxu1 %v303_v9  ;;  %1469 = vmatpush3.msra.mxu0 %v303_v9 }
  0x6b   :  { %1539 = vmatpush3.msra.mxu1 %v303_v9  ;;  %669 = vmatprep.mubr.f32.mxu0 %v40_v10  ;;  %v149_v9 = vld [vmem:[%s2648_s0 + $0x420] sm:$0xff]  ;;  %v290_v10 = vld [vmem:[%s2647_s1 + $0x408] sm:$0xff] }
  0x6c   :  { %814 = vmatprep.mubr.f32.mxu1 %v42_v11  ;;  %670 = vmatmul.mubr.f32.gmra.mxu0 %v39_v12  ;;  %v157_v11 = vld [vmem:[%s2648_s0 + $0x460] sm:$0xff]  ;;  %v159_v12 = vld [vmem:[%s2648_s0 + $0x470] sm:$0xff] }
  0x6d   :  { %815 = vmatmul.mubr.f32.gmra.mxu1 %v41_v13  ;;  %1470 = vmatprep.subr.mxu0 %v302_v14  ;;  %v156_v13 = vld [vmem:[%s2648_s0 + $0x458] sm:$0xff] }
  0x6e   :  { %1524 = vmatprep.subr.mxu1 %v302_v14  ;;  %1471 = vmatpush3.msra.mxu0 %v302_v14 }
  0x6f   :  { %1540 = vmatpush3.msra.mxu1 %v302_v14  ;;  %674 = vmatprep.mubr.f32.mxu0 %v49_v15  ;;  %v158_v14 = vld [vmem:[%s2648_s0 + $0x468] sm:$0xff]  ;;  %v289_v15 = vld [vmem:[%s2647_s1 + $0x400] sm:$0xff] }
  0x70   :  { %819 = vmatprep.mubr.f32.mxu1 %v51_v16  ;;  %675 = vmatmul.mubr.f32.gmra.mxu0 %v48_v17  ;;  %v25_v16 = vld [vmem:[%s2648_s0 + $0x40] sm:$0xff] }
  0x71   :  { %820 = vmatmul.mubr.f32.gmra.mxu1 %v50_v18  ;;  %1472 = vmatprep.subr.mxu0 %v301_v19  ;;  %v97_v17 = vld [vmem:[%s2648_s0 + $0x280] sm:$0xff]  ;;  %v34_v18 = vld [vmem:[%s2648_s0 + $0x88] sm:$0xff] }
  0x72   :  { %1525 = vmatprep.subr.mxu1 %v301_v19  ;;  %1473 = vmatpush3.msra.mxu0 %v301_v19 }
  0x73   :  { %1541 = vmatpush3.msra.mxu1 %v301_v19  ;;  %679 = vmatprep.mubr.f32.mxu0 %v58_v20  ;;  %v106_v19 = vld [vmem:[%s2648_s0 + $0x2c8] sm:$0xff]  ;;  %v43_v20 = vld [vmem:[%s2648_s0 + $0xd0] sm:$0xff] }
  0x74   :  { %824 = vmatprep.mubr.f32.mxu1 %v60_v21  ;;  %680 = vmatmul.mubr.f32.gmra.mxu0 %v57_v22  ;;  %v115_v21 = vld [vmem:[%s2648_s0 + $0x310] sm:$0xff]  ;;  %v52_v22 = vld [vmem:[%s2648_s0 + $0x118] sm:$0xff] }
  0x75   :  { %825 = vmatmul.mubr.f32.gmra.mxu1 %v59_v23  ;;  %1474 = vmatprep.subr.mxu0 %v300_v24  ;;  %v124_v23 = vld [vmem:[%s2648_s0 + $0x358] sm:$0xff] }
  0x76   :  { %1526 = vmatprep.subr.mxu1 %v300_v24  ;;  %1475 = vmatpush3.msra.mxu0 %v300_v24 }
  0x77   :  { %1542 = vmatpush3.msra.mxu1 %v300_v24  ;;  %684 = vmatprep.mubr.f32.mxu0 %v67_v25  ;;  %v61_v24 = vld [vmem:[%s2648_s0 + $0x160] sm:$0xff] }
  0x78   :  { %829 = vmatprep.mubr.f32.mxu1 %v69_v26  ;;  %685 = vmatmul.mubr.f32.gmra.mxu0 %v66_v27  ;;  %v133_v25 = vld [vmem:[%s2648_s0 + $0x3a0] sm:$0xff]  ;;  %v70_v26 = vld [vmem:[%s2648_s0 + $0x1a8] sm:$0xff] }
  0x79   :  { %830 = vmatmul.mubr.f32.gmra.mxu1 %v68_v28  ;;  %1476 = vmatprep.subr.mxu0 %v299_v29  ;;  %v142_v27 = vld [vmem:[%s2648_s0 + $0x3e8] sm:$0xff]  ;;  %v79_v28 = vld [vmem:[%s2648_s0 + $0x1f0] sm:$0xff] }
  0x7a   :  { %1527 = vmatprep.subr.mxu1 %v299_v29  ;;  %1477 = vmatpush3.msra.mxu0 %v299_v29 }
  0x7b   :  { %1543 = vmatpush3.msra.mxu1 %v299_v29  ;;  %689 = vmatprep.mubr.f32.mxu0 %v76_v30  ;;  %v151_v29 = vld [vmem:[%s2648_s0 + $0x430] sm:$0xff]  ;;  %v88_v30 = vld [vmem:[%s2648_s0 + $0x238] sm:$0xff] }
  0x7c   :  { %834 = vmatprep.mubr.f32.mxu1 %v78_v31  ;;  %690 = vmatmul.mubr.f32.gmra.mxu0 %v75_v32  ;;  %v160_v31 = vld [vmem:[%s2648_s0 + $0x478] sm:$0xff] }
  0x7d   :  { %835 = vmatmul.mubr.f32.gmra.mxu1 %v77_v33  ;;  %1478 = vmatprep.subr.mxu0 %v298_v34 }
  0x7e   :  { %1528 = vmatprep.subr.mxu1 %v298_v34  ;;  %1479 = vmatpush3.msra.mxu0 %v298_v34 }
  0x7f   :  { %1544 = vmatpush3.msra.mxu1 %v298_v34  ;;  %694 = vmatprep.mubr.f32.mxu0 %v85_v35 }
  0x80   :  { %839 = vmatprep.mubr.f32.mxu1 %v87_v36  ;;  %695 = vmatmul.mubr.f32.gmra.mxu0 %v84_v37 }
  0x81   :  { %840 = vmatmul.mubr.f32.gmra.mxu1 %v86_v38  ;;  %1480 = vmatprep.subr.mxu0 %v297_v39 }
  0x82   :  { %1529 = vmatprep.subr.mxu1 %v297_v39  ;;  %1481 = vmatpush3.msra.mxu0 %v297_v39 }
  0x83   :  { %1545 = vmatpush3.msra.mxu1 %v297_v39  ;;  %699 = vmatprep.mubr.f32.mxu0 %v94_v40 }
  0x84   :  { %844 = vmatprep.mubr.f32.mxu1 %v96_v41  ;;  %700 = vmatmul.mubr.f32.gmra.mxu0 %v93_v42 }
  0x85   :  { %845 = vmatmul.mubr.f32.gmra.mxu1 %v95_v43  ;;  %1482 = vmatprep.subr.mxu0 %v296_v44 }
  0x86   :  { %1530 = vmatprep.subr.mxu1 %v296_v44  ;;  %1483 = vmatpush3.msra.mxu0 %v296_v44 }
  0x87   :  { %1546 = vmatpush3.msra.mxu1 %v296_v44  ;;  %704 = vmatprep.mubr.f32.mxu0 %v103_v45 }
  0x88   :  { %849 = vmatprep.mubr.f32.mxu1 %v105_v46  ;;  %705 = vmatmul.mubr.f32.gmra.mxu0 %v102_v47 }
  0x89   :  { %850 = vmatmul.mubr.f32.gmra.mxu1 %v104_v48  ;;  %1484 = vmatprep.subr.mxu0 %v295_v49 }
  0x8a   :  { %1531 = vmatprep.subr.mxu1 %v295_v49  ;;  %1485 = vmatpush3.msra.mxu0 %v295_v49 }
  0x8b   :  { %1547 = vmatpush3.msra.mxu1 %v295_v49  ;;  %709 = vmatprep.mubr.f32.mxu0 %v112_v50 }
  0x8c   :  { %854 = vmatprep.mubr.f32.mxu1 %v114_v51  ;;  %710 = vmatmul.mubr.f32.gmra.mxu0 %v111_v52 }
  0x8d   :  { %855 = vmatmul.mubr.f32.gmra.mxu1 %v113_v53  ;;  %1486 = vmatprep.subr.mxu0 %v294_v54 }
  0x8e   :  { %1532 = vmatprep.subr.mxu1 %v294_v54  ;;  %1487 = vmatpush3.msra.mxu0 %v294_v54 }
  0x8f   :  { %1548 = vmatpush3.msra.mxu1 %v294_v54  ;;  %714 = vmatprep.mubr.f32.mxu0 %v121_v55 }
  0x90   :  { %859 = vmatprep.mubr.f32.mxu1 %v123_v56  ;;  %715 = vmatmul.mubr.f32.gmra.mxu0 %v120_v57 }
  0x91   :  { %860 = vmatmul.mubr.f32.gmra.mxu1 %v122_v58  ;;  %1488 = vmatprep.subr.mxu0 %v293_v59 }
  0x92   :  { %1533 = vmatprep.subr.mxu1 %v293_v59  ;;  %1489 = vmatpush3.msra.mxu0 %v293_v59 }
  0x93   :  { %1549 = vmatpush3.msra.mxu1 %v293_v59  ;;  %719 = vmatprep.mubr.f32.mxu0 %v130_v60 }
  0x94   :  { %864 = vmatprep.mubr.f32.mxu1 %v132_v61  ;;  %720 = vmatmul.mubr.f32.gmra.mxu0 %v129_v62 }
  0x95   :  { %865 = vmatmul.mubr.f32.gmra.mxu1 %v131_v63  ;;  %1490 = vmatprep.subr.mxu0 %v292_v0 }
  0x96   :  { %1534 = vmatprep.subr.mxu1 %v292_v0  ;;  %1491 = vmatpush3.msra.mxu0 %v292_v0 }
  0x97   :  { %1550 = vmatpush3.msra.mxu1 %v292_v0  ;;  %724 = vmatprep.mubr.f32.mxu0 %v139_v1 }
  0x98   :  { %869 = vmatprep.mubr.f32.mxu1 %v141_v2  ;;  %725 = vmatmul.mubr.f32.gmra.mxu0 %v138_v3 }
  0x99   :  { %870 = vmatmul.mubr.f32.gmra.mxu1 %v140_v4  ;;  %1492 = vmatprep.subr.mxu0 %v291_v5 }
  0x9a   :  { %1535 = vmatprep.subr.mxu1 %v291_v5  ;;  %1493 = vmatpush3.msra.mxu0 %v291_v5 }
  0x9b   :  { %1551 = vmatpush3.msra.mxu1 %v291_v5  ;;  %729 = vmatprep.mubr.f32.mxu0 %v148_v6 }
  0x9c   :  { %874 = vmatprep.mubr.f32.mxu1 %v150_v7  ;;  %730 = vmatmul.mubr.f32.gmra.mxu0 %v147_v8 }
  0x9d   :  { %875 = vmatmul.mubr.f32.gmra.mxu1 %v149_v9  ;;  %1494 = vmatprep.subr.mxu0 %v290_v10 }
  0x9e   :  { %1536 = vmatprep.subr.mxu1 %v290_v10  ;;  %1495 = vmatpush3.msra.mxu0 %v290_v10 }
  0x9f   :  { %1552 = vmatpush3.msra.mxu1 %v290_v10  ;;  %734 = vmatprep.mubr.f32.mxu0 %v157_v11 }
  0xa0   :  { %879 = vmatprep.mubr.f32.mxu1 %v159_v12  ;;  %735 = vmatmul.mubr.f32.gmra.mxu0 %v156_v13 }
  0xa1   :  { %880 = vmatmul.mubr.f32.gmra.mxu1 %v158_v14  ;;  %1496 = vmatprep.subr.mxu0 %v289_v15 }
  0xa2   :  { %1537 = vmatprep.subr.mxu1 %v289_v15  ;;  %1497 = vmatpush3.msra.mxu0 %v289_v15 }
  0xa3   :  { %1553 = vmatpush3.msra.mxu1 %v289_v15  ;;  %1498 = vmatprep.mubr.f32.mxu0 %v25_v16 }
  0xa4   :  { %1510 = vmatprep.mubr.f32.mxu1 %v97_v17  ;;  %1499 = vmatmul.mubr.f32.vlgmr.msra.gmra.mxu0 %v34_v18 }
  0xa5   :  { %1511 = vmatmul.mubr.f32.vlgmr.msra.gmra.mxu1 %v106_v19  ;;  %1501 = vmatprep.mubr.f32.mxu0 %v43_v20 }
  0xa6   :  { %1513 = vmatprep.mubr.f32.mxu1 %v115_v21 }
  0xa8   :  { %1502 = vmatmul.mubr.f32.gmra.mxu0 %v52_v22 }
  0xa9   :  { %1514 = vmatmul.mubr.f32.gmra.mxu1 %v124_v23  ;;  %1504 = vmatprep.mubr.f32.mxu0 %v61_v24 }
  0xaa   :  { %1516 = vmatprep.mubr.f32.mxu1 %v133_v25 }
  0xac   :  { %1505 = vmatmul.mubr.f32.gmra.mxu0 %v70_v26 }
  0xad   :  { %1517 = vmatmul.mubr.f32.gmra.mxu1 %v142_v27  ;;  %1507 = vmatprep.mubr.f32.mxu0 %v79_v28 }
  0xae   :  { %1519 = vmatprep.mubr.f32.mxu1 %v151_v29 }
  0xb0   :  { %1508 = vmatmul.mubr.f32.gmra.mxu0 %v88_v30 }
  0xb1   :  { %1520 = vmatmul.mubr.f32.gmra.mxu1 %v160_v31 }
  0xe4   :  { %v1146_v32 = vpop.f32.mrf.mxu0 }
  0xe5   :  { %v1226_v33 = vpop.f32.mrf.mxu1 }
  0xe6   :  { %v1147_v34 = vpop.f32.mrf.mxu0 }
  0xe7   :  { %v1227_v35 = vpop.f32.mrf.mxu1  ;;  %v1148_v36 = vadd.f32 %v1147_v34, %v1146_v32 }
  0xe8   :  { %v1228_v37 = vadd.f32 %v1227_v35, %v1226_v33  ;;  %v1149_v38 = vpop.f32.mrf.mxu0 }
  0xe9   :  { %v1229_v39 = vpop.f32.mrf.mxu1 }
  0xea   :  { %v2443_v40 = vadd.f32 %v1228_v37, %v1148_v36  ;;  %v1150_v41 = vpop.f32.mrf.mxu0 }
  0xeb   :  { %v1230_v42 = vpop.f32.mrf.mxu1  ;;  %v1151_v43 = vadd.f32 %v1150_v41, %v1149_v38 }
  0xec   :  { %v1231_v44 = vadd.f32 %v1230_v42, %v1229_v39  ;;  %v1152_v45 = vpop.f32.mrf.mxu0 }
  0xed   :  { %v1232_v46 = vpop.f32.mrf.mxu1 }
  0xee   :  { %v2445_v47 = vadd.f32 %v1231_v44, %v1151_v43  ;;  %v1153_v48 = vpop.f32.mrf.mxu0 }
  0xef   :  { %v1233_v49 = vpop.f32.mrf.mxu1  ;;  %v1154_v50 = vadd.f32 %v1153_v48, %v1152_v45 }
  0xf0   :  { %v1234_v51 = vadd.f32 %v1233_v49, %v1232_v46  ;;  %v1155_v52 = vpop.f32.mrf.mxu0 }
  0xf1   :  { %v1235_v53 = vpop.f32.mrf.mxu1 }
  0xf2   :  { %v2447_v54 = vadd.f32 %v1234_v51, %v1154_v50  ;;  %v1156_v55 = vpop.f32.mrf.mxu0 }
  0xf3   :  { %v1236_v56 = vpop.f32.mrf.mxu1  ;;  %v1157_v57 = vadd.f32 %v1156_v55, %v1155_v52 }
  0xf4   :  { %v1237_v58 = vadd.f32 %v1236_v56, %v1235_v53  ;;  %v1158_v59 = vpop.f32.mrf.mxu0 }
  0xf5   :  { %v1238_v60 = vpop.f32.mrf.mxu1 }
  0xf6   :  { %v2449_v61 = vadd.f32 %v1237_v58, %v1157_v57  ;;  %v1159_v62 = vpop.f32.mrf.mxu0 }
  0xf7   :  { %v1239_v63 = vpop.f32.mrf.mxu1  ;;  %v1160_v0 = vadd.f32 %v1159_v62, %v1158_v59 }
  0xf8   :  { %v1240_v1 = vadd.f32 %v1239_v63, %v1238_v60  ;;  %v1161_v2 = vpop.f32.mrf.mxu0 }
  0xf9   :  { %v1241_v3 = vpop.f32.mrf.mxu1 }
  0xfa   :  { %v2451_v4 = vadd.f32 %v1240_v1, %v1160_v0  ;;  %v1162_v5 = vpop.f32.mrf.mxu0 }
  0xfb   :  { %v1242_v6 = vpop.f32.mrf.mxu1  ;;  %v1163_v7 = vadd.f32 %v1162_v5, %v1161_v2 }
  0xfc   :  { %v1243_v8 = vadd.f32 %v1242_v6, %v1241_v3  ;;  %v1164_v9 = vpop.f32.mrf.mxu0 }
  0xfd   :  { %v1244_v10 = vpop.f32.mrf.mxu1 }
  0xfe   :  { %v2453_v11 = vadd.f32 %v1243_v8, %v1163_v7  ;;  %v1165_v12 = vpop.f32.mrf.mxu0 }
  0xff   :  { %v1245_v13 = vpop.f32.mrf.mxu1  ;;  %v1166_v14 = vadd.f32 %v1165_v12, %v1164_v9 }
 0x100   :  { %v1246_v15 = vadd.f32 %v1245_v13, %v1244_v10  ;;  %v1167_v16 = vpop.f32.mrf.mxu0 }
 0x101   :  { %v1247_v17 = vpop.f32.mrf.mxu1 }
 0x102   :  { %v2455_v18 = vadd.f32 %v1246_v15, %v1166_v14  ;;  %v1168_v19 = vpop.f32.mrf.mxu0 }
 0x103   :  { %v1248_v20 = vpop.f32.mrf.mxu1  ;;  %v1169_v21 = vadd.f32 %v1168_v19, %v1167_v16 }
 0x104   :  { %v1249_v22 = vadd.f32 %v1248_v20, %v1247_v17  ;;  %v1170_v23 = vpop.f32.mrf.mxu0 }
 0x105   :  { %v1250_v24 = vpop.f32.mrf.mxu1 }
 0x106   :  { %v2457_v25 = vadd.f32 %v1249_v22, %v1169_v21  ;;  %v1171_v26 = vpop.f32.mrf.mxu0 }
 0x107   :  { %v1251_v27 = vpop.f32.mrf.mxu1  ;;  %v1172_v28 = vadd.f32 %v1171_v26, %v1170_v23 }
 0x108   :  { %v1252_v29 = vadd.f32 %v1251_v27, %v1250_v24  ;;  %v1173_v30 = vpop.f32.mrf.mxu0 }
 0x109   :  { %v1253_v31 = vpop.f32.mrf.mxu1 }
 0x10a   :  { %v2459_v32 = vadd.f32 %v1252_v29, %v1172_v28  ;;  %v1174_v33 = vpop.f32.mrf.mxu0 }
 0x10b   :  { %v1254_v34 = vpop.f32.mrf.mxu1  ;;  %v1175_v35 = vadd.f32 %v1174_v33, %v1173_v30 }
 0x10c   :  { %2652 = vst [vmem:[#allocation2_spill] sm:$0xff] %v2459_v32  ;;  %v1255_v36 = vadd.f32 %v1254_v34, %v1253_v31  ;;  %v1176_v37 = vpop.f32.mrf.mxu0 }
 0x10d   :  { %v1256_v38 = vpop.f32.mrf.mxu1 }
 0x10e   :  { %v2461_v39 = vadd.f32 %v1255_v36, %v1175_v35  ;;  %v1177_v41 = vpop.f32.mrf.mxu0 }
 0x10f   :  { %v1257_v42 = vpop.f32.mrf.mxu1  ;;  %v1178_v43 = vadd.f32 %v1177_v41, %v1176_v37 }
 0x110   :  { %v1258_v44 = vadd.f32 %v1257_v42, %v1256_v38  ;;  %v1179_v45 = vpop.f32.mrf.mxu0 }
 0x111   :  { %v1259_v46 = vpop.f32.mrf.mxu1 }
 0x112   :  { %v2463_v48 = vadd.f32 %v1258_v44, %v1178_v43  ;;  %v1180_v49 = vpop.f32.mrf.mxu0 }
 0x113   :  { %v1260_v50 = vpop.f32.mrf.mxu1  ;;  %v1181_v51 = vadd.f32 %v1180_v49, %v1179_v45 }
 0x114   :  { %2653 = vst [vmem:[#allocation3_spill] sm:$0xff] %v2463_v48  ;;  %v1261_v52 = vadd.f32 %v1260_v50, %v1259_v46  ;;  %v1182_v53 = vpop.f32.mrf.mxu0 }
 0x115   :  { %v1262_v55 = vpop.f32.mrf.mxu1 }
 0x116   :  { %v2465_v56 = vadd.f32 %v1261_v52, %v1181_v51  ;;  %v1183_v57 = vpop.f32.mrf.mxu0 }
 0x117   :  { %v1263_v58 = vpop.f32.mrf.mxu1  ;;  %v1184_v59 = vadd.f32 %v1183_v57, %v1182_v53 }
 0x118   :  { %2654 = vst [vmem:[#allocation4_spill] sm:$0xff] %v2465_v56  ;;  %v1264_v60 = vadd.f32 %v1263_v58, %v1262_v55  ;;  %v1185_v62 = vpop.f32.mrf.mxu0 }
 0x119   :  { %v1265_v63 = vpop.f32.mrf.mxu1 }
 0x11a   :  { %v2467_v0 = vadd.f32 %v1264_v60, %v1184_v59  ;;  %v1186_v1 = vpop.f32.mrf.mxu0 }
 0x11b   :  { %v1266_v2 = vpop.f32.mrf.mxu1  ;;  %v1187_v3 = vadd.f32 %v1186_v1, %v1185_v62 }
 0x11c   :  { %2655 = vst [vmem:[#allocation5_spill] sm:$0xff] %v2467_v0  ;;  %v1267_v5 = vadd.f32 %v1266_v2, %v1265_v63  ;;  %v1188_v6 = vpop.f32.mrf.mxu0 }
 0x11d   :  { %v1268_v7 = vpop.f32.mrf.mxu1 }
 0x11e   :  { %v2469_v8 = vadd.f32 %v1267_v5, %v1187_v3  ;;  %v1189_v9 = vpop.f32.mrf.mxu0 }
 0x11f   :  { %v1269_v10 = vpop.f32.mrf.mxu1  ;;  %v1190_v12 = vadd.f32 %v1189_v9, %v1188_v6 }
 0x120   :  { %2656 = vst [vmem:[#allocation6_spill] sm:$0xff] %v2469_v8  ;;  %v1270_v13 = vadd.f32 %v1269_v10, %v1268_v7  ;;  %v1191_v14 = vpop.f32.mrf.mxu0 }
 0x121   :  { %v1271_v15 = vpop.f32.mrf.mxu1 }
 0x122   :  { %v2471_v16 = vadd.f32 %v1270_v13, %v1190_v12  ;;  %v1192_v17 = vpop.f32.mrf.mxu0 }
 0x123   :  { %v1272_v19 = vpop.f32.mrf.mxu1  ;;  %v1193_v20 = vadd.f32 %v1192_v17, %v1191_v14 }
 0x124   :  { %2657 = vst [vmem:[#allocation7_spill] sm:$0xff] %v2471_v16  ;;  %v1273_v21 = vadd.f32 %v1272_v19, %v1271_v15  ;;  %v1306_v22 = vpop.f32.mrf.mxu0 }
 0x125   :  { %v1386_v23 = vpop.f32.mrf.mxu1 }
 0x126   :  { %v2473_v24 = vadd.f32 %v1273_v21, %v1193_v20  ;;  %v1307_v26 = vpop.f32.mrf.mxu0 }
 0x127   :  { %v1387_v27 = vpop.f32.mrf.mxu1 }
 0x128   :  { %2658 = vst [vmem:[#allocation8_spill] sm:$0xff] %v2473_v24  ;;  %v1309_v28 = vpop.f32.mrf.mxu0  ;;  %v1308_v24 = vadd.f32 %v1307_v26, %v1306_v22 }
 0x129   :  { %v2475_v29 = vpop.f32.mrf.mxu1 }
 0x12a   :  { %v1310_v30 = vpop.f32.mrf.mxu0 }
 0x12b   :  { %v1390_v31 = vpop.f32.mrf.mxu1  ;;  %v1311_v0 = vadd.f32 %v1310_v30, %v1309_v28 }
 0x12c   :  { %v1312_v33 = vpop.f32.mrf.mxu0 }
 0x12d   :  { %v2477_v34 = vpop.f32.mrf.mxu1 }
 0x12e   :  { %v1313_v35 = vpop.f32.mrf.mxu0 }
 0x12f   :  { %v1393_v36 = vpop.f32.mrf.mxu1  ;;  %v1314_v56 = vadd.f32 %v1313_v35, %v1312_v33  ;;  %v1391_v35 = vadd.f32 %v1390_v31, %v2475_v29 }
 0x130   :  { %v1315_v37 = vpop.f32.mrf.mxu0 }
 0x131   :  { %v1395_v38 = vpop.f32.mrf.mxu1  ;;  %v672_v22 = vadd.f32 %v1314_v56, %v2447_v54 }
 0x132   :  { %v1316_v41 = vpop.f32.mrf.mxu0 }
 0x133   :  { %v1396_v42 = vpop.f32.mrf.mxu1 }
 0x134   :  { %v1318_v43 = vpop.f32.mrf.mxu0 }
 0x135   :  { %v1398_v44 = vpop.f32.mrf.mxu1 }
 0x136   :  { %v1319_v45 = vpop.f32.mrf.mxu0 }
 0x137   :  { %v1399_v46 = vpop.f32.mrf.mxu1 }
 0x138   :  { %v1321_v49 = vpop.f32.mrf.mxu0 }
 0x139   :  { %v2479_v50 = vpop.f32.mrf.mxu1 }
 0x13a   :  { %v1322_v51 = vpop.f32.mrf.mxu0 }
 0x13b   :  { %v2481_v52 = vpop.f32.mrf.mxu1  ;;  %v1323_v32 = vadd.f32 %v1322_v51, %v1321_v49 }
 0x13c   :  { %v1324_v53 = vpop.f32.mrf.mxu0 }
 0x13d   :  { %v2483_v55 = vpop.f32.mrf.mxu1  ;;  %v687_v54 = vadd.f32 %v1323_v32, %v2453_v11  ;;  %v2667_v32 = vld [vmem:[#allocation2_spill] sm:$0xff] }
 0x13e   :  { %v1325_v57 = vpop.f32.mrf.mxu0 }
 0x13f   :  { %v2485_v58 = vpop.f32.mrf.mxu1  ;;  %v1326_v28 = vadd.f32 %v1325_v57, %v1324_v53 }
 0x140   :  { %v1327_v59 = vpop.f32.mrf.mxu0  ;;  %v1406_v11 = vadd.f32 %v2485_v58, %v2483_v55 }
 0x141   :  { %v2487_v60 = vpop.f32.mrf.mxu1  ;;  %v692_v49 = vadd.f32 %v1326_v28, %v2455_v18  ;;  %v2679_v28 = vld [vmem:[#allocation6_spill] sm:$0xff] }
 0x142   :  { %2659 = vst [vmem:[#allocation9_spill] sm:$0xff] %v2487_v60  ;;  %v1328_v62 = vpop.f32.mrf.mxu0 }
 0x143   :  { %v2489_v63 = vpop.f32.mrf.mxu1 }
 0x144   :  { %2660 = vst [vmem:[#allocation10_spill] sm:$0xff] %v2489_v63  ;;  %v1330_v1 = vpop.f32.mrf.mxu0  ;;  %v662_v63 = vadd.f32 %v1308_v24, %v2443_v40  ;;  %v1394_v24 = vadd.f32 %v1393_v36, %v2477_v34  ;;  %v1403_v34 = vadd.f32 %v2481_v52, %v2479_v50  ;;  %v2670_v50 = vld [vmem:[#allocation3_spill] sm:$0xff] }
 0x145   :  { %v2491_v2 = vpop.f32.mrf.mxu1 }
 0x146   :  { %2661 = vst [vmem:[#allocation11_spill] sm:$0xff] %v2491_v2  ;;  %v1331_v3 = vpop.f32.mrf.mxu0  ;;  %v2518_v53 = vadd.f32 %v1394_v24, %v672_v22  ;;  %v2678_v22 = vld [vmem:[#allocation5_spill] sm:$0xff] }
 0x147   :  { %v2493_v5 = vpop.f32.mrf.mxu1 }
 0x148   :  { %2662 = vst [vmem:[#allocation12_spill] sm:$0xff] %v2493_v5  ;;  %v1333_v6 = vpop.f32.mrf.mxu0  ;;  %v1317_v5 = vadd.f32 %v1316_v41, %v1315_v37  ;;  %v1329_v41 = vadd.f32 %v1328_v62, %v1327_v59 }
 0x149   :  { %v1413_v7 = vpop.f32.mrf.mxu1  ;;  %v2668_v62 = vld [vmem:[#allocation9_spill] sm:$0xff] }
 0x14a   :  { %v1334_v9 = vpop.f32.mrf.mxu0  ;;  %v677_v26 = vadd.f32 %v1317_v5, %v2449_v61  ;;  %v697_v36 = vadd.f32 %v1329_v41, %v2457_v25  ;;  %v2532_v25 = vadd.f32 %v1403_v34, %v687_v54  ;;  %v2680_v54 = vld [vmem:[#allocation7_spill] sm:$0xff] }
 0x14b   :  { %v1414_v10 = vpop.f32.mrf.mxu1  ;;  %v1335_v40 = vadd.f32 %v1334_v9, %v1333_v6  ;;  %v2673_v9 = vld [vmem:[#allocation4_spill] sm:$0xff] }
 0x14c   :  { %v1336_v12 = vpop.f32.mrf.mxu0 }
 0x14d   :  { %v2495_v13 = vpop.f32.mrf.mxu1 }
 0x14e   :  { %2663 = vst [vmem:[#allocation13_spill] sm:$0xff] %v2495_v13  ;;  %v1337_v14 = vpop.f32.mrf.mxu0  ;;  %v1320_v13 = vadd.f32 %v1319_v45, %v1318_v43  ;;  %v1397_v43 = vadd.f32 %v1396_v42, %v1395_v38  ;;  %v1332_v45 = vadd.f32 %v1331_v3, %v1330_v1  ;;  %v707_v38 = vadd.f32 %v1335_v40, %v2461_v39  ;;  %v2671_v39 = vld [vmem:[#allocation11_spill] sm:$0xff] }
 0x14f   :  { %v2497_v15 = vpop.f32.mrf.mxu1  ;;  %v1338_v61 = vadd.f32 %v1337_v14, %v1336_v12  ;;  %v1415_v3 = vadd.f32 %v1414_v10, %v1413_v7  ;;  %v2672_v5 = vld [vmem:[#allocation12_spill] sm:$0xff] }
 0x150   :  { %2664 = vst [vmem:[#allocation14_spill] sm:$0xff] %v2497_v15  ;;  %v1339_v17 = vpop.f32.mrf.mxu0  ;;  %v682_v37 = vadd.f32 %v1320_v13, %v2451_v4  ;;  %v822_v4 = vadd.f32 %v1397_v43, %v677_v26  ;;  %v702_v18 = vadd.f32 %v1332_v45, %v2667_v32  ;;  %v1412_v6 = vadd.f32 %v2672_v5, %v2671_v39 }
 0x151   :  { %v2499_v19 = vpop.f32.mrf.mxu1  ;;  %v712_v52 = vadd.f32 %v1338_v61, %v2670_v50 }
 0x152   :  { %2665 = vst [vmem:[#allocation15_spill] sm:$0xff] %v2499_v19  ;;  %v1340_v20 = vpop.f32.mrf.mxu0  ;;  %v667_v19 = vadd.f32 %v1311_v0, %v2445_v47  ;;  %v847_v40 = vadd.f32 %v1412_v6, %v702_v18 }
 0x153   :  { %v2501_v21 = vpop.f32.mrf.mxu1  ;;  %v1341_v51 = vadd.f32 %v1340_v20, %v1339_v17 }
 0x154   :  { %2666 = vst [vmem:[#allocation16_spill] sm:$0xff] %v2501_v21  ;;  %v1342_v16 = vpop.f32.mrf.mxu0  ;;  %v1388_v21 = vadd.f32 %v1387_v27, %v1386_v23  ;;  %v1400_v27 = vadd.f32 %v1399_v46, %v1398_v44  ;;  %v812_v56 = vadd.f32 %v1391_v35, %v667_v19  ;;  %v852_v19 = vadd.f32 %v1415_v3, %v707_v38 }
 0x155   :  { %v2503_v8 = vpop.f32.mrf.mxu1  ;;  %v717_v12 = vadd.f32 %v1341_v51, %v2673_v9 }
 0x156   :  { %v1343_v2 = vpop.f32.mrf.mxu0  ;;  %v807_v23 = vadd.f32 %v1388_v21, %v662_v63  ;;  %v2524_v42 = vadd.f32 %v1400_v27, %v682_v37  ;;  %v2669_v63 = vld [vmem:[#allocation10_spill] sm:$0xff] }
 0x157   :  { %v2505_v48 = vpop.f32.mrf.mxu1  ;;  %v1344_v44 = vadd.f32 %v1343_v2, %v1342_v16  ;;  %v1409_v1 = vadd.f32 %v2669_v63, %v2668_v62  ;;  %v2537_v16 = vadd.f32 %v1406_v11, %v692_v49  ;;  %v2674_v2 = vld [vmem:[#allocation13_spill] sm:$0xff]  ;;  %v2675_v14 = vld [vmem:[#allocation14_spill] sm:$0xff]  ;;  %v2681_v49 = vld [vmem:[#allocation8_spill] sm:$0xff] }
 0x158   :  { %v1345_v15 = vpop.f32.mrf.mxu0  ;;  %v2550_v37 = vld [vmem:[%s2649_s2] ss:$0 sm:$0xff]  ;;  %v1424_v24 = vadd.f32 %v2505_v48, %v2503_v8 }
 0x159   :  { %v2508_v60 = vpop.f32.mrf.mxu1  ;;  %v2541_v7 = vadd.f32 %v1409_v1, %v697_v36  ;;  %v2676_v10 = vld [vmem:[#allocation15_spill] sm:$0xff]  ;;  %v722_v26 = vadd.f32 %v1344_v44, %v2678_v22 }
 0x15a   :  { %v1346_v30 = vpop.f32.mrf.mxu0 }
 0x15b   :  { %v1426_v33 = vpop.f32.mrf.mxu1  ;;  %v1347_v46 = vadd.f32 %v1346_v30, %v1345_v15  ;;  %v1418_v15 = vadd.f32 %v2675_v14, %v2674_v2  ;;  %v2677_v20 = vld [vmem:[#allocation16_spill] sm:$0xff] }
 0x15c   :  { %v1348_v47 = vpop.f32.mrf.mxu0  ;;  %v1421_v21 = vadd.f32 %v2677_v20, %v2676_v10  ;;  %v1427_v27 = vadd.f32 %v1426_v33, %v2508_v60 }
 0x15d   :  { %v1428_v0 = vpop.f32.mrf.mxu1  ;;  %v727_v30 = vadd.f32 %v1347_v46, %v2679_v28  ;;  %v867_v46 = vadd.f32 %v1424_v24, %v722_v26 }
 0x15e   :  { %v1349_v29 = vpop.f32.mrf.mxu0  ;;  %v862_v38 = vadd.f32 %v1421_v21, %v717_v12 }
 0x15f   :  { %v1429_v31 = vpop.f32.mrf.mxu1  ;;  %v1350_v55 = vadd.f32 %v1349_v29, %v1348_v47  ;;  %v857_v47 = vadd.f32 %v1418_v15, %v712_v52  ;;  %v2560_v29 = vld [vmem:[%s2650_s3] ss:$0 sm:$0xff]  ;;  %v872_v44 = vadd.f32 %v1427_v27, %v727_v30 }
 0x160   :  { %v1351_v57 = vpop.f32.mrf.mxu0  ;;  %v1430_v32 = vadd.f32 %v1429_v31, %v1428_v0 }
 0x161   :  { %v1431_v59 = vpop.f32.mrf.mxu1  ;;  %v732_v61 = vadd.f32 %v1350_v55, %v2680_v54 }
 0x162   :  { %v1352_v58 = vpop.f32.mrf.mxu0 }
 0x163   :  { %v1432_v13 = vpop.f32.mrf.mxu1  ;;  %v1353_v17 = vadd.f32 %v1352_v58, %v1351_v57  ;;  %v877_v5 = vadd.f32 %v1430_v32, %v732_v61 }
 0x164   :  { %v1500_v35 = vpop.f32.mrf.mxu0  ;;  %v1433_v60 = vadd.f32 %v1432_v13, %v1431_v59 }
 0x165   :  { %v1512_v41 = vpop.f32.mrf.mxu1  ;;  %v957_v43 = vadd.f32 %v1500_v35, %v812_v56  ;;  %v737_v51 = vadd.f32 %v1353_v17, %v2681_v49 }
 0x166   :  { %v997_v45 = vadd.f32 %v1512_v41, %v852_v19  ;;  %v951_v34 = vpop.f32.mrf.mxu0 }
 0x167   :  { %v991_v36 = vpop.f32.mrf.mxu1  ;;  %v1038_v11 = vmul.f32 %v2550_v37, %v957_v43  ;;  %v952_v8 = vadd.f32 %v951_v34, %v807_v23  ;;  %v882_v23 = vadd.f32 %v1433_v60, %v737_v51 }
 0x168   :  { %v1046_v48 = vmul.f32 %v2550_v37, %v997_v45  ;;  %v992_v56 = vadd.f32 %v991_v36, %v847_v40  ;;  %v1503_v33 = vpop.f32.mrf.mxu0 }
 0x169   :  { %v1515_v18 = vpop.f32.mrf.mxu1  ;;  %v1061_v57 = vadd.f32 %v2560_v29, %v1038_v11  ;;  %v1037_v63 = vmul.f32 %v2550_v37, %v952_v8  ;;  %v967_v3 = vadd.f32 %v1503_v33, %v822_v4 }
 0x16a   :  { %v1069_v62 = vadd.f32 %v2560_v29, %v1046_v48  ;;  %v1045_v1 = vmul.f32 %v2550_v37, %v992_v56  ;;  %v1007_v50 = vadd.f32 %v1515_v18, %v862_v38  ;;  %v961_v52 = vpop.f32.mrf.mxu0 }
 0x16b   :  { %v1001_v39 = vpop.f32.mrf.mxu1  ;;  %v1077_v0 = vmax.f32 %v1061_v57, 0.0  ;;  %v1060_v59 = vadd.f32 %v2560_v29, %v1037_v63  ;;  %v1040_v9 = vmul.f32 %v2550_v37, %v967_v3  ;;  %v962_v55 = vadd.f32 %v961_v52, %v2518_v53 }
 0x16c   :  { %v1085_v31 = vmax.f32 %v1069_v62, 0.0  ;;  %v1068_v6 = vadd.f32 %v2560_v29, %v1045_v1  ;;  %v1048_v12 = vmul.f32 %v2550_v37, %v1007_v50  ;;  %v1002_v58 = vadd.f32 %v1001_v39, %v857_v47  ;;  %v1506_v13 = vpop.f32.mrf.mxu0 }
 0x16d   :  { %v1518_v4 = vpop.f32.mrf.mxu1  ;;  %1093 = vst [vmem:[%s2651_s4 + $0x8] sm:$0xff] %v1077_v0  ;;  %v1076_v2 = vmax.f32 %v1060_v59, 0.0  ;;  %v977_v15 = vadd.f32 %v1506_v13, %v2532_v25  ;;  %v1063_v19 = vadd.f32 %v2560_v29, %v1040_v9  ;;  %v1039_v10 = vmul.f32 %v2550_v37, %v962_v55 }
 0x16e   :  { %1101 = vst [vmem:[%s2651_s4 + $0x48] sm:$0xff] %v1085_v31  ;;  %v1084_v14 = vmax.f32 %v1068_v6, 0.0  ;;  %v1017_v17 = vadd.f32 %v1518_v4, %v872_v44  ;;  %v1071_v53 = vadd.f32 %v2560_v29, %v1048_v12  ;;  %v1047_v20 = vmul.f32 %v2550_v37, %v1002_v58  ;;  %v971_v21 = vpop.f32.mrf.mxu0 }
 0x16f   :  { %v1011_v22 = vpop.f32.mrf.mxu1  ;;  %1092 = vst [vmem:[%s2651_s4] sm:$0xff] %v1076_v2  ;;  %v1042_v25 = vmul.f32 %v2550_v37, %v977_v15  ;;  %v972_v28 = vadd.f32 %v971_v21, %v2524_v42  ;;  %v1079_v35 = vmax.f32 %v1063_v19, 0.0  ;;  %v1062_v40 = vadd.f32 %v2560_v29, %v1039_v10 }
 0x170   :  { %1100 = vst [vmem:[%s2651_s4 + $0x40] sm:$0xff] %v1084_v14  ;;  %v1050_v26 = vmul.f32 %v2550_v37, %v1017_v17  ;;  %v1012_v30 = vadd.f32 %v1011_v22, %v867_v46  ;;  %v1087_v41 = vmax.f32 %v1071_v53, 0.0  ;;  %v1070_v24 = vadd.f32 %v2560_v29, %v1047_v20  ;;  %v1509_v43 = vpop.f32.mrf.mxu0 }
 0x171   :  { %v1521_v45 = vpop.f32.mrf.mxu1  ;;  %v1065_v47 = vadd.f32 %v2560_v29, %v1042_v25  ;;  %v1041_v54 = vmul.f32 %v2550_v37, %v972_v28  ;;  %1095 = vst [vmem:[%s2651_s4 + $0x18] sm:$0xff] %v1079_v35  ;;  %v1078_v42 = vmax.f32 %v1062_v40, 0.0  ;;  %v987_v51 = vadd.f32 %v1509_v43, %v2541_v7 }
 0x172   :  { %v1073_v27 = vadd.f32 %v2560_v29, %v1050_v26  ;;  %v1049_v61 = vmul.f32 %v2550_v37, %v1012_v30  ;;  %1103 = vst [vmem:[%s2651_s4 + $0x58] sm:$0xff] %v1087_v41  ;;  %v1086_v49 = vmax.f32 %v1070_v24, 0.0  ;;  %v1027_v34 = vadd.f32 %v1521_v45, %v882_v23  ;;  %v981_v36 = vpop.f32.mrf.mxu0 }
 0x173   :  { %v1021_v38 = vpop.f32.mrf.mxu1  ;;  %v1081_v11 = vmax.f32 %v1065_v47, 0.0  ;;  %v1064_v8 = vadd.f32 %v2560_v29, %v1041_v54  ;;  %1094 = vst [vmem:[%s2651_s4 + $0x10] sm:$0xff] %v1078_v42  ;;  %v1044_v32 = vmul.f32 %v2550_v37, %v987_v51  ;;  %v982_v60 = vadd.f32 %v981_v36, %v2537_v16 }
 0x174   :  { %v1089_v48 = vmax.f32 %v1073_v27, 0.0  ;;  %v1072_v56 = vadd.f32 %v2560_v29, %v1049_v61  ;;  %1102 = vst [vmem:[%s2651_s4 + $0x50] sm:$0xff] %v1086_v49  ;;  %v1052_v7 = vmul.f32 %v2550_v37, %v1027_v34  ;;  %v1022_v33 = vadd.f32 %v1021_v38, %v877_v5 }
 0x175   :  { %1097 = vst [vmem:[%s2651_s4 + $0x28] sm:$0xff] %v1081_v11  ;;  %v1080_v18 = vmax.f32 %v1064_v8, 0.0  ;;  %v1067_v46 = vadd.f32 %v2560_v29, %v1044_v32  ;;  %v1043_v62 = vmul.f32 %v2550_v37, %v982_v60 }
 0x176   :  { %1105 = vst [vmem:[%s2651_s4 + $0x68] sm:$0xff] %v1089_v48  ;;  %v1088_v44 = vmax.f32 %v1072_v56, 0.0  ;;  %v1075_v57 = vadd.f32 %v2560_v29, %v1052_v7  ;;  %v1051_v63 = vmul.f32 %v2550_v37, %v1022_v33 }
 0x177   :  { %1096 = vst [vmem:[%s2651_s4 + $0x20] sm:$0xff] %v1080_v18  ;;  %v1083_v16 = vmax.f32 %v1067_v46, 0.0  ;;  %v1066_v3 = vadd.f32 %v2560_v29, %v1043_v62 }
 0x178   :  { %1104 = vst [vmem:[%s2651_s4 + $0x60] sm:$0xff] %v1088_v44  ;;  %v1091_v1 = vmax.f32 %v1075_v57, 0.0  ;;  %v1074_v50 = vadd.f32 %v2560_v29, %v1051_v63 }
 0x179   :  { %1099 = vst [vmem:[%s2651_s4 + $0x38] sm:$0xff] %v1083_v16  ;;  %v1082_v37 = vmax.f32 %v1066_v3, 0.0 }
 0x17a   :  { %1107 = vst [vmem:[%s2651_s4 + $0x78] sm:$0xff] %v1091_v1  ;;  %v1090_v52 = vmax.f32 %v1074_v50, 0.0 }
 0x17b   :  { %1098 = vst [vmem:[%s2651_s4 + $0x30] sm:$0xff] %v1082_v37 }
 0x17c   :  { %1106 = vst [vmem:[%s2651_s4 + $0x70] sm:$0xff] %v1090_v52 }

// kernel: forward_pallas.17
= control target key start
LH: loop header
LB: loop body
LE: loop exit
PB: predicated region body
PF: predicated region fallthrough
CT: control target
= control target key end

     0   :  { %v174_v0 = vmov 0.0   ;;  %vm175_vm0 = vmmov 0   ;;  %vm111_vm1 = vcmask 7168   ;;  %s253_s1 = inlined_call_operand.vmem [shape: f32[128,1], index: 1, kind: input, shape index: {}]   ;;  %s254_s2 = inlined_call_operand.<no memory space> [shape: f32[1,1], index: 2, kind: input, shape index: {}]   ;;  %s255_s0 = inlined_call_operand.vmem [shape: f32[8,128], index: 0, kind: input, shape index: {}]   ;;  %s256_s3 = inlined_call_operand.vmem [shape: f32[8,1], index: 3, kind: output, shape index: {}]  }
   0x1   :  { %135 = vmatprep.subr.mxu0 %v174_v0  ;;  %v32_v1 = vld [vmem:[%s253_s1 + $0x78] sm:$0xff]  ;;  %v31_v2 = vld [vmem:[%s253_s1 + $0x70] sm:$0xff]  ;;  %167 = vmatprep.mubr.msk.f32.mxu0 %vm175_vm0, %v174_v0  ;;  %v8_v3 = vstv %s254_s2  ;;  %v30_v4 = vld [vmem:[%s253_s1 + $0x68] sm:$0xff] }
   0x2   :  { %136 = vmatpush3.msra.mxu0 %v32_v1  ;;  %9 = vst [vmem:[#allocation2] sm:$0x1] %v8_v3  ;;  %v29_v5 = vld [vmem:[%s253_s1 + $0x60] sm:$0xff]  ;;  %v28_v6 = vld [vmem:[%s253_s1 + $0x58] sm:$0xff]  ;;  %v27_v7 = vld [vmem:[%s253_s1 + $0x50] sm:$0xff] }
   0x3   :  { %137 = vmatprep.subr.mxu0 %v174_v0  ;;  %v26_v8 = vld [vmem:[%s253_s1 + $0x48] sm:$0xff]  ;;  %v25_v9 = vld [vmem:[%s253_s1 + $0x40] sm:$0xff]  ;;  %v24_v10 = vld [vmem:[%s253_s1 + $0x38] sm:$0xff] }
   0x4   :  { %138 = vmatpush3.msra.mxu0 %v31_v2  ;;  %v23_v11 = vld [vmem:[%s253_s1 + $0x30] sm:$0xff]  ;;  %v22_v12 = vld [vmem:[%s253_s1 + $0x28] sm:$0xff]  ;;  %v21_v13 = vld [vmem:[%s253_s1 + $0x20] sm:$0xff] }
   0x5   :  { %139 = vmatprep.subr.mxu0 %v174_v0  ;;  %v20_v14 = vld [vmem:[%s253_s1 + $0x18] sm:$0xff]  ;;  %v19_v15 = vld [vmem:[%s253_s1 + $0x10] sm:$0xff]  ;;  %v18_v16 = vld [vmem:[%s253_s1 + $0x8] sm:$0xff] }
   0x6   :  { %140 = vmatpush3.msra.mxu0 %v30_v4  ;;  %v17_v17 = vld [vmem:[%s253_s1] sm:$0xff] }
   0x7   :  { %141 = vmatprep.subr.mxu0 %v174_v0  ;;  %v16_v18 = vld [vmem:[%s255_s0] sm:$0xff] }
   0x8   :  { %142 = vmatpush3.msra.mxu0 %v29_v5 }
   0x9   :  { %143 = vmatprep.subr.mxu0 %v174_v0  ;;  %v117_v19 = vld [vmem:[#allocation2] ss:$0 sm:$0xff] }
   0xa   :  { %144 = vmatpush3.msra.mxu0 %v28_v6 }
   0xb   :  { %145 = vmatprep.subr.mxu0 %v174_v0 }
   0xc   :  { %146 = vmatpush3.msra.mxu0 %v27_v7 }
   0xd   :  { %147 = vmatprep.subr.mxu0 %v174_v0 }
   0xe   :  { %148 = vmatpush3.msra.mxu0 %v26_v8 }
   0xf   :  { %149 = vmatprep.subr.mxu0 %v174_v0 }
  0x10   :  { %150 = vmatpush3.msra.mxu0 %v25_v9 }
  0x11   :  { %151 = vmatprep.subr.mxu0 %v174_v0 }
  0x12   :  { %152 = vmatpush3.msra.mxu0 %v24_v10 }
  0x13   :  { %153 = vmatprep.subr.mxu0 %v174_v0 }
  0x14   :  { %154 = vmatpush3.msra.mxu0 %v23_v11 }
  0x15   :  { %155 = vmatprep.subr.mxu0 %v174_v0 }
  0x16   :  { %156 = vmatpush3.msra.mxu0 %v22_v12 }
  0x17   :  { %157 = vmatprep.subr.mxu0 %v174_v0 }
  0x18   :  { %158 = vmatpush3.msra.mxu0 %v21_v13 }
  0x19   :  { %159 = vmatprep.subr.mxu0 %v174_v0 }
  0x1a   :  { %160 = vmatpush3.msra.mxu0 %v20_v14 }
  0x1b   :  { %161 = vmatprep.subr.mxu0 %v174_v0 }
  0x1c   :  { %162 = vmatpush3.msra.mxu0 %v19_v15 }
  0x1d   :  { %163 = vmatprep.subr.mxu0 %v174_v0 }
  0x1e   :  { %164 = vmatpush3.msra.mxu0 %v18_v16 }
  0x1f   :  { %165 = vmatprep.subr.mxu0 %v174_v0 }
  0x20   :  { %166 = vmatpush3.msra.mxu0 %v17_v17 }
  0x21   :  { %168 = vmatmul.mubr.f32.vlgmr.msra.gmra.mxu0 %v16_v18 }
  0xe1   :  { %v106_v20 = vpop.f32.mrf.mxu0 }
  0xe2   :  { %v107_v21 = vadd.f32 %v117_v19, %v106_v20 }
  0xe3   :  { %v169_v22 = vpop.f32.mrf.mxu0 }
  0xe4   :  { %172 = vtanh.f32 %v107_v21 }
  0xf1   :  { %v173_v23 = vpop.eup %172 }
  0xf2   :  { %112 = vst.msk [vmem:[%s256_s3] sm:$0xff] %vm111_vm1, %v173_v23 }

// kernel: forward_pallas.15
= control target key start
LH: loop header
LB: loop body
LE: loop exit
PB: predicated region body
PF: predicated region fallthrough
CT: control target
= control target key end

     0   :  { %v169_v0 = vmov 0.0   ;;  %vm170_vm0 = vmmov 0   ;;  %vm108_vm1 = vcmask 523264   ;;  %s248_s1 = inlined_call_operand.vmem [shape: f32[128,64], index: 1, kind: input, shape index: {}]   ;;  %s249_s0 = inlined_call_operand.vmem [shape: f32[8,128], index: 0, kind: input, shape index: {}]   ;;  %s250_s2 = inlined_call_operand.vmem [shape: f32[1,64], index: 2, kind: input, shape index: {}]   ;;  %s251_s3 = inlined_call_operand.vmem [shape: f32[8,64], index: 3, kind: output, shape index: {}]  }
   0x1   :  { %132 = vmatprep.subr.mxu0 %v169_v0  ;;  %v30_v1 = vld [vmem:[%s248_s1 + $0x78] sm:$0xff]  ;;  %v29_v2 = vld [vmem:[%s248_s1 + $0x70] sm:$0xff]  ;;  %164 = vmatprep.mubr.msk.f32.mxu0 %vm170_vm0, %v169_v0  ;;  %v28_v3 = vld [vmem:[%s248_s1 + $0x68] sm:$0xff] }
   0x2   :  { %133 = vmatpush3.msra.mxu0 %v30_v1  ;;  %v27_v4 = vld [vmem:[%s248_s1 + $0x60] sm:$0xff]  ;;  %v26_v5 = vld [vmem:[%s248_s1 + $0x58] sm:$0xff]  ;;  %v25_v6 = vld [vmem:[%s248_s1 + $0x50] sm:$0xff] }
   0x3   :  { %134 = vmatprep.subr.mxu0 %v169_v0  ;;  %v24_v7 = vld [vmem:[%s248_s1 + $0x48] sm:$0xff]  ;;  %v23_v8 = vld [vmem:[%s248_s1 + $0x40] sm:$0xff]  ;;  %v22_v9 = vld [vmem:[%s248_s1 + $0x38] sm:$0xff] }
   0x4   :  { %135 = vmatpush3.msra.mxu0 %v29_v2  ;;  %v21_v10 = vld [vmem:[%s248_s1 + $0x30] sm:$0xff]  ;;  %v20_v11 = vld [vmem:[%s248_s1 + $0x28] sm:$0xff]  ;;  %v19_v12 = vld [vmem:[%s248_s1 + $0x20] sm:$0xff] }
   0x5   :  { %136 = vmatprep.subr.mxu0 %v169_v0  ;;  %v18_v13 = vld [vmem:[%s248_s1 + $0x18] sm:$0xff]  ;;  %v17_v14 = vld [vmem:[%s248_s1 + $0x10] sm:$0xff]  ;;  %v16_v15 = vld [vmem:[%s248_s1 + $0x8] sm:$0xff] }
   0x6   :  { %137 = vmatpush3.msra.mxu0 %v28_v3  ;;  %v15_v16 = vld [vmem:[%s248_s1] sm:$0xff] }
   0x7   :  { %138 = vmatprep.subr.mxu0 %v169_v0  ;;  %v14_v17 = vld [vmem:[%s249_s0] sm:$0xff] }
   0x8   :  { %139 = vmatpush3.msra.mxu0 %v27_v4  ;;  %v114_v18 = vld [vmem:[%s250_s2] ss:$0 sm:$0xff] }
   0x9   :  { %140 = vmatprep.subr.mxu0 %v169_v0 }
   0xa   :  { %141 = vmatpush3.msra.mxu0 %v26_v5 }
   0xb   :  { %142 = vmatprep.subr.mxu0 %v169_v0 }
   0xc   :  { %143 = vmatpush3.msra.mxu0 %v25_v6 }
   0xd   :  { %144 = vmatprep.subr.mxu0 %v169_v0 }
   0xe   :  { %145 = vmatpush3.msra.mxu0 %v24_v7 }
   0xf   :  { %146 = vmatprep.subr.mxu0 %v169_v0 }
  0x10   :  { %147 = vmatpush3.msra.mxu0 %v23_v8 }
  0x11   :  { %148 = vmatprep.subr.mxu0 %v169_v0 }
  0x12   :  { %149 = vmatpush3.msra.mxu0 %v22_v9 }
  0x13   :  { %150 = vmatprep.subr.mxu0 %v169_v0 }
  0x14   :  { %151 = vmatpush3.msra.mxu0 %v21_v10 }
  0x15   :  { %152 = vmatprep.subr.mxu0 %v169_v0 }
  0x16   :  { %153 = vmatpush3.msra.mxu0 %v20_v11 }
  0x17   :  { %154 = vmatprep.subr.mxu0 %v169_v0 }
  0x18   :  { %155 = vmatpush3.msra.mxu0 %v19_v12 }
  0x19   :  { %156 = vmatprep.subr.mxu0 %v169_v0 }
  0x1a   :  { %157 = vmatpush3.msra.mxu0 %v18_v13 }
  0x1b   :  { %158 = vmatprep.subr.mxu0 %v169_v0 }
  0x1c   :  { %159 = vmatpush3.msra.mxu0 %v17_v14 }
  0x1d   :  { %160 = vmatprep.subr.mxu0 %v169_v0 }
  0x1e   :  { %161 = vmatpush3.msra.mxu0 %v16_v15 }
  0x1f   :  { %162 = vmatprep.subr.mxu0 %v169_v0 }
  0x20   :  { %163 = vmatpush3.msra.mxu0 %v15_v16 }
  0x21   :  { %165 = vmatmul.mubr.f32.vlgmr.msra.gmra.mxu0 %v14_v17 }
  0xe1   :  { %v104_v19 = vpop.f32.mrf.mxu0 }
  0xe2   :  { %v105_v20 = vadd.f32 %v114_v18, %v104_v19 }
  0xe3   :  { %v166_v21 = vpop.f32.mrf.mxu0 }
  0xe4   :  { %109 = vst.msk [vmem:[%s251_s3] sm:$0xff] %vm108_vm1, %v105_v20 }

</bundles_post_ra>
